<compile_context>
chip_gen: v6e
topology: v6e:2x2x1
jax: 0.10.0
libtpu: 0.0.40
codegen_flags: <defaults>
</compile_context>

<pallas_src>
import functools

import jax
import jax.numpy as jnp
from jax.experimental import pallas as pl


FEAT = 512      # conv output channels / per-branch feature dim
HID = 128       # 1024 // 8 hidden width of the gate MLPs
NCLS = 11       # number of classes


# -----------------------------------------------------------------------------
# Fully fused kernel: dual conv + bias + ReLU + GAP + gate MLPs + classifiers
# -----------------------------------------------------------------------------
def fusion30_kernel(pat_ref, convw_ref, convb_ref, w1_ref, b1_ref, w2_ref, w3_ref,
                    o_ref, *, batch, hw):
    """Single-invocation Fusion30 forward.

    pat_ref:   (2, batch*hw, K)  bf16  im2col patches, one row block per branch
    convw_ref: (2, K, FEAT)      bf16  conv weights per branch
    convb_ref: (2, 1, FEAT)      f32   conv biases per branch
    w1_ref:    (2*FEAT, 3*HID)   bf16  cols [0:128)=wf1_a, [128:256)=wf2_a,
                                       [256:267)=cls1_w (rows 0:512),
                                       [267:278)=cls2_w (rows 512:1024); scaled by 1/hw
    b1_ref:    (1, 3*HID)        f32   classifier biases in the cls columns
    w2_ref:    (2*HID, 2*HID)    bf16  blockdiag(wf1_b, wf2_b)
    w3_ref:    (2*HID, HID)      bf16  wf1_c in cols [0:11), wf2_c in cols [11:22)
    o_ref:     (batch, NCLS)     f32
    """
    # ---- BCNN feature extractors: conv-as-matmul + bias + ReLU + global pool ----
    feats = []
    for br in range(2):                                   # static unroll, 2 branches
        acc = jnp.dot(pat_ref[br], convw_ref[br],
                      preferred_element_type=jnp.float32)           # (batch*hw, FEAT) f32
        act = jnp.maximum(acc + convb_ref[br], 0.0)
        # raw spatial sums; the 1/hw mean scale is folded into w1 rows at fuse time
        rows = [jnp.sum(act[b * hw:(b + 1) * hw], axis=0, keepdims=True)
                for b in range(batch)]
        feats.append(jnp.concatenate(rows, axis=0).astype(jnp.bfloat16))  # (batch, FEAT)
    f1, f2 = feats

    # ---- stage 1: first gate-MLP layers of both gates + both classifiers, fused ----
    # xf = [f1 | f2] is never materialized: xf @ W1 = f1 @ W1[:FEAT] + f2 @ W1[FEAT:].
    s1 = (jnp.dot(f1, w1_ref[0:FEAT, :], preferred_element_type=jnp.float32)
          + jnp.dot(f2, w1_ref[FEAT:2 * FEAT, :], preferred_element_type=jnp.float32)
          + b1_ref[...])                                             # (batch, 3*HID)
    h = jnp.maximum(s1[:, 0:2 * HID], 0.0)                           # [h1 | h2]
    y1 = s1[:, 2 * HID:2 * HID + NCLS]                               # bcnn1 class scores
    y2 = s1[:, 2 * HID + NCLS:2 * HID + 2 * NCLS]                    # bcnn2 class scores

    # ---- stages 2+3: remaining (bias-free) gate-MLP layers, block-diagonal fused ----
    h = jnp.maximum(
        jnp.dot(h.astype(jnp.bfloat16), w2_ref[...],
                preferred_element_type=jnp.float32), 0.0)            # (batch, 2*HID)
    g = jnp.dot(h.astype(jnp.bfloat16), w3_ref[...],
                preferred_element_type=jnp.float32)                  # (batch, HID)
    wf = 1.0 / (1.0 + jnp.exp(-g))                                   # sigmoid gates (EUP)

    o_ref[...] = wf[:, 0:NCLS] * y1 + wf[:, NCLS:2 * NCLS] * y2


def fusion30_pallas(pat, conv_w, conv_b, w1, b1, w2, w3, *, batch, hw):
    kernel = functools.partial(fusion30_kernel, batch=batch, hw=hw)
    # Grid-less call: all operands (~1.3 MiB incl. bf16 head weights) and the two
    # (batch*hw, 512) f32 activations fit comfortably in scoped VMEM on v5e/v6e/v7x.
    return pl.pallas_call(
        kernel,
        out_shape=jax.ShapeDtypeStruct((batch, NCLS), jnp.float32),
    )(pat, conv_w, conv_b, w1, b1, w2, w3)


# -----------------------------------------------------------------------------
# Parameter construction (deterministic, synthetic) and one-time fusion/repack
# -----------------------------------------------------------------------------
def make_params(key, cin=3):
    ks = iter(jax.random.split(key, 16))
    nrm = lambda shape, s=0.05: (s * jax.random.normal(next(ks), shape)).astype(jnp.float32)

    p = {}
    # two BCNN backbones (features) + their 11-way classifiers
    p["conv1_w"], p["conv1_b"] = nrm((FEAT, cin, 3, 3)), nrm((FEAT,))
    p["conv2_w"], p["conv2_b"] = nrm((FEAT, cin, 3, 3)), nrm((FEAT,))
    p["cls1_w"], p["cls1_b"] = nrm((FEAT, NCLS)), nrm((NCLS,))
    p["cls2_w"], p["cls2_b"] = nrm((FEAT, NCLS)), nrm((NCLS,))
    # weightf1 / weightf2: Linear(1024,128,F) ReLU Linear(128,128,F) ReLU Linear(128,11,F) Sigmoid
    p["wf1_a"], p["wf1_b"], p["wf1_c"] = nrm((2 * FEAT, HID)), nrm((HID, HID)), nrm((HID, NCLS))
    p["wf2_a"], p["wf2_b"], p["wf2_c"] = nrm((2 * FEAT, HID)), nrm((HID, HID)), nrm((HID, NCLS))
    return p


def fuse_params(p, hw):
    """One-time repacking into kernel-friendly bf16 layouts (outside the hot path)."""
    cin = p["conv1_w"].shape[1]
    K = cin * 9
    conv_w = jnp.stack([p["conv1_w"].reshape(FEAT, K).T,
                        p["conv2_w"].reshape(FEAT, K).T]).astype(jnp.bfloat16)   # (2, K, 512)
    conv_b = jnp.stack([p["conv1_b"].reshape(1, FEAT),
                        p["conv2_b"].reshape(1, FEAT)])                          # (2, 1, 512) f32

    # Stage-1 matrix (1024, 384): gate layer-A for both gates + both classifiers,
    # classifiers sharing one 128-lane column block via disjoint row halves.
    w1 = jnp.zeros((2 * FEAT, 3 * HID), jnp.float32)
    w1 = w1.at[:, 0:HID].set(p["wf1_a"])
    w1 = w1.at[:, HID:2 * HID].set(p["wf2_a"])
    w1 = w1.at[0:FEAT, 2 * HID:2 * HID + NCLS].set(p["cls1_w"])
    w1 = w1.at[FEAT:2 * FEAT, 2 * HID + NCLS:2 * HID + 2 * NCLS].set(p["cls2_w"])
    w1 = (w1 * (1.0 / hw)).astype(jnp.bfloat16)          # fold global-avg-pool scale

    b1 = jnp.zeros((1, 3 * HID), jnp.float32)
    b1 = b1.at[0, 2 * HID:2 * HID + NCLS].set(p["cls1_b"])
    b1 = b1.at[0, 2 * HID + NCLS:2 * HID + 2 * NCLS].set(p["cls2_b"])

    w2 = jnp.zeros((2 * HID, 2 * HID), jnp.float32)
    w2 = w2.at[0:HID, 0:HID].set(p["wf1_b"])
    w2 = w2.at[HID:2 * HID, HID:2 * HID].set(p["wf2_b"])
    w2 = w2.astype(jnp.bfloat16)

    w3 = jnp.zeros((2 * HID, HID), jnp.float32)
    w3 = w3.at[0:HID, 0:NCLS].set(p["wf1_c"])
    w3 = w3.at[HID:2 * HID, NCLS:2 * NCLS].set(p["wf2_c"])
    w3 = w3.astype(jnp.bfloat16)

    return {"conv_w": conv_w, "conv_b": conv_b,
            "w1": w1, "b1": b1, "w2": w2, "w3": w3}


def im2col_3x3(x):
    """x: (B, C, H, W) -> (B, H*W, C*9) patches for a 3x3, stride-1, pad-1 conv."""
    B, C, H, W = x.shape
    xp = jnp.pad(x, ((0, 0), (0, 0), (1, 1), (1, 1)))
    cols = [xp[:, :, ki:ki + H, kj:kj + W] for ki in range(3) for kj in range(3)]
    pat = jnp.stack(cols, axis=2)                                # (B, C, 9, H, W)
    return pat.transpose(0, 3, 4, 1, 2).reshape(B, H * W, C * 9)


@jax.jit
def fusion30_forward(x1, x2, fp):
    B, C, H, W = x1.shape
    HW = H * W
    # stacked im2col patches for both branches, bf16 for the MXU (f32 accumulation)
    pat = jnp.stack([im2col_3x3(x1), im2col_3x3(x2)], axis=0)    # (2, B, HW, C*9)
    pat = pat.reshape(2, B * HW, C * 9).astype(jnp.bfloat16)
    return fusion30_pallas(pat, fp["conv_w"], fp["conv_b"],
                           fp["w1"], fp["b1"], fp["w2"], fp["w3"],
                           batch=B, hw=HW)


if __name__ == "__main__":
    key = jax.random.PRNGKey(0)
    kp, k1, k2 = jax.random.split(key, 3)

    B, C, H, W = 2, 3, 16, 16
    params = make_params(kp, cin=C)
    fused = fuse_params(params, hw=H * W)

    x1 = jax.random.normal(k1, (B, C, H, W), dtype=jnp.float32)
    x2 = jax.random.normal(k2, (B, C, H, W), dtype=jnp.float32)

    out = fusion30_forward(x1, x2, fused)
    jax.block_until_ready(out)
    assert out.shape == (B, NCLS), out.shape
    print("KERNEL_OK")
</pallas_src>

<mosaic_0001>
module attributes {stable_mosaic.version = 11 : i64} {
  func.func @fusion30_kernel(%arg0: memref<2x512x27xbf16, #tpu.memory_space<vmem>>, %arg1: memref<2x27x512xbf16, #tpu.memory_space<vmem>>, %arg2: memref<2x1x512xf32, #tpu.memory_space<vmem>>, %arg3: memref<1024x384xbf16, #tpu.memory_space<vmem>>, %arg4: memref<1x384xf32, #tpu.memory_space<vmem>>, %arg5: memref<256x256xbf16, #tpu.memory_space<vmem>>, %arg6: memref<256x128xbf16, #tpu.memory_space<vmem>>, %arg7: memref<2x11xf32, #tpu.memory_space<vmem>>) attributes {dimension_semantics = [], scalar_prefetch = 0 : i64, scratch_operands = 0 : i64, tpu.core_type = #tpu.core_type<tc>} {
    %c0 = arith.constant 0 : index
    %c0_0 = arith.constant 0 : index
    %c0_1 = arith.constant 0 : index
    %0 = vector.load %arg0[%c0, %c0_0, %c0_1] : memref<2x512x27xbf16, #tpu.memory_space<vmem>>, vector<1x512x27xbf16>
    %1 = vector.shape_cast %0 : vector<1x512x27xbf16> to vector<512x27xbf16>
    %c0_2 = arith.constant 0 : index
    %c0_3 = arith.constant 0 : index
    %c0_4 = arith.constant 0 : index
    %2 = vector.load %arg1[%c0_2, %c0_3, %c0_4] : memref<2x27x512xbf16, #tpu.memory_space<vmem>>, vector<1x27x512xbf16>
    %3 = vector.shape_cast %2 : vector<1x27x512xbf16> to vector<27x512xbf16>
    %cst = arith.constant dense<0.000000e+00> : vector<512x512xf32>
    %4 = tpu.matmul %1, %3, %cst {dimension_numbers = #tpu.dot_dimension_numbers<[1], [0], [0], [1], [0, 0, 1, 1], [], []>} : vector<512x27xbf16>, vector<27x512xbf16>, vector<512x512xf32> -> vector<512x512xf32>
    %c0_5 = arith.constant 0 : index
    %c0_6 = arith.constant 0 : index
    %c0_7 = arith.constant 0 : index
    %5 = vector.load %arg2[%c0_5, %c0_6, %c0_7] : memref<2x1x512xf32, #tpu.memory_space<vmem>>, vector<1x1x512xf32>
    %6 = vector.shape_cast %5 : vector<1x1x512xf32> to vector<1x512xf32>
    %7 = vector.broadcast %6 : vector<1x512xf32> to vector<512x512xf32>
    %8 = arith.addf %4, %7 : vector<512x512xf32>
    %cst_8 = arith.constant 0.000000e+00 : f32
    %9 = vector.broadcast %cst_8 : f32 to vector<512x512xf32>
    %10 = arith.maximumf %8, %9 : vector<512x512xf32>
    %11 = vector.extract_strided_slice %10 {offsets = [0, 0], sizes = [256, 512], strides = [1, 1]} : vector<512x512xf32> to vector<256x512xf32>
    %cst_9 = arith.constant dense<0.000000e+00> : vector<512xf32>
    %12 = vector.multi_reduction <add>, %11, %cst_9 [0] : vector<256x512xf32> to vector<512xf32>
    %13 = vector.shape_cast %12 : vector<512xf32> to vector<1x512xf32>
    %14 = vector.extract_strided_slice %10 {offsets = [256, 0], sizes = [256, 512], strides = [1, 1]} : vector<512x512xf32> to vector<256x512xf32>
    %cst_10 = arith.constant dense<0.000000e+00> : vector<512xf32>
    %15 = vector.multi_reduction <add>, %14, %cst_10 [0] : vector<256x512xf32> to vector<512xf32>
    %16 = vector.shape_cast %15 : vector<512xf32> to vector<1x512xf32>
    %17 = tpu.concatenate %13, %16 in 0 : vector<1x512xf32>, vector<1x512xf32> -> vector<2x512xf32>
    %18 = arith.truncf %17 : vector<2x512xf32> to vector<2x512xbf16>
    %c1 = arith.constant 1 : index
    %c0_11 = arith.constant 0 : index
    %c0_12 = arith.constant 0 : index
    %19 = vector.load %arg0[%c1, %c0_11, %c0_12] : memref<2x512x27xbf16, #tpu.memory_space<vmem>>, vector<1x512x27xbf16>
    %20 = vector.shape_cast %19 : vector<1x512x27xbf16> to vector<512x27xbf16>
    %c1_13 = arith.constant 1 : index
    %c0_14 = arith.constant 0 : index
    %c0_15 = arith.constant 0 : index
    %21 = vector.load %arg1[%c1_13, %c0_14, %c0_15] : memref<2x27x512xbf16, #tpu.memory_space<vmem>>, vector<1x27x512xbf16>
    %22 = vector.shape_cast %21 : vector<1x27x512xbf16> to vector<27x512xbf16>
    %cst_16 = arith.constant dense<0.000000e+00> : vector<512x512xf32>
    %23 = tpu.matmul %20, %22, %cst_16 {dimension_numbers = #tpu.dot_dimension_numbers<[1], [0], [0], [1], [0, 0, 1, 1], [], []>} : vector<512x27xbf16>, vector<27x512xbf16>, vector<512x512xf32> -> vector<512x512xf32>
    %c1_17 = arith.constant 1 : index
    %c0_18 = arith.constant 0 : index
    %c0_19 = arith.constant 0 : index
    %24 = vector.load %arg2[%c1_17, %c0_18, %c0_19] : memref<2x1x512xf32, #tpu.memory_space<vmem>>, vector<1x1x512xf32>
    %25 = vector.shape_cast %24 : vector<1x1x512xf32> to vector<1x512xf32>
    %26 = vector.broadcast %25 : vector<1x512xf32> to vector<512x512xf32>
    %27 = arith.addf %23, %26 : vector<512x512xf32>
    %cst_20 = arith.constant 0.000000e+00 : f32
    %28 = vector.broadcast %cst_20 : f32 to vector<512x512xf32>
    %29 = arith.maximumf %27, %28 : vector<512x512xf32>
    %30 = vector.extract_strided_slice %29 {offsets = [0, 0], sizes = [256, 512], strides = [1, 1]} : vector<512x512xf32> to vector<256x512xf32>
    %cst_21 = arith.constant dense<0.000000e+00> : vector<512xf32>
    %31 = vector.multi_reduction <add>, %30, %cst_21 [0] : vector<256x512xf32> to vector<512xf32>
    %32 = vector.shape_cast %31 : vector<512xf32> to vector<1x512xf32>
    %33 = vector.extract_strided_slice %29 {offsets = [256, 0], sizes = [256, 512], strides = [1, 1]} : vector<512x512xf32> to vector<256x512xf32>
    %cst_22 = arith.constant dense<0.000000e+00> : vector<512xf32>
    %34 = vector.multi_reduction <add>, %33, %cst_22 [0] : vector<256x512xf32> to vector<512xf32>
    %35 = vector.shape_cast %34 : vector<512xf32> to vector<1x512xf32>
    %36 = tpu.concatenate %32, %35 in 0 : vector<1x512xf32>, vector<1x512xf32> -> vector<2x512xf32>
    %37 = arith.truncf %36 : vector<2x512xf32> to vector<2x512xbf16>
    %c0_23 = arith.constant 0 : index
    %c0_24 = arith.constant 0 : index
    %38 = vector.load %arg3[%c0_23, %c0_24] : memref<1024x384xbf16, #tpu.memory_space<vmem>>, vector<512x384xbf16>
    %cst_25 = arith.constant dense<0.000000e+00> : vector<2x384xf32>
    %39 = tpu.matmul %18, %38, %cst_25 {dimension_numbers = #tpu.dot_dimension_numbers<[1], [0], [0], [1], [0, 0, 1, 1], [], []>} : vector<2x512xbf16>, vector<512x384xbf16>, vector<2x384xf32> -> vector<2x384xf32>
    %c512 = arith.constant 512 : index
    %c0_26 = arith.constant 0 : index
    %40 = vector.load %arg3[%c512, %c0_26] : memref<1024x384xbf16, #tpu.memory_space<vmem>>, vector<512x384xbf16>
    %cst_27 = arith.constant dense<0.000000e+00> : vector<2x384xf32>
    %41 = tpu.matmul %37, %40, %cst_27 {dimension_numbers = #tpu.dot_dimension_numbers<[1], [0], [0], [1], [0, 0, 1, 1], [], []>} : vector<2x512xbf16>, vector<512x384xbf16>, vector<2x384xf32> -> vector<2x384xf32>
    %42 = arith.addf %39, %41 : vector<2x384xf32>
    %c0_28 = arith.constant 0 : index
    %c0_29 = arith.constant 0 : index
    %43 = vector.load %arg4[%c0_28, %c0_29] : memref<1x384xf32, #tpu.memory_space<vmem>>, vector<1x384xf32>
    %44 = vector.broadcast %43 : vector<1x384xf32> to vector<2x384xf32>
    %45 = arith.addf %42, %44 : vector<2x384xf32>
    %46 = vector.extract_strided_slice %45 {offsets = [0, 0], sizes = [2, 256], strides = [1, 1]} : vector<2x384xf32> to vector<2x256xf32>
    %cst_30 = arith.constant 0.000000e+00 : f32
    %47 = vector.broadcast %cst_30 : f32 to vector<2x256xf32>
    %48 = arith.maximumf %46, %47 : vector<2x256xf32>
    %49 = vector.extract_strided_slice %45 {offsets = [0, 256], sizes = [2, 11], strides = [1, 1]} : vector<2x384xf32> to vector<2x11xf32>
    %50 = vector.extract_strided_slice %45 {offsets = [0, 267], sizes = [2, 11], strides = [1, 1]} : vector<2x384xf32> to vector<2x11xf32>
    %51 = arith.truncf %48 : vector<2x256xf32> to vector<2x256xbf16>
    %c0_31 = arith.constant 0 : index
    %c0_32 = arith.constant 0 : index
    %52 = vector.load %arg5[%c0_31, %c0_32] : memref<256x256xbf16, #tpu.memory_space<vmem>>, vector<256x256xbf16>
    %cst_33 = arith.constant dense<0.000000e+00> : vector<2x256xf32>
    %53 = tpu.matmul %51, %52, %cst_33 {dimension_numbers = #tpu.dot_dimension_numbers<[1], [0], [0], [1], [0, 0, 1, 1], [], []>} : vector<2x256xbf16>, vector<256x256xbf16>, vector<2x256xf32> -> vector<2x256xf32>
    %cst_34 = arith.constant 0.000000e+00 : f32
    %54 = vector.broadcast %cst_34 : f32 to vector<2x256xf32>
    %55 = arith.maximumf %53, %54 : vector<2x256xf32>
    %56 = arith.truncf %55 : vector<2x256xf32> to vector<2x256xbf16>
    %c0_35 = arith.constant 0 : index
    %c0_36 = arith.constant 0 : index
    %57 = vector.load %arg6[%c0_35, %c0_36] : memref<256x128xbf16, #tpu.memory_space<vmem>>, vector<256x128xbf16>
    %cst_37 = arith.constant dense<0.000000e+00> : vector<2x128xf32>
    %58 = tpu.matmul %56, %57, %cst_37 {dimension_numbers = #tpu.dot_dimension_numbers<[1], [0], [0], [1], [0, 0, 1, 1], [], []>} : vector<2x256xbf16>, vector<256x128xbf16>, vector<2x128xf32> -> vector<2x128xf32>
    %cst_38 = arith.constant 0.000000e+00 : f32
    %59 = vector.broadcast %cst_38 : f32 to vector<2x128xf32>
    %60 = arith.subf %59, %58 : vector<2x128xf32>
    %61 = math.exp %60 : vector<2x128xf32>
    %cst_39 = arith.constant 1.000000e+00 : f32
    %62 = vector.broadcast %cst_39 : f32 to vector<2x128xf32>
    %63 = arith.addf %62, %61 : vector<2x128xf32>
    %cst_40 = arith.constant 1.000000e+00 : f32
    %64 = vector.broadcast %cst_40 : f32 to vector<2x128xf32>
    %65 = arith.divf %64, %63 : vector<2x128xf32>
    %66 = vector.extract_strided_slice %65 {offsets = [0, 0], sizes = [2, 11], strides = [1, 1]} : vector<2x128xf32> to vector<2x11xf32>
    %67 = arith.mulf %66, %49 : vector<2x11xf32>
    %68 = vector.extract_strided_slice %65 {offsets = [0, 11], sizes = [2, 11], strides = [1, 1]} : vector<2x128xf32> to vector<2x11xf32>
    %69 = arith.mulf %68, %50 : vector<2x11xf32>
    %70 = arith.addf %67, %69 : vector<2x11xf32>
    %c0_41 = arith.constant 0 : index
    %c0_42 = arith.constant 0 : index
    %71 = vector.load %arg7[%c0_41, %c0_42] : memref<2x11xf32, #tpu.memory_space<vmem>>, vector<2x11xf32>
    tpu.vector_store %arg7[%c0_41, %c0_42], %70 {strides = array<i32>} : memref<2x11xf32, #tpu.memory_space<vmem>>, vector<2x11xf32>,
    return
  }
}

</mosaic_0001>

<bundles_post_ra>
// kernel: fusion30_forward.1
= control target key start
LH: loop header
LB: loop body
LE: loop exit
PB: predicated region body
PF: predicated region fallthrough
CT: control target
= control target key end

     0   :  { %vm415_vm0 = vcmask 1044480   ;;  %vm416_vm1 = vcmask 1045504   ;;  %v6501_v2 = vmov 65535   ;;  %v6502_v5 = vmov 0   ;;  %s8937_s0 = inlined_call_operand.vmem [shape: bf16[2,512,27], index: 0, kind: input, shape index: {}]   ;;  %s8938_s1 = inlined_call_operand.vmem [shape: bf16[2,27,512], index: 1, kind: input, shape index: {}]   ;;  %s8939_s2 = inlined_call_operand.vmem [shape: f32[2,1,512], index: 2, kind: input, shape index: {}]   ;;  %s8940_s3 = inlined_call_operand.vmem [shape: bf16[1024,384], index: 3, kind: input, shape index: {}]   ;;  %s8941_s4 = inlined_call_operand.vmem [shape: f32[1,384], index: 4, kind: input, shape index: {}]   ;;  %s8942_s5 = inlined_call_operand.vmem [shape: bf16[256,256], index: 5, kind: input, shape index: {}]   ;;  %s8943_s6 = inlined_call_operand.vmem [shape: bf16[256,128], index: 6, kind: input, shape index: {}]   ;;  %s8944_s7 = inlined_call_operand.hbm [shape: f32[2,11], index: 7, kind: output, shape index: {}]  }
   0x1   :  { %v6065_v0 = vld [vmem:[%s8938_s1 + $0x24] ss:$16 sps:$4 sm:$0x3f]   ;;  %v6067_v1 = vld [vmem:[%s8938_s1 + $0x20] ss:$16 sps:$4 sm:$0x3f]   ;;  %463 = vmatprep.mubr.bf16.mxu0 %v6502_v5  ;;  %763 = vmatprep.mubr.bf16.mxu1 %v6502_v5 }
   0x2   :  { %v417_v3 = vsel %vm415_vm0, 4294967295, %v6501_v2  ;;  %v6068_v8 = vld [vmem:[%s8938_s1 + $0x4] ss:$16 sps:$4 sm:$0xff]   ;;  %v6073_v9 = vld [vmem:[%s8938_s1 + $0x28] ss:$16 sps:$4 sm:$0x3f]  }
   0x3   :  { %v418_v4 = vsel %vm416_vm1, %v417_v3, 0  ;;  %v6075_v10 = vld [vmem:[%s8938_s1 + $0x2c] ss:$16 sps:$4 sm:$0x3f]   ;;  %v6070_v11 = vld [vmem:[%s8938_s1] ss:$16 sps:$4 sm:$0xff]  }
   0x4   :  { %v423_v6 = vand.u32 %v6065_v0, %v418_v4  ;;  %v420_v7 = vand.u32 %v6067_v1, %v418_v4  ;;  %v429_v12 = vand.u32 %v6075_v10, %v418_v4  ;;  %v6071_v13 = vld [vmem:[%s8937_s0] sm:$0xff]   ;;  %v6072_v14 = vld [vmem:[%s8937_s0 + $0xf0] sm:$0xff]   ;;  %vm318_vm2 = vcmask 220160   ;;  %v6080_v16 = vld [vmem:[%s8938_s1 + $0xc] ss:$16 sps:$4 sm:$0xff]  }
   0x5   :  { %v426_v15 = vand.u32 %v6073_v9, %v418_v4  ;;  %v6084_v17 = vld [vmem:[%s8938_s1 + $0x6c] ss:$16 sps:$4 sm:$0x3f]   ;;  %v6078_v18 = vld [vmem:[%s8938_s1 + $0x8] ss:$16 sps:$4 sm:$0xff]   ;;  %v6081_v27 = vld [vmem:[%s8937_s0 + $0x10] sm:$0xff]  }
   0x6   :  { %443 = vmatprep.subr.bf16.mxu0 %v423_v6  ;;  %6057 = vmatprep.subr.bf16.mxu1 %v423_v6  ;;  %v6086_v19 = vld [vmem:[%s8938_s1 + $0x60] ss:$16 sps:$4 sm:$0x3f]   ;;  %v6088_v20 = vld [vmem:[%s8938_s1 + $0x64] ss:$16 sps:$4 sm:$0x3f]   ;;  %v2097_v21 = vand.u32 %v6084_v17, %v418_v4 }
   0x7   :  { %444 = vmatpush1.bf16.msra.mxu0 %v420_v7  ;;  %6059 = vmatpush1.bf16.msra.mxu1 %v420_v7  ;;  %v2088_v22 = vand.u32 %v6086_v19, %v418_v4  ;;  %v6076_v23 = vld [vmem:[%s8937_s0 + $0x8] sm:$0xff]   ;;  %v2091_v24 = vand.u32 %v6088_v20, %v418_v4  ;;  %v6077_v25 = vld [vmem:[%s8937_s0 + $0xf8] sm:$0xff]   ;;  %v6107_v31 = vld [vmem:[%s8938_s1 + $0x40] ss:$16 sps:$4 sm:$0xff]  }
   0x8   :  { %445 = vmatprep.subr.bf16.mxu0 %v6068_v8  ;;  %6058 = vmatprep.subr.bf16.mxu1 %v6068_v8  ;;  %v6082_v26 = vld [vmem:[%s8938_s1 + $0x68] ss:$16 sps:$4 sm:$0x3f]   ;;  %v6106_v30 = vld [vmem:[%s8938_s1 + $0x4c] ss:$16 sps:$4 sm:$0xff]   ;;  %v6089_v34 = vld [vmem:[%s8937_s0 + $0x20] sm:$0xff]  }
   0x9   :  { %v2094_v28 = vand.u32 %v6082_v26, %v418_v4  ;;  %v6104_v29 = vld [vmem:[%s8938_s1 + $0x48] ss:$16 sps:$4 sm:$0xff]   ;;  %v6109_v32 = vld [vmem:[%s8938_s1 + $0x44] ss:$16 sps:$4 sm:$0xff]  }
   0xa   :  { %v6085_v33 = vld [vmem:[%s8937_s0 + $0x18] sm:$0xff]   ;;  %v6090_v35 = vld [vmem:[%s8937_s0 + $0x28] sm:$0xff]   ;;  %v6091_v36 = vld [vmem:[%s8937_s0 + $0x30] sm:$0xff]  }
   0xb   :  { %446 = vmatpush1.bf16.msra.mxu0 %v6070_v11  ;;  %6060 = vmatpush1.bf16.msra.mxu1 %v6070_v11  ;;  %v6092_v37 = vld [vmem:[%s8937_s0 + $0x38] sm:$0xff]   ;;  %v6093_v38 = vld [vmem:[%s8937_s0 + $0x40] sm:$0xff]   ;;  %v6094_v39 = vld [vmem:[%s8937_s0 + $0x48] sm:$0xff]  }
   0xc   :  { %796 = vmatprep.subr.bf16.mxu1 %v429_v12  ;;  %2111 = vmatprep.subr.bf16.mxu0 %v2091_v24  ;;  %v6095_v40 = vld [vmem:[%s8937_s0 + $0x50] sm:$0xff]   ;;  %v6096_v41 = vld [vmem:[%s8937_s0 + $0x58] sm:$0xff]   ;;  %v6097_v42 = vld [vmem:[%s8937_s0 + $0x60] sm:$0xff]  }
   0xd   :  { %v6098_v43 = vld [vmem:[%s8937_s0 + $0x68] sm:$0xff]   ;;  %v6099_v44 = vld [vmem:[%s8937_s0 + $0x70] sm:$0xff]   ;;  %v6100_v45 = vld [vmem:[%s8937_s0 + $0x78] sm:$0xff]  }
   0xe   :  { %5466 = vmatmul.mubr.msk.bf16.vlgmr.msra.gmra.mxu0 %vm318_vm2, %v6071_v13  ;;  %5496 = vmatmul.mubr.msk.bf16.vlgmr.msra.gmra.mxu1 %vm318_vm2, %v6072_v14  ;;  %v6101_v46 = vld [vmem:[%s8937_s0 + $0x80] sm:$0xff]   ;;  %v6102_v47 = vld [vmem:[%s8937_s0 + $0x88] sm:$0xff]   ;;  %v6103_v48 = vld [vmem:[%s8937_s0 + $0x90] sm:$0xff]  }
   0xf   :  { %797 = vmatpush1.bf16.msra.mxu1 %v426_v15  ;;  %473 = vmatprep.mubr.bf16.mxu0 %v6502_v5  ;;  %v6110_v49 = vld [vmem:[%s8937_s0 + $0x98] sm:$0xff]   ;;  %v6111_v50 = vld [vmem:[%s8937_s0 + $0xa0] sm:$0xff]  }
  0x10   :  { %773 = vmatprep.mubr.bf16.mxu1 %v6502_v5  ;;  %798 = vmatprep.subr.bf16.mxu1 %v6080_v16 }
  0x11   :  { %2112 = vmatpush1.bf16.msra.mxu0 %v2088_v22 }
  0x12   :  { %2113 = vmatprep.subr.bf16.mxu0 %v6109_v32 }
  0x13   :  { %799 = vmatpush1.bf16.msra.mxu1 %v6078_v18 }
  0x14   :  { %2464 = vmatprep.subr.bf16.mxu1 %v2097_v21 }
  0x15   :  { %2114 = vmatpush1.bf16.msra.mxu0 %v6107_v31 }
  0x16   :  { %5467 = vmatmul.mubr.msk.bf16.gmra.mxu0 %vm318_vm2, %v6076_v23  ;;  %5497 = vmatmul.mubr.msk.bf16.gmra.mxu1 %vm318_vm2, %v6077_v25 }
  0x17   :  { %483 = vmatprep.mubr.bf16.mxu0 %v6502_v5  ;;  %816 = vmatprep.mubr.bf16.mxu1 %v6502_v5 }
  0x1e   :  { %5468 = vmatmul.mubr.msk.bf16.gmra.mxu0 %vm318_vm2, %v6081_v27  ;;  %5498 = vmatmul.mubr.msk.bf16.vlgmr.msra.gmra.mxu1 %vm318_vm2, %v6071_v13 }
  0x1f   :  { %2465 = vmatpush1.bf16.msra.mxu1 %v2094_v28  ;;  %493 = vmatprep.mubr.bf16.mxu0 %v6502_v5 }
  0x20   :  { %826 = vmatprep.mubr.bf16.mxu1 %v6502_v5  ;;  %2466 = vmatprep.subr.bf16.mxu1 %v6106_v30 }
  0x23   :  { %2467 = vmatpush1.bf16.msra.mxu1 %v6104_v29 }
  0x26   :  { %5469 = vmatmul.mubr.msk.bf16.gmra.mxu0 %vm318_vm2, %v6085_v33  ;;  %5499 = vmatmul.mubr.msk.bf16.gmra.mxu1 %vm318_vm2, %v6076_v23 }
  0x27   :  { %503 = vmatprep.mubr.bf16.mxu0 %v6502_v5  ;;  %836 = vmatprep.mubr.bf16.mxu1 %v6502_v5 }
  0x2e   :  { %5470 = vmatmul.mubr.msk.bf16.gmra.mxu0 %vm318_vm2, %v6089_v34  ;;  %5500 = vmatmul.mubr.msk.bf16.gmra.mxu1 %vm318_vm2, %v6081_v27 }
  0x2f   :  { %513 = vmatprep.mubr.bf16.mxu0 %v6502_v5  ;;  %846 = vmatprep.mubr.bf16.mxu1 %v6502_v5 }
  0x36   :  { %5471 = vmatmul.mubr.msk.bf16.gmra.mxu0 %vm318_vm2, %v6090_v35  ;;  %5501 = vmatmul.mubr.msk.bf16.gmra.mxu1 %vm318_vm2, %v6085_v33 }
  0x37   :  { %523 = vmatprep.mubr.bf16.mxu0 %v6502_v5  ;;  %856 = vmatprep.mubr.bf16.mxu1 %v6502_v5 }
  0x3e   :  { %5472 = vmatmul.mubr.msk.bf16.gmra.mxu0 %vm318_vm2, %v6091_v36  ;;  %5502 = vmatmul.mubr.msk.bf16.gmra.mxu1 %vm318_vm2, %v6089_v34 }
  0x3f   :  { %533 = vmatprep.mubr.bf16.mxu0 %v6502_v5  ;;  %866 = vmatprep.mubr.bf16.mxu1 %v6502_v5 }
  0x46   :  { %5473 = vmatmul.mubr.msk.bf16.gmra.mxu0 %vm318_vm2, %v6092_v37  ;;  %5503 = vmatmul.mubr.msk.bf16.gmra.mxu1 %vm318_vm2, %v6090_v35 }
  0x47   :  { %543 = vmatprep.mubr.bf16.mxu0 %v6502_v5  ;;  %876 = vmatprep.mubr.bf16.mxu1 %v6502_v5 }
  0x4e   :  { %5474 = vmatmul.mubr.msk.bf16.gmra.mxu0 %vm318_vm2, %v6093_v38  ;;  %5504 = vmatmul.mubr.msk.bf16.gmra.mxu1 %vm318_vm2, %v6091_v36 }
  0x4f   :  { %553 = vmatprep.mubr.bf16.mxu0 %v6502_v5  ;;  %886 = vmatprep.mubr.bf16.mxu1 %v6502_v5 }
  0x56   :  { %5475 = vmatmul.mubr.msk.bf16.gmra.mxu0 %vm318_vm2, %v6094_v39  ;;  %5505 = vmatmul.mubr.msk.bf16.gmra.mxu1 %vm318_vm2, %v6092_v37 }
  0x57   :  { %563 = vmatprep.mubr.bf16.mxu0 %v6502_v5  ;;  %896 = vmatprep.mubr.bf16.mxu1 %v6502_v5 }
  0x5e   :  { %5476 = vmatmul.mubr.msk.bf16.gmra.mxu0 %vm318_vm2, %v6095_v40  ;;  %5506 = vmatmul.mubr.msk.bf16.gmra.mxu1 %vm318_vm2, %v6093_v38 }
  0x5f   :  { %573 = vmatprep.mubr.bf16.mxu0 %v6502_v5  ;;  %906 = vmatprep.mubr.bf16.mxu1 %v6502_v5 }
  0x66   :  { %5477 = vmatmul.mubr.msk.bf16.gmra.mxu0 %vm318_vm2, %v6096_v41  ;;  %5507 = vmatmul.mubr.msk.bf16.gmra.mxu1 %vm318_vm2, %v6094_v39 }
  0x67   :  { %583 = vmatprep.mubr.bf16.mxu0 %v6502_v5  ;;  %916 = vmatprep.mubr.bf16.mxu1 %v6502_v5 }
  0x6e   :  { %5478 = vmatmul.mubr.msk.bf16.gmra.mxu0 %vm318_vm2, %v6097_v42  ;;  %5508 = vmatmul.mubr.msk.bf16.gmra.mxu1 %vm318_vm2, %v6095_v40 }
  0x6f   :  { %593 = vmatprep.mubr.bf16.mxu0 %v6502_v5  ;;  %926 = vmatprep.mubr.bf16.mxu1 %v6502_v5 }
  0x76   :  { %5479 = vmatmul.mubr.msk.bf16.gmra.mxu0 %vm318_vm2, %v6098_v43  ;;  %5509 = vmatmul.mubr.msk.bf16.gmra.mxu1 %vm318_vm2, %v6096_v41 }
  0x77   :  { %603 = vmatprep.mubr.bf16.mxu0 %v6502_v5  ;;  %936 = vmatprep.mubr.bf16.mxu1 %v6502_v5 }
  0x7e   :  { %5480 = vmatmul.mubr.msk.bf16.gmra.mxu0 %vm318_vm2, %v6099_v44  ;;  %5510 = vmatmul.mubr.msk.bf16.gmra.mxu1 %vm318_vm2, %v6097_v42 }
  0x7f   :  { %613 = vmatprep.mubr.bf16.mxu0 %v6502_v5  ;;  %946 = vmatprep.mubr.bf16.mxu1 %v6502_v5 }
  0x86   :  { %5481 = vmatmul.mubr.msk.bf16.gmra.mxu0 %vm318_vm2, %v6100_v45  ;;  %5511 = vmatmul.mubr.msk.bf16.gmra.mxu1 %vm318_vm2, %v6098_v43 }
  0x87   :  { %623 = vmatprep.mubr.bf16.mxu0 %v6502_v5  ;;  %956 = vmatprep.mubr.bf16.mxu1 %v6502_v5 }
  0x8e   :  { %5482 = vmatmul.mubr.msk.bf16.gmra.mxu0 %vm318_vm2, %v6101_v46  ;;  %5512 = vmatmul.mubr.msk.bf16.gmra.mxu1 %vm318_vm2, %v6099_v44 }
  0x8f   :  { %633 = vmatprep.mubr.bf16.mxu0 %v6502_v5  ;;  %966 = vmatprep.mubr.bf16.mxu1 %v6502_v5 }
  0x96   :  { %5483 = vmatmul.mubr.msk.bf16.gmra.mxu0 %vm318_vm2, %v6102_v47  ;;  %5513 = vmatmul.mubr.msk.bf16.gmra.mxu1 %vm318_vm2, %v6100_v45 }
  0x97   :  { %643 = vmatprep.mubr.bf16.mxu0 %v6502_v5  ;;  %976 = vmatprep.mubr.bf16.mxu1 %v6502_v5 }
  0x9e   :  { %5484 = vmatmul.mubr.msk.bf16.gmra.mxu0 %vm318_vm2, %v6103_v48  ;;  %5514 = vmatmul.mubr.msk.bf16.gmra.mxu1 %vm318_vm2, %v6101_v46 }
  0x9f   :  { %653 = vmatprep.mubr.bf16.mxu0 %v6502_v5  ;;  %986 = vmatprep.mubr.bf16.mxu1 %v6502_v5 }
  0xa6   :  { %5485 = vmatmul.mubr.msk.bf16.gmra.mxu0 %vm318_vm2, %v6110_v49  ;;  %5515 = vmatmul.mubr.msk.bf16.gmra.mxu1 %vm318_vm2, %v6102_v47 }
  0xa7   :  { %663 = vmatprep.mubr.bf16.mxu0 %v6502_v5  ;;  %996 = vmatprep.mubr.bf16.mxu1 %v6502_v5 }
  0xae   :  { %5486 = vmatmul.mubr.msk.bf16.gmra.mxu0 %vm318_vm2, %v6111_v50  ;;  %5516 = vmatmul.mubr.msk.bf16.gmra.mxu1 %vm318_vm2, %v6103_v48 }
  0xaf   :  { %12 = vsyncpa [#allocation3], 0  ;;  %673 = vmatprep.mubr.bf16.mxu0 %v6502_v5  ;;  %1006 = vmatprep.mubr.bf16.mxu1 %v6502_v5  ;;  %v6112_v51 = vld [vmem:[%s8937_s0 + $0xa8] sm:$0xff]   ;;  %v6113_v52 = vld [vmem:[%s8937_s0 + $0xb0] sm:$0xff]   ;;  %v102_v53 = vlaneseq  ;;  %vm1689_vm3 = vcmask 1040384   ;;  %s6504_s12 = smov [#allocation2]  }
  0xb0   :  { %v6114_v54 = vld [vmem:[%s8937_s0 + $0xb8] sm:$0xff]   ;;  %v100_v57 = vld [vmem:[%s8939_s2] sm:$0xf]  ;;  %v6804_v7 = vld [vmem:[%s8937_s0 + $0xc8] sm:$0xff]   ;;  %s5418_s13 = sshll.u32 %s6504_s12, 4  ;;  %vm5410_vm4 = vcmask 82944   ;;  %s5419_s13 = int_to_ptr.vmem [resolvable:$true] %s5418_s13 }
  0xb1   :  { %v6765_v55 = vshrl.u32 %v102_v53, 7  ;;  %v6115_v58 = vld [vmem:[%s8937_s0 + $0xc0] sm:$0xff]   ;;  %v6829_v28 = vld [vmem:[%s8937_s0 + $0xd0] sm:$0xff]   ;;  %s6479_s14 = scalar_lea.vmem %s5419_s13, 32  ;;  %p6484_p1 = scmp.lt.s32.totalorder %s5419_s13, %s5419_s13 }
  0xb2   :  { %p6480_p0 = scmp.ne.s32.totalorder %s5419_s13, %s6479_s14  ;;  %p6485_p2 = scmp.lt.s32.totalorder %s6479_s14, %s6479_s14 }
  0xb3   :  { %v6772_v56 = vsub.s32 0, %v6765_v55  ;;  %v6781_v59 = vsub.s32 1, %v6765_v55  ;;  %v6821_v22 = vsub.s32 2, %v6765_v55  ;;  %v116_v29 = vsub.s32 3, %v6765_v55 }
  0xb4   :  { %p6486_p3 = por %p6485_p2, %p6484_p1 }
  0xb5   :  { %8948 = vst [vmem:[#allocation5_spill] sm:$0xff] %v6772_v56  ;;  %8949 = vst [vmem:[#allocation6_spill] sm:$0xff] %v6781_v59  ;;  %v6784_v60 = vrot.slane %v100_v57, %v6772_v56  ;;  %v6792_v0 = vrot.slane %v100_v57, %v6781_v59  ;;  %v6836_v35 = vrot.slane %v100_v57, %v6821_v22 }
  0xb6   :  { %5487 = vmatmul.mubr.msk.bf16.gmra.mxu0 %vm318_vm2, %v6112_v51  ;;  %5517 = vmatmul.mubr.msk.bf16.gmra.mxu1 %vm318_vm2, %v6110_v49  ;;  %8950 = vst [vmem:[#allocation7_spill] sm:$0xff] %v6821_v22  ;;  %v6844_v41 = vrot.slane %v100_v57, %v116_v29  ;;  %p6487_p4 = pnand %p6486_p3, %p6480_p0 }
  0xb7   :  { %683 = vmatprep.mubr.bf16.mxu0 %v6502_v5  ;;  %1016 = vmatprep.mubr.bf16.mxu1 %v6502_v5 }
  0xbe   :  { %5488 = vmatmul.mubr.msk.bf16.gmra.mxu0 %vm318_vm2, %v6113_v52  ;;  %5518 = vmatmul.mubr.msk.bf16.gmra.mxu1 %vm318_vm2, %v6111_v50 }
  0xbf   :  { %693 = vmatprep.mubr.bf16.mxu0 %v6502_v5  ;;  %1026 = vmatprep.mubr.bf16.mxu1 %v6502_v5 }
  0xc6   :  { %5489 = vmatmul.mubr.msk.bf16.gmra.mxu0 %vm318_vm2, %v6114_v54  ;;  %5519 = vmatmul.mubr.msk.bf16.gmra.mxu1 %vm318_vm2, %v6112_v51 }
  0xc7   :  { %703 = vmatprep.mubr.bf16.mxu0 %v6502_v5  ;;  %1036 = vmatprep.mubr.bf16.mxu1 %v6502_v5 }
  0xce   :  { %v465_v61 = vpop.f32.mrf.mxu0  ;;  %5490 = vmatmul.mubr.msk.bf16.gmra.mxu0 %vm318_vm2, %v6115_v58  ;;  %v6787_v62 = vpop.f32.mrf.mxu1  ;;  %5520 = vmatmul.mubr.msk.bf16.gmra.mxu1 %vm318_vm2, %v6113_v52 }
  0xcf   :  { %v466_v63 = vadd.f32 %v465_v61, %v6784_v60  ;;  %713 = vmatprep.mubr.bf16.mxu0 %v6502_v5  ;;  %1046 = vmatprep.mubr.bf16.mxu1 %v6502_v5 }
  0xd0   :  { %v467_v1 = vpop.f32.mrf.mxu0  ;;  %v6796_v2 = vpop.f32.mrf.mxu1 }
  0xd1   :  { %v468_v3 = vadd.f32 %v467_v1, %v6792_v0  ;;  %v1137_v8 = vmax.f32 %v466_v63, 0.0 }
  0xd2   :  { %v469_v4 = vpop.f32.mrf.mxu0  ;;  %v6799_v6 = vpop.f32.mrf.mxu1 }
  0xd3   :  { %v470_v9 = vadd.f32 %v469_v4, %v6784_v60  ;;  %v1138_v12 = vmax.f32 %v468_v3, 0.0 }
  0xd4   :  { %v471_v10 = vpop.f32.mrf.mxu0  ;;  %v6807_v11 = vpop.f32.mrf.mxu1 }
  0xd5   :  { %v1141_v13 = vmax.f32 %v470_v9, 0.0  ;;  %v472_v14 = vadd.f32 %v471_v10, %v6792_v0 }
  0xd6   :  { %v475_v15 = vpop.f32.mrf.mxu0  ;;  %5491 = vmatmul.mubr.msk.bf16.gmra.mxu0 %vm318_vm2, %v6804_v7  ;;  %v6812_v16 = vpop.f32.mrf.mxu1  ;;  %5521 = vmatmul.mubr.msk.bf16.gmra.mxu1 %vm318_vm2, %v6114_v54  ;;  %v6855_v54 = vld [vmem:[%s8937_s0 + $0xd8] sm:$0xff]  }
  0xd7   :  { %v1393_v17 = vadd.f32 %v1141_v13, %v1137_v8  ;;  %v1142_v18 = vmax.f32 %v472_v14, 0.0  ;;  %v476_v19 = vadd.f32 %v475_v15, %v6784_v60  ;;  %723 = vmatprep.mubr.bf16.mxu0 %v6502_v5  ;;  %1056 = vmatprep.mubr.bf16.mxu1 %v6502_v5 }
  0xd8   :  { %v477_v20 = vpop.f32.mrf.mxu0  ;;  %v6818_v21 = vpop.f32.mrf.mxu1 }
  0xd9   :  { %v1430_v23 = vadd.f32 %v1142_v18, %v1138_v12  ;;  %v1145_v24 = vmax.f32 %v476_v19, 0.0  ;;  %v478_v25 = vadd.f32 %v477_v20, %v6792_v0 }
  0xda   :  { %v479_v26 = vpop.f32.mrf.mxu0  ;;  %v6824_v27 = vpop.f32.mrf.mxu1 }
  0xdb   :  { %v1394_v30 = vadd.f32 %v1393_v17, %v1145_v24  ;;  %v1146_v31 = vmax.f32 %v478_v25, 0.0  ;;  %v480_v32 = vadd.f32 %v479_v26, %v6784_v60 }
  0xdc   :  { %v481_v33 = vpop.f32.mrf.mxu0  ;;  %v6833_v34 = vpop.f32.mrf.mxu1 }
  0xdd   :  { %v1431_v36 = vadd.f32 %v1430_v23, %v1146_v31  ;;  %v1149_v37 = vmax.f32 %v480_v32, 0.0  ;;  %v482_v38 = vadd.f32 %v481_v33, %v6792_v0 }
  0xde   :  { %v485_v39 = vpop.f32.mrf.mxu0  ;;  %5492 = vmatmul.mubr.msk.bf16.gmra.mxu0 %vm318_vm2, %v6829_v28  ;;  %v818_v40 = vpop.f32.mrf.mxu1  ;;  %5522 = vmatmul.mubr.msk.bf16.gmra.mxu1 %vm318_vm2, %v6115_v58 }
  0xdf   :  { %v1395_v42 = vadd.f32 %v1394_v30, %v1149_v37  ;;  %v1150_v43 = vmax.f32 %v482_v38, 0.0  ;;  %v486_v44 = vadd.f32 %v485_v39, %v6784_v60  ;;  %733 = vmatprep.mubr.bf16.mxu0 %v6502_v5  ;;  %1066 = vmatprep.mubr.bf16.mxu1 %v6502_v5  ;;  %v819_v45 = vadd.f32 %v818_v40, %v6836_v35  ;;  %v6874_v40 = vld [vmem:[%s8937_s0 + $0xe0] sm:$0xff]  }
  0xe0   :  { %v487_v46 = vpop.f32.mrf.mxu0  ;;  %v820_v47 = vpop.f32.mrf.mxu1 }
  0xe1   :  { %v1432_v48 = vadd.f32 %v1431_v36, %v1150_v43  ;;  %v1153_v49 = vmax.f32 %v486_v44, 0.0  ;;  %v488_v50 = vadd.f32 %v487_v46, %v6792_v0  ;;  %v821_v51 = vadd.f32 %v820_v47, %v6844_v41 }
  0xe2   :  { %v489_v52 = vpop.f32.mrf.mxu0  ;;  %v822_v53 = vpop.f32.mrf.mxu1  ;;  %v1139_v12 = vmax.f32 %v819_v45, 0.0 }
  0xe3   :  { %v1396_v57 = vadd.f32 %v1395_v42, %v1153_v49  ;;  %v1154_v58 = vmax.f32 %v488_v50, 0.0  ;;  %v490_v61 = vadd.f32 %v489_v52, %v6784_v60  ;;  %v823_v63 = vadd.f32 %v822_v53, %v6836_v35 }
  0xe4   :  { %v491_v1 = vpop.f32.mrf.mxu0  ;;  %v824_v3 = vpop.f32.mrf.mxu1  ;;  %v1140_v13 = vmax.f32 %v821_v51, 0.0 }
  0xe5   :  { %v1433_v4 = vadd.f32 %v1432_v48, %v1154_v58  ;;  %v1157_v8 = vmax.f32 %v490_v61, 0.0  ;;  %v492_v9 = vadd.f32 %v491_v1, %v6792_v0  ;;  %v825_v10 = vadd.f32 %v824_v3, %v6844_v41 }
  0xe6   :  { %v1143_v14 = vmax.f32 %v823_v63, 0.0  ;;  %v495_v15 = vpop.f32.mrf.mxu0  ;;  %5493 = vmatmul.mubr.msk.bf16.gmra.mxu0 %vm318_vm2, %v6855_v54  ;;  %v828_v17 = vpop.f32.mrf.mxu1  ;;  %5523 = vmatmul.mubr.msk.bf16.gmra.mxu1 %vm318_vm2, %v6804_v7 }
  0xe7   :  { %v1397_v18 = vadd.f32 %v1396_v57, %v1157_v8  ;;  %v1158_v19 = vmax.f32 %v492_v9, 0.0  ;;  %v1144_v20 = vmax.f32 %v825_v10, 0.0  ;;  %v496_v23 = vadd.f32 %v495_v15, %v6784_v60  ;;  %743 = vmatprep.mubr.bf16.mxu0 %v6502_v5  ;;  %1076 = vmatprep.mubr.bf16.mxu1 %v6502_v5 }
  0xe8   :  { %v1467_v24 = vadd.f32 %v1143_v14, %v1139_v12  ;;  %v829_v25 = vadd.f32 %v828_v17, %v6836_v35  ;;  %v497_v26 = vpop.f32.mrf.mxu0  ;;  %v830_v30 = vpop.f32.mrf.mxu1 }
  0xe9   :  { %v1434_v31 = vadd.f32 %v1433_v4, %v1158_v19  ;;  %v1504_v32 = vadd.f32 %v1144_v20, %v1140_v13  ;;  %v1161_v33 = vmax.f32 %v496_v23, 0.0  ;;  %v498_v36 = vadd.f32 %v497_v26, %v6792_v0 }
  0xea   :  { %v1147_v7 = vmax.f32 %v829_v25, 0.0  ;;  %v831_v37 = vadd.f32 %v830_v30, %v6844_v41  ;;  %v499_v38 = vpop.f32.mrf.mxu0  ;;  %v832_v39 = vpop.f32.mrf.mxu1 }
  0xeb   :  { %v1398_v42 = vadd.f32 %v1397_v18, %v1161_v33  ;;  %v1162_v43 = vmax.f32 %v498_v36, 0.0  ;;  %v500_v44 = vadd.f32 %v499_v38, %v6784_v60  ;;  %v833_v45 = vadd.f32 %v832_v39, %v6836_v35 }
  0xec   :  { %v1468_v46 = vadd.f32 %v1467_v24, %v1147_v7  ;;  %v1148_v47 = vmax.f32 %v831_v37, 0.0  ;;  %v501_v48 = vpop.f32.mrf.mxu0  ;;  %v834_v49 = vpop.f32.mrf.mxu1  ;;  %v6893_v24 = vld [vmem:[%s8937_s0 + $0xe8] sm:$0xff]  }
  0xed   :  { %v1435_v50 = vadd.f32 %v1434_v31, %v1162_v43  ;;  %v1165_v51 = vmax.f32 %v500_v44, 0.0  ;;  %v1151_v52 = vmax.f32 %v833_v45, 0.0  ;;  %v502_v53 = vadd.f32 %v501_v48, %v6792_v0 }
  0xee   :  { %v1505_v57 = vadd.f32 %v1504_v32, %v1148_v47  ;;  %v835_v58 = vadd.f32 %v834_v49, %v6844_v41  ;;  %v505_v61 = vpop.f32.mrf.mxu0  ;;  %5494 = vmatmul.mubr.msk.bf16.gmra.mxu0 %vm318_vm2, %v6874_v40  ;;  %v838_v63 = vpop.f32.mrf.mxu1  ;;  %5524 = vmatmul.mubr.msk.bf16.gmra.mxu1 %vm318_vm2, %v6829_v28 }
  0xef   :  { %v1399_v1 = vadd.f32 %v1398_v42, %v1165_v51  ;;  %v1469_v3 = vadd.f32 %v1468_v46, %v1151_v52  ;;  %v1166_v4 = vmax.f32 %v502_v53, 0.0  ;;  %v506_v8 = vadd.f32 %v505_v61, %v6784_v60  ;;  %753 = vmatprep.mubr.bf16.mxu0 %v6502_v5  ;;  %1086 = vmatprep.mubr.bf16.mxu1 %v6502_v5 }
  0xf0   :  { %v1152_v9 = vmax.f32 %v835_v58, 0.0  ;;  %v839_v10 = vadd.f32 %v838_v63, %v6836_v35  ;;  %v507_v12 = vpop.f32.mrf.mxu0  ;;  %v840_v13 = vpop.f32.mrf.mxu1 }
  0xf1   :  { %v1436_v14 = vadd.f32 %v1435_v50, %v1166_v4  ;;  %v1169_v15 = vmax.f32 %v506_v8, 0.0  ;;  %v508_v17 = vadd.f32 %v507_v12, %v6792_v0  ;;  %v841_v28 = vadd.f32 %v840_v13, %v6844_v41 }
  0xf2   :  { %v1506_v18 = vadd.f32 %v1505_v57, %v1152_v9  ;;  %v1155_v19 = vmax.f32 %v839_v10, 0.0  ;;  %v509_v20 = vpop.f32.mrf.mxu0  ;;  %v842_v23 = vpop.f32.mrf.mxu1  ;;  %v6912_v9 = vld [vmem:[%s8937_s0 + $0x100] sm:$0xff]  }
  0xf3   :  { %v1400_v25 = vadd.f32 %v1399_v1, %v1169_v15  ;;  %v1170_v26 = vmax.f32 %v508_v17, 0.0  ;;  %v1156_v30 = vmax.f32 %v841_v28, 0.0  ;;  %v510_v31 = vadd.f32 %v509_v20, %v6784_v60 }
  0xf4   :  { %v1470_v32 = vadd.f32 %v1469_v3, %v1155_v19  ;;  %v843_v33 = vadd.f32 %v842_v23, %v6836_v35  ;;  %v511_v36 = vpop.f32.mrf.mxu0  ;;  %v844_v7 = vpop.f32.mrf.mxu1 }
  0xf5   :  { %v1437_v37 = vadd.f32 %v1436_v14, %v1170_v26  ;;  %v1507_v38 = vadd.f32 %v1506_v18, %v1156_v30  ;;  %v1173_v39 = vmax.f32 %v510_v31, 0.0  ;;  %v512_v42 = vadd.f32 %v511_v36, %v6792_v0 }
  0xf6   :  { %v1159_v43 = vmax.f32 %v843_v33, 0.0  ;;  %v845_v44 = vadd.f32 %v844_v7, %v6844_v41  ;;  %v515_v45 = vpop.f32.mrf.mxu0  ;;  %5495 = vmatmul.mubr.msk.bf16.gmra.mxu0 %vm318_vm2, %v6893_v24  ;;  %v848_v46 = vpop.f32.mrf.mxu1  ;;  %5525 = vmatmul.mubr.msk.bf16.gmra.mxu1 %vm318_vm2, %v6855_v54 }
  0xf7   :  { %v1401_v47 = vadd.f32 %v1400_v25, %v1173_v39  ;;  %v1174_v48 = vmax.f32 %v512_v42, 0.0  ;;  %v516_v49 = vadd.f32 %v515_v45, %v6784_v60  ;;  %v849_v50 = vadd.f32 %v848_v46, %v6836_v35  ;;  %1096 = vmatprep.mubr.bf16.mxu1 %v6502_v5  ;;  %2131 = vmatprep.mubr.bf16.mxu0 %v6502_v5 }
  0xf8   :  { %v1471_v51 = vadd.f32 %v1470_v32, %v1159_v43  ;;  %v1160_v52 = vmax.f32 %v845_v44, 0.0  ;;  %v517_v53 = vpop.f32.mrf.mxu0  ;;  %v850_v57 = vpop.f32.mrf.mxu1 }
  0xf9   :  { %v1438_v58 = vadd.f32 %v1437_v37, %v1174_v48  ;;  %v1177_v61 = vmax.f32 %v516_v49, 0.0  ;;  %v1163_v63 = vmax.f32 %v849_v50, 0.0  ;;  %v518_v1 = vadd.f32 %v517_v53, %v6792_v0 }
  0xfa   :  { %v1508_v54 = vadd.f32 %v1507_v38, %v1160_v52  ;;  %v851_v3 = vadd.f32 %v850_v57, %v6844_v41  ;;  %v519_v4 = vpop.f32.mrf.mxu0  ;;  %v852_v8 = vpop.f32.mrf.mxu1 }
  0xfb   :  { %v1402_v10 = vadd.f32 %v1401_v47, %v1177_v61  ;;  %v1472_v12 = vadd.f32 %v1471_v51, %v1163_v63  ;;  %v1178_v13 = vmax.f32 %v518_v1, 0.0  ;;  %v520_v14 = vadd.f32 %v519_v4, %v6784_v60  ;;  %v6931_v51 = vld [vmem:[%s8937_s0 + $0x108] sm:$0xff]  }
  0xfc   :  { %v1164_v15 = vmax.f32 %v851_v3, 0.0  ;;  %v853_v17 = vadd.f32 %v852_v8, %v6836_v35  ;;  %v521_v28 = vpop.f32.mrf.mxu0  ;;  %v854_v18 = vpop.f32.mrf.mxu1 }
  0xfd   :  { %v1439_v19 = vadd.f32 %v1438_v58, %v1178_v13  ;;  %v1181_v20 = vmax.f32 %v520_v14, 0.0  ;;  %v522_v23 = vadd.f32 %v521_v28, %v6792_v0  ;;  %v855_v25 = vadd.f32 %v854_v18, %v6844_v41 }
  0xfe   :  { %v1509_v26 = vadd.f32 %v1508_v54, %v1164_v15  ;;  %v1167_v30 = vmax.f32 %v853_v17, 0.0  ;;  %v525_v31 = vpop.f32.mrf.mxu0  ;;  %v858_v32 = vpop.f32.mrf.mxu1  ;;  %5526 = vmatmul.mubr.msk.bf16.gmra.mxu1 %vm318_vm2, %v6874_v40  ;;  %5643 = vmatmul.mubr.msk.bf16.vlgmr.msra.gmra.mxu0 %vm318_vm2, %v6912_v9 }
  0xff   :  { %v1403_v33 = vadd.f32 %v1402_v10, %v1181_v20  ;;  %v1182_v36 = vmax.f32 %v522_v23, 0.0  ;;  %v1168_v7 = vmax.f32 %v855_v25, 0.0  ;;  %v526_v37 = vadd.f32 %v525_v31, %v6784_v60  ;;  %1106 = vmatprep.mubr.bf16.mxu1 %v6502_v5  ;;  %2141 = vmatprep.mubr.bf16.mxu0 %v6502_v5 }
 0x100   :  { %v1473_v38 = vadd.f32 %v1472_v12, %v1167_v30  ;;  %v859_v39 = vadd.f32 %v858_v32, %v6836_v35  ;;  %v527_v42 = vpop.f32.mrf.mxu0  ;;  %v860_v43 = vpop.f32.mrf.mxu1 }
 0x101   :  { %v1440_v44 = vadd.f32 %v1439_v19, %v1182_v36  ;;  %v1510_v45 = vadd.f32 %v1509_v26, %v1168_v7  ;;  %v1185_v40 = vmax.f32 %v526_v37, 0.0  ;;  %v528_v46 = vadd.f32 %v527_v42, %v6792_v0 }
 0x102   :  { %v1171_v47 = vmax.f32 %v859_v39, 0.0  ;;  %v861_v48 = vadd.f32 %v860_v43, %v6844_v41  ;;  %v529_v49 = vpop.f32.mrf.mxu0  ;;  %v862_v50 = vpop.f32.mrf.mxu1 }
 0x103   :  { %v1404_v52 = vadd.f32 %v1403_v33, %v1185_v40  ;;  %v1186_v53 = vmax.f32 %v528_v46, 0.0  ;;  %v530_v57 = vadd.f32 %v529_v49, %v6784_v60  ;;  %v863_v58 = vadd.f32 %v862_v50, %v6836_v35 }
 0x104   :  { %v1474_v61 = vadd.f32 %v1473_v38, %v1171_v47  ;;  %v1172_v63 = vmax.f32 %v861_v48, 0.0  ;;  %v531_v1 = vpop.f32.mrf.mxu0  ;;  %v864_v54 = vpop.f32.mrf.mxu1  ;;  %v6950_v38 = vld [vmem:[%s8937_s0 + $0x110] sm:$0xff]  }
 0x105   :  { %v1441_v3 = vadd.f32 %v1440_v44, %v1186_v53  ;;  %v1189_v4 = vmax.f32 %v530_v57, 0.0  ;;  %v1175_v8 = vmax.f32 %v863_v58, 0.0  ;;  %v532_v10 = vadd.f32 %v531_v1, %v6792_v0 }
 0x106   :  { %v1511_v12 = vadd.f32 %v1510_v45, %v1172_v63  ;;  %v865_v13 = vadd.f32 %v864_v54, %v6844_v41  ;;  %v535_v14 = vpop.f32.mrf.mxu0  ;;  %v868_v15 = vpop.f32.mrf.mxu1  ;;  %5527 = vmatmul.mubr.msk.bf16.gmra.mxu1 %vm318_vm2, %v6893_v24  ;;  %5644 = vmatmul.mubr.msk.bf16.gmra.mxu0 %vm318_vm2, %v6931_v51  ;;  %v6477_v63 = vld [vmem:[%s8937_s0 + $0xf0] sm:$0xff]  }
 0x107   :  { %v1405_v17 = vadd.f32 %v1404_v52, %v1189_v4  ;;  %v1475_v28 = vadd.f32 %v1474_v61, %v1175_v8  ;;  %v1190_v18 = vmax.f32 %v532_v10, 0.0  ;;  %v536_v19 = vadd.f32 %v535_v14, %v6784_v60  ;;  %1116 = vmatprep.mubr.bf16.mxu1 %v6502_v5  ;;  %2151 = vmatprep.mubr.bf16.mxu0 %v6502_v5 }
 0x108   :  { %v1176_v20 = vmax.f32 %v865_v13, 0.0  ;;  %v869_v23 = vadd.f32 %v868_v15, %v6836_v35  ;;  %v537_v25 = vpop.f32.mrf.mxu0  ;;  %v870_v26 = vpop.f32.mrf.mxu1 }
 0x109   :  { %v1442_v30 = vadd.f32 %v1441_v3, %v1190_v18  ;;  %v1193_v31 = vmax.f32 %v536_v19, 0.0  ;;  %v538_v24 = vadd.f32 %v537_v25, %v6792_v0  ;;  %v871_v32 = vadd.f32 %v870_v26, %v6844_v41  ;;  %v6971_v25 = vld [vmem:[%s8937_s0 + $0x118] sm:$0xff]  }
 0x10a   :  { %v1512_v33 = vadd.f32 %v1511_v12, %v1176_v20  ;;  %v1179_v36 = vmax.f32 %v869_v23, 0.0  ;;  %v539_v7 = vpop.f32.mrf.mxu0  ;;  %v872_v37 = vpop.f32.mrf.mxu1 }
 0x10b   :  { %v1406_v39 = vadd.f32 %v1405_v17, %v1193_v31  ;;  %v1194_v42 = vmax.f32 %v538_v24, 0.0  ;;  %v1180_v43 = vmax.f32 %v871_v32, 0.0  ;;  %v540_v44 = vadd.f32 %v539_v7, %v6784_v60 }
 0x10c   :  { %v1476_v45 = vadd.f32 %v1475_v28, %v1179_v36  ;;  %v873_v40 = vadd.f32 %v872_v37, %v6836_v35  ;;  %v541_v46 = vpop.f32.mrf.mxu0  ;;  %v874_v47 = vpop.f32.mrf.mxu1 }
 0x10d   :  { %v1443_v48 = vadd.f32 %v1442_v30, %v1194_v42  ;;  %v1513_v49 = vadd.f32 %v1512_v33, %v1180_v43  ;;  %v1197_v50 = vmax.f32 %v540_v44, 0.0  ;;  %v542_v52 = vadd.f32 %v541_v46, %v6792_v0 }
 0x10e   :  { %v1183_v53 = vmax.f32 %v873_v40, 0.0  ;;  %v875_v57 = vadd.f32 %v874_v47, %v6844_v41  ;;  %v545_v58 = vpop.f32.mrf.mxu0  ;;  %v878_v61 = vpop.f32.mrf.mxu1  ;;  %5528 = vmatmul.mubr.msk.bf16.gmra.mxu1 %vm318_vm2, %v6477_v63  ;;  %5645 = vmatmul.mubr.msk.bf16.gmra.mxu0 %vm318_vm2, %v6950_v38  ;;  %v6478_v47 = vld [vmem:[%s8937_s0 + $0xf8] sm:$0xff]  }
 0x10f   :  { %v1407_v1 = vadd.f32 %v1406_v39, %v1197_v50  ;;  %v1198_v54 = vmax.f32 %v542_v52, 0.0  ;;  %v546_v3 = vadd.f32 %v545_v58, %v6784_v60  ;;  %v879_v4 = vadd.f32 %v878_v61, %v6836_v35  ;;  %1126 = vmatprep.mubr.bf16.mxu1 %v6502_v5  ;;  %2161 = vmatprep.mubr.bf16.mxu0 %v6502_v5 }
 0x110   :  { %v1477_v8 = vadd.f32 %v1476_v45, %v1183_v53  ;;  %v1184_v10 = vmax.f32 %v875_v57, 0.0  ;;  %v547_v12 = vpop.f32.mrf.mxu0  ;;  %v880_v13 = vpop.f32.mrf.mxu1 }
 0x111   :  { %v1444_v14 = vadd.f32 %v1443_v48, %v1198_v54  ;;  %v1201_v15 = vmax.f32 %v546_v3, 0.0  ;;  %v1187_v17 = vmax.f32 %v879_v4, 0.0  ;;  %v548_v28 = vadd.f32 %v547_v12, %v6792_v0 }
 0x112   :  { %v1514_v18 = vadd.f32 %v1513_v49, %v1184_v10  ;;  %v881_v19 = vadd.f32 %v880_v13, %v6844_v41  ;;  %v549_v20 = vpop.f32.mrf.mxu0  ;;  %v882_v23 = vpop.f32.mrf.mxu1  ;;  %v6992_v13 = vld [vmem:[%s8937_s0 + $0x120] sm:$0xff]  }
 0x113   :  { %v1408_v26 = vadd.f32 %v1407_v1, %v1201_v15  ;;  %v1478_v30 = vadd.f32 %v1477_v8, %v1187_v17  ;;  %v1202_v31 = vmax.f32 %v548_v28, 0.0  ;;  %v550_v24 = vadd.f32 %v549_v20, %v6784_v60 }
 0x114   :  { %v1188_v32 = vmax.f32 %v881_v19, 0.0  ;;  %v883_v33 = vadd.f32 %v882_v23, %v6836_v35  ;;  %v551_v36 = vpop.f32.mrf.mxu0  ;;  %v884_v7 = vpop.f32.mrf.mxu1 }
 0x115   :  { %v1445_v37 = vadd.f32 %v1444_v14, %v1202_v31  ;;  %v1205_v39 = vmax.f32 %v550_v24, 0.0  ;;  %v552_v42 = vadd.f32 %v551_v36, %v6792_v0  ;;  %v885_v43 = vadd.f32 %v884_v7, %v6844_v41 }
 0x116   :  { %v1515_v44 = vadd.f32 %v1514_v18, %v1188_v32  ;;  %v1191_v45 = vmax.f32 %v883_v33, 0.0  ;;  %v555_v40 = vpop.f32.mrf.mxu0  ;;  %v888_v46 = vpop.f32.mrf.mxu1  ;;  %5529 = vmatmul.mubr.msk.bf16.gmra.mxu1 %vm318_vm2, %v6478_v47  ;;  %5646 = vmatmul.mubr.msk.bf16.gmra.mxu0 %vm318_vm2, %v6971_v25 }
 0x117   :  { %v1409_v48 = vadd.f32 %v1408_v26, %v1205_v39  ;;  %v1206_v49 = vmax.f32 %v552_v42, 0.0  ;;  %v1192_v50 = vmax.f32 %v885_v43, 0.0  ;;  %v556_v52 = vadd.f32 %v555_v40, %v6784_v60  ;;  %2171 = vmatprep.mubr.bf16.mxu0 %v6502_v5  ;;  %2484 = vmatprep.mubr.bf16.mxu1 %v6502_v5 }
 0x118   :  { %v1479_v53 = vadd.f32 %v1478_v30, %v1191_v45  ;;  %v889_v57 = vadd.f32 %v888_v46, %v6836_v35  ;;  %v557_v58 = vpop.f32.mrf.mxu0  ;;  %v890_v61 = vpop.f32.mrf.mxu1 }
 0x119   :  { %v1446_v63 = vadd.f32 %v1445_v37, %v1206_v49  ;;  %v1516_v1 = vadd.f32 %v1515_v44, %v1192_v50  ;;  %v1209_v54 = vmax.f32 %v556_v52, 0.0  ;;  %v558_v3 = vadd.f32 %v557_v58, %v6792_v0  ;;  %v7011_v58 = vld [vmem:[%s8937_s0 + $0x128] sm:$0xff]  }
 0x11a   :  { %v1195_v4 = vmax.f32 %v889_v57, 0.0  ;;  %v891_v8 = vadd.f32 %v890_v61, %v6844_v41  ;;  %v559_v10 = vpop.f32.mrf.mxu0  ;;  %v892_v12 = vpop.f32.mrf.mxu1 }
 0x11b   :  { %v1410_v14 = vadd.f32 %v1409_v48, %v1209_v54  ;;  %v1210_v15 = vmax.f32 %v558_v3, 0.0  ;;  %v560_v17 = vadd.f32 %v559_v10, %v6784_v60  ;;  %v893_v28 = vadd.f32 %v892_v12, %v6836_v35 }
 0x11c   :  { %v1480_v18 = vadd.f32 %v1479_v53, %v1195_v4  ;;  %v1196_v19 = vmax.f32 %v891_v8, 0.0  ;;  %v561_v20 = vpop.f32.mrf.mxu0  ;;  %v894_v23 = vpop.f32.mrf.mxu1 }
 0x11d   :  { %v1447_v26 = vadd.f32 %v1446_v63, %v1210_v15  ;;  %v1213_v30 = vmax.f32 %v560_v17, 0.0  ;;  %v1199_v31 = vmax.f32 %v893_v28, 0.0  ;;  %v562_v24 = vadd.f32 %v561_v20, %v6792_v0 }
 0x11e   :  { %v1517_v32 = vadd.f32 %v1516_v1, %v1196_v19  ;;  %v895_v33 = vadd.f32 %v894_v23, %v6844_v41  ;;  %v565_v36 = vpop.f32.mrf.mxu0  ;;  %v898_v7 = vpop.f32.mrf.mxu1  ;;  %5647 = vmatmul.mubr.msk.bf16.gmra.mxu0 %vm318_vm2, %v6992_v13  ;;  %5675 = vmatmul.mubr.msk.bf16.vlgmr.msra.gmra.mxu1 %vm318_vm2, %v6912_v9 }
 0x11f   :  { %v1411_v37 = vadd.f32 %v1410_v14, %v1213_v30  ;;  %v1481_v39 = vadd.f32 %v1480_v18, %v1199_v31  ;;  %v1214_v42 = vmax.f32 %v562_v24, 0.0  ;;  %v566_v43 = vadd.f32 %v565_v36, %v6784_v60  ;;  %2181 = vmatprep.mubr.bf16.mxu0 %v6502_v5  ;;  %2494 = vmatprep.mubr.bf16.mxu1 %v6502_v5 }
 0x120   :  { %v1200_v44 = vmax.f32 %v895_v33, 0.0  ;;  %v899_v45 = vadd.f32 %v898_v7, %v6836_v35  ;;  %v567_v40 = vpop.f32.mrf.mxu0  ;;  %v900_v46 = vpop.f32.mrf.mxu1 }
 0x121   :  { %v1448_v47 = vadd.f32 %v1447_v26, %v1214_v42  ;;  %v1217_v48 = vmax.f32 %v566_v43, 0.0  ;;  %v568_v49 = vadd.f32 %v567_v40, %v6792_v0  ;;  %v901_v9 = vadd.f32 %v900_v46, %v6844_v41  ;;  %v7030_v40 = vld [vmem:[%s8937_s0 + $0x130] sm:$0xff]  }
 0x122   :  { %v1518_v50 = vadd.f32 %v1517_v32, %v1200_v44  ;;  %v1203_v52 = vmax.f32 %v899_v45, 0.0  ;;  %v569_v53 = vpop.f32.mrf.mxu0  ;;  %v902_v57 = vpop.f32.mrf.mxu1 }
 0x123   :  { %v1412_v61 = vadd.f32 %v1411_v37, %v1217_v48  ;;  %v1218_v63 = vmax.f32 %v568_v49, 0.0  ;;  %v1204_v1 = vmax.f32 %v901_v9, 0.0  ;;  %v570_v54 = vadd.f32 %v569_v53, %v6784_v60 }
 0x124   :  { %v1482_v3 = vadd.f32 %v1481_v39, %v1203_v52  ;;  %v903_v4 = vadd.f32 %v902_v57, %v6836_v35  ;;  %v571_v8 = vpop.f32.mrf.mxu0  ;;  %v904_v10 = vpop.f32.mrf.mxu1 }
 0x125   :  { %v1449_v12 = vadd.f32 %v1448_v47, %v1218_v63  ;;  %v1519_v14 = vadd.f32 %v1518_v50, %v1204_v1  ;;  %v1221_v15 = vmax.f32 %v570_v54, 0.0  ;;  %v572_v17 = vadd.f32 %v571_v8, %v6792_v0 }
 0x126   :  { %v1207_v28 = vmax.f32 %v903_v4, 0.0  ;;  %v905_v18 = vadd.f32 %v904_v10, %v6844_v41  ;;  %v575_v19 = vpop.f32.mrf.mxu0  ;;  %v908_v20 = vpop.f32.mrf.mxu1  ;;  %5648 = vmatmul.mubr.msk.bf16.gmra.mxu0 %vm318_vm2, %v7011_v58  ;;  %5676 = vmatmul.mubr.msk.bf16.gmra.mxu1 %vm318_vm2, %v6931_v51 }
 0x127   :  { %v1413_v23 = vadd.f32 %v1412_v61, %v1221_v15  ;;  %v1222_v26 = vmax.f32 %v572_v17, 0.0  ;;  %v576_v30 = vadd.f32 %v575_v19, %v6784_v60  ;;  %v909_v31 = vadd.f32 %v908_v20, %v6836_v35  ;;  %2191 = vmatprep.mubr.bf16.mxu0 %v6502_v5  ;;  %2504 = vmatprep.mubr.bf16.mxu1 %v6502_v5 }
 0x128   :  { %v1483_v24 = vadd.f32 %v1482_v3, %v1207_v28  ;;  %v1208_v32 = vmax.f32 %v905_v18, 0.0  ;;  %v577_v33 = vpop.f32.mrf.mxu0  ;;  %v910_v36 = vpop.f32.mrf.mxu1 }
 0x129   :  { %v1450_v7 = vadd.f32 %v1449_v12, %v1222_v26  ;;  %v1225_v37 = vmax.f32 %v576_v30, 0.0  ;;  %v1211_v39 = vmax.f32 %v909_v31, 0.0  ;;  %v578_v42 = vadd.f32 %v577_v33, %v6792_v0  ;;  %v7049_v33 = vld [vmem:[%s8937_s0 + $0x138] sm:$0xff]  }
 0x12a   :  { %v1520_v51 = vadd.f32 %v1519_v14, %v1208_v32  ;;  %v911_v43 = vadd.f32 %v910_v36, %v6844_v41  ;;  %v579_v44 = vpop.f32.mrf.mxu0  ;;  %v912_v45 = vpop.f32.mrf.mxu1 }
 0x12b   :  { %v1414_v46 = vadd.f32 %v1413_v23, %v1225_v37  ;;  %v1484_v47 = vadd.f32 %v1483_v24, %v1211_v39  ;;  %v1226_v48 = vmax.f32 %v578_v42, 0.0  ;;  %v580_v49 = vadd.f32 %v579_v44, %v6784_v60 }
 0x12c   :  { %v1212_v9 = vmax.f32 %v911_v43, 0.0  ;;  %v913_v50 = vadd.f32 %v912_v45, %v6836_v35  ;;  %v581_v52 = vpop.f32.mrf.mxu0  ;;  %v914_v53 = vpop.f32.mrf.mxu1 }
 0x12d   :  { %v1451_v57 = vadd.f32 %v1450_v7, %v1226_v48  ;;  %v1229_v61 = vmax.f32 %v580_v49, 0.0  ;;  %v582_v63 = vadd.f32 %v581_v52, %v6792_v0  ;;  %v915_v1 = vadd.f32 %v914_v53, %v6844_v41 }
 0x12e   :  { %v1521_v54 = vadd.f32 %v1520_v51, %v1212_v9  ;;  %v1215_v3 = vmax.f32 %v913_v50, 0.0  ;;  %v585_v4 = vpop.f32.mrf.mxu0  ;;  %v918_v8 = vpop.f32.mrf.mxu1  ;;  %5649 = vmatmul.mubr.msk.bf16.gmra.mxu0 %vm318_vm2, %v7030_v40  ;;  %5677 = vmatmul.mubr.msk.bf16.gmra.mxu1 %vm318_vm2, %v6950_v38 }
 0x12f   :  { %v1415_v10 = vadd.f32 %v1414_v46, %v1229_v61  ;;  %v1230_v12 = vmax.f32 %v582_v63, 0.0  ;;  %v1216_v14 = vmax.f32 %v915_v1, 0.0  ;;  %v586_v15 = vadd.f32 %v585_v4, %v6784_v60  ;;  %2201 = vmatprep.mubr.bf16.mxu0 %v6502_v5  ;;  %2514 = vmatprep.mubr.bf16.mxu1 %v6502_v5 }
 0x130   :  { %v1485_v17 = vadd.f32 %v1484_v47, %v1215_v3  ;;  %v919_v28 = vadd.f32 %v918_v8, %v6836_v35  ;;  %v587_v18 = vpop.f32.mrf.mxu0  ;;  %v920_v19 = vpop.f32.mrf.mxu1 }
 0x131   :  { %v1452_v20 = vadd.f32 %v1451_v57, %v1230_v12  ;;  %v1522_v23 = vadd.f32 %v1521_v54, %v1216_v14  ;;  %v1233_v26 = vmax.f32 %v586_v15, 0.0  ;;  %v588_v30 = vadd.f32 %v587_v18, %v6792_v0  ;;  %v7068_v18 = vld [vmem:[%s8937_s0 + $0x140] sm:$0xff]  }
 0x132   :  { %v1219_v38 = vmax.f32 %v919_v28, 0.0  ;;  %v921_v31 = vadd.f32 %v920_v19, %v6844_v41  ;;  %v589_v24 = vpop.f32.mrf.mxu0  ;;  %v922_v32 = vpop.f32.mrf.mxu1 }
 0x133   :  { %v1416_v36 = vadd.f32 %v1415_v10, %v1233_v26  ;;  %v1234_v7 = vmax.f32 %v588_v30, 0.0  ;;  %v590_v37 = vadd.f32 %v589_v24, %v6784_v60  ;;  %v923_v39 = vadd.f32 %v922_v32, %v6836_v35 }
 0x134   :  { %v1486_v42 = vadd.f32 %v1485_v17, %v1219_v38  ;;  %v1220_v51 = vmax.f32 %v921_v31, 0.0  ;;  %v591_v43 = vpop.f32.mrf.mxu0  ;;  %v924_v44 = vpop.f32.mrf.mxu1 }
 0x135   :  { %v1453_v45 = vadd.f32 %v1452_v20, %v1234_v7  ;;  %v1237_v46 = vmax.f32 %v590_v37, 0.0  ;;  %v1223_v47 = vmax.f32 %v923_v39, 0.0  ;;  %v592_v48 = vadd.f32 %v591_v43, %v6792_v0 }
 0x136   :  { %v1523_v49 = vadd.f32 %v1522_v23, %v1220_v51  ;;  %v925_v9 = vadd.f32 %v924_v44, %v6844_v41  ;;  %v595_v50 = vpop.f32.mrf.mxu0  ;;  %v928_v52 = vpop.f32.mrf.mxu1  ;;  %5650 = vmatmul.mubr.msk.bf16.gmra.mxu0 %vm318_vm2, %v7049_v33  ;;  %5678 = vmatmul.mubr.msk.bf16.gmra.mxu1 %vm318_vm2, %v6971_v25 }
 0x137   :  { %v1417_v53 = vadd.f32 %v1416_v36, %v1237_v46  ;;  %v1487_v57 = vadd.f32 %v1486_v42, %v1223_v47  ;;  %v1238_v61 = vmax.f32 %v592_v48, 0.0  ;;  %v596_v63 = vadd.f32 %v595_v50, %v6784_v60  ;;  %2211 = vmatprep.mubr.bf16.mxu0 %v6502_v5  ;;  %2524 = vmatprep.mubr.bf16.mxu1 %v6502_v5 }
 0x138   :  { %v1224_v1 = vmax.f32 %v925_v9, 0.0  ;;  %v929_v54 = vadd.f32 %v928_v52, %v6836_v35  ;;  %v597_v3 = vpop.f32.mrf.mxu0  ;;  %v930_v4 = vpop.f32.mrf.mxu1 }
 0x139   :  { %v1454_v8 = vadd.f32 %v1453_v45, %v1238_v61  ;;  %v1241_v10 = vmax.f32 %v596_v63, 0.0  ;;  %v598_v12 = vadd.f32 %v597_v3, %v6792_v0  ;;  %v931_v25 = vadd.f32 %v930_v4, %v6844_v41  ;;  %v7087_v3 = vld [vmem:[%s8937_s0 + $0x148] sm:$0xff]  }
 0x13a   :  { %v1524_v14 = vadd.f32 %v1523_v49, %v1224_v1  ;;  %v1227_v15 = vmax.f32 %v929_v54, 0.0  ;;  %v599_v17 = vpop.f32.mrf.mxu0  ;;  %v932_v28 = vpop.f32.mrf.mxu1 }
 0x13b   :  { %v1418_v19 = vadd.f32 %v1417_v53, %v1241_v10  ;;  %v1242_v20 = vmax.f32 %v598_v12, 0.0  ;;  %v1228_v23 = vmax.f32 %v931_v25, 0.0  ;;  %v600_v26 = vadd.f32 %v599_v17, %v6784_v60 }
 0x13c   :  { %v1488_v30 = vadd.f32 %v1487_v57, %v1227_v15  ;;  %v933_v38 = vadd.f32 %v932_v28, %v6836_v35  ;;  %v601_v31 = vpop.f32.mrf.mxu0  ;;  %v934_v24 = vpop.f32.mrf.mxu1 }
 0x13d   :  { %v1455_v32 = vadd.f32 %v1454_v8, %v1242_v20  ;;  %v1525_v36 = vadd.f32 %v1524_v14, %v1228_v23  ;;  %v1245_v7 = vmax.f32 %v600_v26, 0.0  ;;  %v602_v37 = vadd.f32 %v601_v31, %v6792_v0 }
 0x13e   :  { %v1231_v39 = vmax.f32 %v933_v38, 0.0  ;;  %v935_v42 = vadd.f32 %v934_v24, %v6844_v41  ;;  %v605_v51 = vpop.f32.mrf.mxu0  ;;  %v938_v43 = vpop.f32.mrf.mxu1  ;;  %5651 = vmatmul.mubr.msk.bf16.gmra.mxu0 %vm318_vm2, %v7068_v18  ;;  %5679 = vmatmul.mubr.msk.bf16.gmra.mxu1 %vm318_vm2, %v6992_v13 }
 0x13f   :  { %v1419_v44 = vadd.f32 %v1418_v19, %v1245_v7  ;;  %v1246_v45 = vmax.f32 %v602_v37, 0.0  ;;  %v606_v46 = vadd.f32 %v605_v51, %v6784_v60  ;;  %v939_v47 = vadd.f32 %v938_v43, %v6836_v35  ;;  %2221 = vmatprep.mubr.bf16.mxu0 %v6502_v5  ;;  %2534 = vmatprep.mubr.bf16.mxu1 %v6502_v5 }
 0x140   :  { %v1489_v48 = vadd.f32 %v1488_v30, %v1231_v39  ;;  %v1232_v49 = vmax.f32 %v935_v42, 0.0  ;;  %v607_v9 = vpop.f32.mrf.mxu0  ;;  %v940_v50 = vpop.f32.mrf.mxu1 }
 0x141   :  { %v1456_v52 = vadd.f32 %v1455_v32, %v1246_v45  ;;  %v1249_v53 = vmax.f32 %v606_v46, 0.0  ;;  %v1235_v57 = vmax.f32 %v939_v47, 0.0  ;;  %v608_v61 = vadd.f32 %v607_v9, %v6792_v0  ;;  %v7106_v9 = vld [vmem:[%s8937_s0 + $0x150] sm:$0xff]  }
 0x142   :  { %v1526_v13 = vadd.f32 %v1525_v36, %v1232_v49  ;;  %v941_v63 = vadd.f32 %v940_v50, %v6844_v41  ;;  %v609_v1 = vpop.f32.mrf.mxu0  ;;  %v942_v54 = vpop.f32.mrf.mxu1 }
 0x143   :  { %v1420_v4 = vadd.f32 %v1419_v44, %v1249_v53  ;;  %v1490_v8 = vadd.f32 %v1489_v48, %v1235_v57  ;;  %v1250_v10 = vmax.f32 %v608_v61, 0.0  ;;  %v610_v12 = vadd.f32 %v609_v1, %v6784_v60 }
 0x144   :  { %v1236_v25 = vmax.f32 %v941_v63, 0.0  ;;  %v943_v14 = vadd.f32 %v942_v54, %v6836_v35  ;;  %v611_v15 = vpop.f32.mrf.mxu0  ;;  %v944_v17 = vpop.f32.mrf.mxu1 }
 0x145   :  { %v1457_v28 = vadd.f32 %v1456_v52, %v1250_v10  ;;  %v1253_v19 = vmax.f32 %v610_v12, 0.0  ;;  %v612_v20 = vadd.f32 %v611_v15, %v6792_v0  ;;  %v945_v23 = vadd.f32 %v944_v17, %v6844_v41 }
 0x146   :  { %v1527_v26 = vadd.f32 %v1526_v13, %v1236_v25  ;;  %v1239_v30 = vmax.f32 %v943_v14, 0.0  ;;  %v615_v38 = vpop.f32.mrf.mxu0  ;;  %v948_v31 = vpop.f32.mrf.mxu1  ;;  %5652 = vmatmul.mubr.msk.bf16.gmra.mxu0 %vm318_vm2, %v7087_v3  ;;  %5680 = vmatmul.mubr.msk.bf16.gmra.mxu1 %vm318_vm2, %v7011_v58 }
 0x147   :  { %v1421_v24 = vadd.f32 %v1420_v4, %v1253_v19  ;;  %v1254_v32 = vmax.f32 %v612_v20, 0.0  ;;  %v1240_v36 = vmax.f32 %v945_v23, 0.0  ;;  %v616_v7 = vadd.f32 %v615_v38, %v6784_v60  ;;  %2231 = vmatprep.mubr.bf16.mxu0 %v6502_v5  ;;  %2544 = vmatprep.mubr.bf16.mxu1 %v6502_v5 }
 0x148   :  { %v1491_v37 = vadd.f32 %v1490_v8, %v1239_v30  ;;  %v949_v39 = vadd.f32 %v948_v31, %v6836_v35  ;;  %v617_v42 = vpop.f32.mrf.mxu0  ;;  %v950_v51 = vpop.f32.mrf.mxu1 }
 0x149   :  { %v1458_v43 = vadd.f32 %v1457_v28, %v1254_v32  ;;  %v1528_v44 = vadd.f32 %v1527_v26, %v1240_v36  ;;  %v1257_v45 = vmax.f32 %v616_v7, 0.0  ;;  %v618_v46 = vadd.f32 %v617_v42, %v6792_v0 }
 0x14a   :  { %v1243_v58 = vmax.f32 %v949_v39, 0.0  ;;  %v951_v47 = vadd.f32 %v950_v51, %v6844_v41  ;;  %v619_v48 = vpop.f32.mrf.mxu0  ;;  %v952_v49 = vpop.f32.mrf.mxu1  ;;  %v7129_v39 = vld [vmem:[%s8937_s0 + $0x158] sm:$0xff]  }
 0x14b   :  { %v1422_v50 = vadd.f32 %v1421_v24, %v1257_v45  ;;  %v1258_v52 = vmax.f32 %v618_v46, 0.0  ;;  %v620_v53 = vadd.f32 %v619_v48, %v6784_v60  ;;  %v953_v57 = vadd.f32 %v952_v49, %v6836_v35 }
 0x14c   :  { %v1492_v61 = vadd.f32 %v1491_v37, %v1243_v58  ;;  %v1244_v13 = vmax.f32 %v951_v47, 0.0  ;;  %v621_v63 = vpop.f32.mrf.mxu0  ;;  %v954_v1 = vpop.f32.mrf.mxu1 }
 0x14d   :  { %v1459_v54 = vadd.f32 %v1458_v43, %v1258_v52  ;;  %v1261_v4 = vmax.f32 %v620_v53, 0.0  ;;  %v1247_v8 = vmax.f32 %v953_v57, 0.0  ;;  %v622_v10 = vadd.f32 %v621_v63, %v6792_v0 }
 0x14e   :  { %v1529_v12 = vadd.f32 %v1528_v44, %v1244_v13  ;;  %v955_v25 = vadd.f32 %v954_v1, %v6844_v41  ;;  %v625_v14 = vpop.f32.mrf.mxu0  ;;  %v958_v15 = vpop.f32.mrf.mxu1  ;;  %5653 = vmatmul.mubr.msk.bf16.gmra.mxu0 %vm318_vm2, %v7106_v9  ;;  %5681 = vmatmul.mubr.msk.bf16.gmra.mxu1 %vm318_vm2, %v7030_v40 }
 0x14f   :  { %v7116_v17 = vadd.f32 %v1422_v50, %v1261_v4  ;;  %v1493_v28 = vadd.f32 %v1492_v61, %v1247_v8  ;;  %v1262_v19 = vmax.f32 %v622_v10, 0.0  ;;  %v626_v20 = vadd.f32 %v625_v14, %v6784_v60  ;;  %2241 = vmatprep.mubr.bf16.mxu0 %v6502_v5  ;;  %2554 = vmatprep.mubr.bf16.mxu1 %v6502_v5 }
 0x150   :  { %v1248_v23 = vmax.f32 %v955_v25, 0.0  ;;  %v959_v26 = vadd.f32 %v958_v15, %v6836_v35  ;;  %v627_v30 = vpop.f32.mrf.mxu0  ;;  %v960_v38 = vpop.f32.mrf.mxu1 }
 0x151   :  { %v7122_v31 = vadd.f32 %v1459_v54, %v1262_v19  ;;  %v628_v24 = vadd.f32 %v627_v30, %v6792_v0  ;;  %v961_v36 = vadd.f32 %v960_v38, %v6844_v41  ;;  %v1265_v42 = vmax.f32 %v626_v20, 0.0 }
 0x152   :  { %v1530_v40 = vadd.f32 %v1529_v12, %v1248_v23  ;;  %v1251_v32 = vmax.f32 %v959_v26, 0.0  ;;  %v629_v7 = vpop.f32.mrf.mxu0  ;;  %v962_v37 = vpop.f32.mrf.mxu1  ;;  %v7148_v26 = vld [vmem:[%s8937_s0 + $0x160] sm:$0xff]  }
 0x153   :  { %v630_v51 = vadd.f32 %v629_v7, %v6784_v60  ;;  %v1252_v44 = vmax.f32 %v961_v36, 0.0  ;;  %v963_v45 = vadd.f32 %v962_v37, %v6836_v35  ;;  %v1266_v47 = vmax.f32 %v628_v24, 0.0 }
 0x154   :  { %v1494_v43 = vadd.f32 %v1493_v28, %v1251_v32  ;;  %v631_v46 = vpop.f32.mrf.mxu0  ;;  %v964_v58 = vpop.f32.mrf.mxu1 }
 0x155   :  { %v1269_v48 = vmax.f32 %v630_v51, 0.0  ;;  %v632_v49 = vadd.f32 %v631_v46, %v6792_v0  ;;  %v1531_v50 = vadd.f32 %v1530_v40, %v1252_v44  ;;  %v1255_v52 = vmax.f32 %v963_v45, 0.0 }
 0x156   :  { %v965_v53 = vadd.f32 %v964_v58, %v6844_v41  ;;  %v635_v57 = vpop.f32.mrf.mxu0  ;;  %v968_v61 = vpop.f32.mrf.mxu1  ;;  %5654 = vmatmul.mubr.msk.bf16.gmra.mxu0 %vm318_vm2, %v7129_v39  ;;  %5682 = vmatmul.mubr.msk.bf16.gmra.mxu1 %vm318_vm2, %v7049_v33 }
 0x157   :  { %v1541_v13 = vadd.f32 %v1269_v48, %v1265_v42  ;;  %v1270_v63 = vmax.f32 %v632_v49, 0.0  ;;  %2251 = vmatprep.mubr.bf16.mxu0 %v6502_v5  ;;  %2564 = vmatprep.mubr.bf16.mxu1 %v6502_v5  ;;  %v1495_v1 = vadd.f32 %v1494_v43, %v1255_v52  ;;  %v636_v4 = vadd.f32 %v635_v57, %v6784_v60 }
 0x158   :  { %v1256_v54 = vmax.f32 %v965_v53, 0.0  ;;  %v969_v8 = vadd.f32 %v968_v61, %v6836_v35  ;;  %v637_v10 = vpop.f32.mrf.mxu0  ;;  %v970_v12 = vpop.f32.mrf.mxu1 }
 0x159   :  { %v1578_v25 = vadd.f32 %v1270_v63, %v1266_v47  ;;  %v638_v14 = vadd.f32 %v637_v10, %v6792_v0  ;;  %v1273_v28 = vmax.f32 %v636_v4, 0.0  ;;  %v971_v19 = vadd.f32 %v970_v12, %v6844_v41  ;;  %v7170_v10 = vld [vmem:[%s8937_s0 + $0x168] sm:$0xff]  }
 0x15a   :  { %v1532_v15 = vadd.f32 %v1531_v50, %v1256_v54  ;;  %v1259_v33 = vmax.f32 %v969_v8, 0.0  ;;  %v639_v20 = vpop.f32.mrf.mxu0  ;;  %v972_v23 = vpop.f32.mrf.mxu1 }
 0x15b   :  { %v1274_v30 = vmax.f32 %v638_v14, 0.0  ;;  %v640_v38 = vadd.f32 %v639_v20, %v6784_v60  ;;  %v1542_v24 = vadd.f32 %v1541_v13, %v1273_v28  ;;  %v1260_v32 = vmax.f32 %v971_v19, 0.0 }
 0x15c   :  { %v1496_v40 = vadd.f32 %v1495_v1, %v1259_v33  ;;  %v973_v36 = vadd.f32 %v972_v23, %v6836_v35  ;;  %v641_v7 = vpop.f32.mrf.mxu0  ;;  %v974_v37 = vpop.f32.mrf.mxu1 }
 0x15d   :  { %v1579_v42 = vadd.f32 %v1578_v25, %v1274_v30  ;;  %v1277_v51 = vmax.f32 %v640_v38, 0.0  ;;  %v642_v43 = vadd.f32 %v641_v7, %v6792_v0  ;;  %v975_v44 = vadd.f32 %v974_v37, %v6844_v41 }
 0x15e   :  { %v1533_v45 = vadd.f32 %v1532_v15, %v1260_v32  ;;  %v1263_v46 = vmax.f32 %v973_v36, 0.0  ;;  %v645_v58 = vpop.f32.mrf.mxu0  ;;  %v978_v47 = vpop.f32.mrf.mxu1  ;;  %5655 = vmatmul.mubr.msk.bf16.gmra.mxu0 %vm318_vm2, %v7148_v26  ;;  %5683 = vmatmul.mubr.msk.bf16.gmra.mxu1 %vm318_vm2, %v7068_v18 }
 0x15f   :  { %v1543_v48 = vadd.f32 %v1542_v24, %v1277_v51  ;;  %v1278_v49 = vmax.f32 %v642_v43, 0.0  ;;  %v1264_v50 = vmax.f32 %v975_v44, 0.0  ;;  %v646_v52 = vadd.f32 %v645_v58, %v6784_v60  ;;  %2261 = vmatprep.mubr.bf16.mxu0 %v6502_v5  ;;  %2574 = vmatprep.mubr.bf16.mxu1 %v6502_v5 }
 0x160   :  { %v7161_v53 = vadd.f32 %v1496_v40, %v1263_v46  ;;  %v979_v57 = vadd.f32 %v978_v47, %v6836_v35  ;;  %v647_v61 = vpop.f32.mrf.mxu0  ;;  %v980_v13 = vpop.f32.mrf.mxu1 }
 0x161   :  { %v1580_v63 = vadd.f32 %v1579_v42, %v1278_v49  ;;  %v7164_v1 = vadd.f32 %v1533_v45, %v1264_v50  ;;  %v1281_v54 = vmax.f32 %v646_v52, 0.0  ;;  %v648_v18 = vadd.f32 %v647_v61, %v6792_v0 }
 0x162   :  { %v649_v4 = vpop.f32.mrf.mxu0  ;;  %v982_v8 = vpop.f32.mrf.mxu1  ;;  %v981_v15 = vadd.f32 %v980_v13, %v6844_v41  ;;  %v1267_v38 = vmax.f32 %v979_v57, 0.0  ;;  %v7190_v13 = vld [vmem:[%s8937_s0 + $0x170] sm:$0xff]  }
 0x163   :  { %v1544_v12 = vadd.f32 %v1543_v48, %v1281_v54  ;;  %v1282_v25 = vmax.f32 %v648_v18, 0.0  ;;  %v650_v14 = vadd.f32 %v649_v4, %v6784_v60  ;;  %v983_v28 = vadd.f32 %v982_v8, %v6836_v35 }
 0x164   :  { %v651_v33 = vpop.f32.mrf.mxu0  ;;  %v984_v19 = vpop.f32.mrf.mxu1  ;;  %v1268_v51 = vmax.f32 %v981_v15, 0.0 }
 0x165   :  { %v1581_v20 = vadd.f32 %v1580_v63, %v1282_v25  ;;  %v1285_v23 = vmax.f32 %v650_v14, 0.0  ;;  %v652_v30 = vadd.f32 %v651_v33, %v6792_v0  ;;  %v1271_v24 = vmax.f32 %v983_v28, 0.0 }
 0x166   :  { %v985_v40 = vadd.f32 %v984_v19, %v6844_v41  ;;  %v655_v32 = vpop.f32.mrf.mxu0  ;;  %v988_v36 = vpop.f32.mrf.mxu1  ;;  %5656 = vmatmul.mubr.msk.bf16.gmra.mxu0 %vm318_vm2, %v7170_v10  ;;  %5684 = vmatmul.mubr.msk.bf16.gmra.mxu1 %vm318_vm2, %v7087_v3 }
 0x167   :  { %v1545_v7 = vadd.f32 %v1544_v12, %v1285_v23  ;;  %v1286_v37 = vmax.f32 %v652_v30, 0.0  ;;  %v656_v42 = vadd.f32 %v655_v32, %v6784_v60  ;;  %2271 = vmatprep.mubr.bf16.mxu0 %v6502_v5  ;;  %2584 = vmatprep.mubr.bf16.mxu1 %v6502_v5  ;;  %v1615_v43 = vadd.f32 %v1271_v24, %v1267_v38 }
 0x168   :  { %v1272_v44 = vmax.f32 %v985_v40, 0.0  ;;  %v989_v45 = vadd.f32 %v988_v36, %v6836_v35  ;;  %v657_v46 = vpop.f32.mrf.mxu0  ;;  %v990_v58 = vpop.f32.mrf.mxu1 }
 0x169   :  { %v1582_v47 = vadd.f32 %v1581_v20, %v1286_v37  ;;  %v1289_v48 = vmax.f32 %v656_v42, 0.0  ;;  %v658_v49 = vadd.f32 %v657_v46, %v6792_v0  ;;  %v991_v52 = vadd.f32 %v990_v58, %v6844_v41 }
 0x16a   :  { %v1652_v3 = vadd.f32 %v1272_v44, %v1268_v51  ;;  %v1275_v50 = vmax.f32 %v989_v45, 0.0  ;;  %v659_v57 = vpop.f32.mrf.mxu0  ;;  %v992_v61 = vpop.f32.mrf.mxu1 }
 0x16b   :  { %v1546_v63 = vadd.f32 %v1545_v7, %v1289_v48  ;;  %v1290_v54 = vmax.f32 %v658_v49, 0.0  ;;  %v660_v18 = vadd.f32 %v659_v57, %v6784_v60  ;;  %v1276_v8 = vmax.f32 %v991_v52, 0.0  ;;  %v7209_v49 = vld [vmem:[%s8937_s0 + $0x178] sm:$0xff]  }
 0x16c   :  { %v1616_v4 = vadd.f32 %v1615_v43, %v1275_v50  ;;  %v993_v12 = vadd.f32 %v992_v61, %v6836_v35  ;;  %v661_v25 = vpop.f32.mrf.mxu0  ;;  %v994_v14 = vpop.f32.mrf.mxu1 }
 0x16d   :  { %v1583_v15 = vadd.f32 %v1582_v47, %v1290_v54  ;;  %v1293_v28 = vmax.f32 %v660_v18, 0.0  ;;  %v662_v33 = vadd.f32 %v661_v25, %v6792_v0  ;;  %v995_v19 = vadd.f32 %v994_v14, %v6844_v41 }
 0x16e   :  { %v1653_v20 = vadd.f32 %v1652_v3, %v1276_v8  ;;  %v1279_v23 = vmax.f32 %v993_v12, 0.0  ;;  %v665_v30 = vpop.f32.mrf.mxu0  ;;  %v998_v38 = vpop.f32.mrf.mxu1  ;;  %5657 = vmatmul.mubr.msk.bf16.gmra.mxu0 %vm318_vm2, %v7190_v13  ;;  %5685 = vmatmul.mubr.msk.bf16.gmra.mxu1 %vm318_vm2, %v7106_v9 }
 0x16f   :  { %v1547_v24 = vadd.f32 %v1546_v63, %v1293_v28  ;;  %v1294_v40 = vmax.f32 %v662_v33, 0.0  ;;  %v1280_v32 = vmax.f32 %v995_v19, 0.0  ;;  %v666_v36 = vadd.f32 %v665_v30, %v6784_v60  ;;  %2281 = vmatprep.mubr.bf16.mxu0 %v6502_v5  ;;  %2594 = vmatprep.mubr.bf16.mxu1 %v6502_v5  ;;  %v6152_v19 = vld [vmem:[%s8940_s3 + $0x3a8] ss:$12 sps:$4 sm:$0xff]  }
 0x170   :  { %v1617_v7 = vadd.f32 %v1616_v4, %v1279_v23  ;;  %v999_v37 = vadd.f32 %v998_v38, %v6836_v35  ;;  %v667_v42 = vpop.f32.mrf.mxu0  ;;  %v1000_v51 = vpop.f32.mrf.mxu1 }
 0x171   :  { %v1584_v43 = vadd.f32 %v1583_v15, %v1294_v40  ;;  %v1654_v44 = vadd.f32 %v1653_v20, %v1280_v32  ;;  %v1297_v45 = vmax.f32 %v666_v36, 0.0  ;;  %v668_v46 = vadd.f32 %v667_v42, %v6792_v0  ;;  %v6154_v20 = vld [vmem:[%s8940_s3 + $0x3ac] ss:$12 sps:$4 sm:$0xff]  }
 0x172   :  { %v1283_v9 = vmax.f32 %v999_v37, 0.0  ;;  %v1001_v58 = vadd.f32 %v1000_v51, %v6844_v41  ;;  %v669_v47 = vpop.f32.mrf.mxu0  ;;  %v1002_v48 = vpop.f32.mrf.mxu1  ;;  %v6157_v40 = vld [vmem:[%s8940_s3 + $0x52c] ss:$12 sps:$4 sm:$0xff]   ;;  %4133 = vmatprep.subr.bf16.mxu0 %v6154_v20 }
 0x173   :  { %v1548_v3 = vadd.f32 %v1547_v24, %v1297_v45  ;;  %v1298_v50 = vmax.f32 %v668_v46, 0.0  ;;  %v670_v52 = vadd.f32 %v669_v47, %v6784_v60  ;;  %v1003_v57 = vadd.f32 %v1002_v48, %v6836_v35  ;;  %4134 = vmatpush1.bf16.msra.mxu0 %v6152_v19  ;;  %4174 = vmatprep.subr.bf16.mxu1 %v6157_v40  ;;  %v7240_v47 = vld [vmem:[%s8937_s0 + $0x180] sm:$0xff]  }
 0x174   :  { %v1618_v61 = vadd.f32 %v1617_v7, %v1283_v9  ;;  %v1284_v63 = vmax.f32 %v1001_v58, 0.0  ;;  %v671_v54 = vpop.f32.mrf.mxu0  ;;  %v1004_v18 = vpop.f32.mrf.mxu1 }
 0x175   :  { %v1585_v4 = vadd.f32 %v1584_v43, %v1298_v50  ;;  %v1301_v8 = vmax.f32 %v670_v52, 0.0  ;;  %v1287_v12 = vmax.f32 %v1003_v57, 0.0  ;;  %v672_v25 = vadd.f32 %v671_v54, %v6792_v0 }
 0x176   :  { %v1655_v14 = vadd.f32 %v1654_v44, %v1284_v63  ;;  %v1005_v15 = vadd.f32 %v1004_v18, %v6844_v41  ;;  %v675_v28 = vpop.f32.mrf.mxu0  ;;  %v1008_v33 = vpop.f32.mrf.mxu1  ;;  %5658 = vmatmul.mubr.msk.bf16.gmra.mxu0 %vm318_vm2, %v7209_v49  ;;  %5686 = vmatmul.mubr.msk.bf16.gmra.mxu1 %vm318_vm2, %v7129_v39  ;;  %v6155_v39 = vld [vmem:[%s8940_s3 + $0x528] ss:$12 sps:$4 sm:$0xff]  }
 0x177   :  { %v1549_v23 = vadd.f32 %v1548_v3, %v1301_v8  ;;  %v1619_v30 = vadd.f32 %v1618_v61, %v1287_v12  ;;  %v1302_v38 = vmax.f32 %v672_v25, 0.0  ;;  %v676_v24 = vadd.f32 %v675_v28, %v6784_v60  ;;  %2291 = vmatprep.mubr.bf16.mxu0 %v6502_v5  ;;  %2604 = vmatprep.mubr.bf16.mxu1 %v6502_v5 }
 0x178   :  { %v1288_v32 = vmax.f32 %v1005_v15, 0.0  ;;  %v1009_v36 = vadd.f32 %v1008_v33, %v6836_v35  ;;  %v677_v7 = vpop.f32.mrf.mxu0  ;;  %v1010_v37 = vpop.f32.mrf.mxu1  ;;  %4175 = vmatpush1.bf16.msra.mxu1 %v6155_v39 }
 0x179   :  { %v1586_v42 = vadd.f32 %v1585_v4, %v1302_v38  ;;  %v1305_v51 = vmax.f32 %v676_v24, 0.0  ;;  %v678_v43 = vadd.f32 %v677_v7, %v6792_v0  ;;  %v1011_v44 = vadd.f32 %v1010_v37, %v6844_v41 }
 0x17a   :  { %v1656_v45 = vadd.f32 %v1655_v14, %v1288_v32  ;;  %v1291_v46 = vmax.f32 %v1009_v36, 0.0  ;;  %v679_v9 = vpop.f32.mrf.mxu0  ;;  %v1012_v58 = vpop.f32.mrf.mxu1 }
 0x17b   :  { %v1550_v48 = vadd.f32 %v1549_v23, %v1305_v51  ;;  %v1306_v3 = vmax.f32 %v678_v43, 0.0  ;;  %v1292_v50 = vmax.f32 %v1011_v44, 0.0  ;;  %v680_v52 = vadd.f32 %v679_v9, %v6784_v60  ;;  %v7259_v43 = vld [vmem:[%s8937_s0 + $0x188] sm:$0xff]  }
 0x17c   :  { %v1620_v57 = vadd.f32 %v1619_v30, %v1291_v46  ;;  %v1013_v61 = vadd.f32 %v1012_v58, %v6836_v35  ;;  %v681_v63 = vpop.f32.mrf.mxu0  ;;  %v1014_v54 = vpop.f32.mrf.mxu1 }
 0x17d   :  { %v1587_v18 = vadd.f32 %v1586_v42, %v1306_v3  ;;  %v1657_v4 = vadd.f32 %v1656_v45, %v1292_v50  ;;  %v1309_v8 = vmax.f32 %v680_v52, 0.0  ;;  %v682_v12 = vadd.f32 %v681_v63, %v6792_v0 }
 0x17e   :  { %v1295_v25 = vmax.f32 %v1013_v61, 0.0  ;;  %v1015_v14 = vadd.f32 %v1014_v54, %v6844_v41  ;;  %v685_v15 = vpop.f32.mrf.mxu0  ;;  %v1018_v28 = vpop.f32.mrf.mxu1  ;;  %5659 = vmatmul.mubr.msk.bf16.gmra.mxu0 %vm318_vm2, %v7240_v47  ;;  %5687 = vmatmul.mubr.msk.bf16.gmra.mxu1 %vm318_vm2, %v7148_v26 }
 0x17f   :  { %v1551_v33 = vadd.f32 %v1550_v48, %v1309_v8  ;;  %v1310_v19 = vmax.f32 %v682_v12, 0.0  ;;  %v686_v20 = vadd.f32 %v685_v15, %v6784_v60  ;;  %v1019_v23 = vadd.f32 %v1018_v28, %v6836_v35  ;;  %2301 = vmatprep.mubr.bf16.mxu0 %v6502_v5  ;;  %2614 = vmatprep.mubr.bf16.mxu1 %v6502_v5  ;;  %v6159_v12 = vld [vmem:[%s8940_s3 + $0x390] ss:$12 sps:$4 sm:$0xff]  }
 0x180   :  { %v1621_v30 = vadd.f32 %v1620_v57, %v1295_v25  ;;  %v1296_v38 = vmax.f32 %v1015_v14, 0.0  ;;  %v687_v24 = vpop.f32.mrf.mxu0  ;;  %v1020_v39 = vpop.f32.mrf.mxu1  ;;  %v6161_v25 = vld [vmem:[%s8940_s3 + $0x394] ss:$12 sps:$4 sm:$0xff]  }
 0x181   :  { %v1588_v40 = vadd.f32 %v1587_v18, %v1310_v19  ;;  %v1313_v32 = vmax.f32 %v686_v20, 0.0  ;;  %v1299_v36 = vmax.f32 %v1019_v23, 0.0  ;;  %v688_v7 = vadd.f32 %v687_v24, %v6792_v0  ;;  %4135 = vmatprep.subr.bf16.mxu0 %v6161_v25 }
 0x182   :  { %v1658_v26 = vadd.f32 %v1657_v4, %v1296_v38  ;;  %v1021_v37 = vadd.f32 %v1020_v39, %v6844_v41  ;;  %v689_v42 = vpop.f32.mrf.mxu0  ;;  %v1022_v51 = vpop.f32.mrf.mxu1  ;;  %v6164_v38 = vld [vmem:[%s8940_s3 + $0x514] ss:$12 sps:$4 sm:$0xff]   ;;  %4136 = vmatpush1.bf16.msra.mxu0 %v6159_v12 }
 0x183   :  { %v1552_v44 = vadd.f32 %v1551_v33, %v1313_v32  ;;  %v1622_v45 = vadd.f32 %v1621_v30, %v1299_v36  ;;  %v1314_v46 = vmax.f32 %v688_v7, 0.0  ;;  %v690_v9 = vadd.f32 %v689_v42, %v6784_v60  ;;  %v6162_v30 = vld [vmem:[%s8940_s3 + $0x510] ss:$12 sps:$4 sm:$0xff]   ;;  %4176 = vmatprep.subr.bf16.mxu1 %v6164_v38 }
 0x184   :  { %v1300_v58 = vmax.f32 %v1021_v37, 0.0  ;;  %v1023_v48 = vadd.f32 %v1022_v51, %v6836_v35  ;;  %v691_v3 = vpop.f32.mrf.mxu0  ;;  %v1024_v50 = vpop.f32.mrf.mxu1  ;;  %v7290_v42 = vld [vmem:[%s8937_s0 + $0x190] sm:$0xff]   ;;  %4177 = vmatpush1.bf16.msra.mxu1 %v6162_v30 }
 0x185   :  { %v1589_v52 = vadd.f32 %v1588_v40, %v1314_v46  ;;  %v1317_v57 = vmax.f32 %v690_v9, 0.0  ;;  %v692_v61 = vadd.f32 %v691_v3, %v6792_v0  ;;  %v1025_v63 = vadd.f32 %v1024_v50, %v6844_v41 }
 0x186   :  { %v1659_v54 = vadd.f32 %v1658_v26, %v1300_v58  ;;  %v1303_v18 = vmax.f32 %v1023_v48, 0.0  ;;  %v695_v4 = vpop.f32.mrf.mxu0  ;;  %v1028_v8 = vpop.f32.mrf.mxu1  ;;  %5660 = vmatmul.mubr.msk.bf16.gmra.mxu0 %vm318_vm2, %v7259_v43  ;;  %5688 = vmatmul.mubr.msk.bf16.gmra.mxu1 %vm318_vm2, %v7170_v10 }
 0x187   :  { %v1553_v14 = vadd.f32 %v1552_v44, %v1317_v57  ;;  %v1318_v15 = vmax.f32 %v692_v61, 0.0  ;;  %v1304_v28 = vmax.f32 %v1025_v63, 0.0  ;;  %v696_v33 = vadd.f32 %v695_v4, %v6784_v60  ;;  %2311 = vmatprep.mubr.bf16.mxu0 %v6502_v5  ;;  %2624 = vmatprep.mubr.bf16.mxu1 %v6502_v5 }
 0x188   :  { %v1623_v19 = vadd.f32 %v1622_v45, %v1303_v18  ;;  %v1029_v10 = vadd.f32 %v1028_v8, %v6836_v35  ;;  %v697_v20 = vpop.f32.mrf.mxu0  ;;  %v1030_v23 = vpop.f32.mrf.mxu1 }
 0x189   :  { %v1590_v24 = vadd.f32 %v1589_v52, %v1318_v15  ;;  %v1660_v39 = vadd.f32 %v1659_v54, %v1304_v28  ;;  %v1321_v40 = vmax.f32 %v696_v33, 0.0  ;;  %v698_v32 = vadd.f32 %v697_v20, %v6792_v0 }
 0x18a   :  { %v1307_v36 = vmax.f32 %v1029_v10, 0.0  ;;  %v1031_v7 = vadd.f32 %v1030_v23, %v6844_v41  ;;  %v699_v26 = vpop.f32.mrf.mxu0  ;;  %v1032_v37 = vpop.f32.mrf.mxu1 }
 0x18b   :  { %v1554_v51 = vadd.f32 %v1553_v14, %v1321_v40  ;;  %v1322_v44 = vmax.f32 %v698_v32, 0.0  ;;  %v700_v45 = vadd.f32 %v699_v26, %v6784_v60  ;;  %v1033_v46 = vadd.f32 %v1032_v37, %v6836_v35  ;;  %v7309_v40 = vld [vmem:[%s8937_s0 + $0x198] sm:$0xff]  }
 0x18c   :  { %v1624_v9 = vadd.f32 %v1623_v19, %v1307_v36  ;;  %v1308_v58 = vmax.f32 %v1031_v7, 0.0  ;;  %v701_v48 = vpop.f32.mrf.mxu0  ;;  %v1034_v3 = vpop.f32.mrf.mxu1 }
 0x18d   :  { %v1591_v50 = vadd.f32 %v1590_v24, %v1322_v44  ;;  %v1325_v52 = vmax.f32 %v700_v45, 0.0  ;;  %v1311_v57 = vmax.f32 %v1033_v46, 0.0  ;;  %v702_v61 = vadd.f32 %v701_v48, %v6792_v0 }
 0x18e   :  { %v1661_v63 = vadd.f32 %v1660_v39, %v1308_v58  ;;  %v1035_v54 = vadd.f32 %v1034_v3, %v6844_v41  ;;  %v705_v18 = vpop.f32.mrf.mxu0  ;;  %v1038_v4 = vpop.f32.mrf.mxu1  ;;  %5661 = vmatmul.mubr.msk.bf16.gmra.mxu0 %vm318_vm2, %v7290_v42  ;;  %5689 = vmatmul.mubr.msk.bf16.gmra.mxu1 %vm318_vm2, %v7190_v13  ;;  %v6165_v3 = vld [vmem:[%s8940_s3 + $0x378] ss:$12 sps:$4 sm:$0xff]  }
 0x18f   :  { %v1555_v8 = vadd.f32 %v1554_v51, %v1325_v52  ;;  %v1625_v12 = vadd.f32 %v1624_v9, %v1311_v57  ;;  %v1326_v25 = vmax.f32 %v702_v61, 0.0  ;;  %v706_v14 = vadd.f32 %v705_v18, %v6784_v60  ;;  %2321 = vmatprep.mubr.bf16.mxu0 %v6502_v5  ;;  %2634 = vmatprep.mubr.bf16.mxu1 %v6502_v5 }
 0x190   :  { %v1312_v15 = vmax.f32 %v1035_v54, 0.0  ;;  %v1039_v28 = vadd.f32 %v1038_v4, %v6836_v35  ;;  %v707_v33 = vpop.f32.mrf.mxu0  ;;  %v1040_v19 = vpop.f32.mrf.mxu1 }
 0x191   :  { %v1592_v10 = vadd.f32 %v1591_v50, %v1326_v25  ;;  %v1329_v20 = vmax.f32 %v706_v14, 0.0  ;;  %v708_v23 = vadd.f32 %v707_v33, %v6792_v0  ;;  %v1041_v13 = vadd.f32 %v1040_v19, %v6844_v41  ;;  %v6167_v50 = vld [vmem:[%s8940_s3 + $0x37c] ss:$12 sps:$4 sm:$0xff]  }
 0x192   :  { %v1662_v30 = vadd.f32 %v1661_v63, %v1312_v15  ;;  %v1315_v38 = vmax.f32 %v1039_v28, 0.0  ;;  %v709_v24 = vpop.f32.mrf.mxu0  ;;  %v1042_v39 = vpop.f32.mrf.mxu1  ;;  %4137 = vmatprep.subr.bf16.mxu0 %v6167_v50  ;;  %v6168_v28 = vld [vmem:[%s8940_s3 + $0x4f8] ss:$12 sps:$4 sm:$0xff]  }
 0x193   :  { %v1556_v32 = vadd.f32 %v1555_v8, %v1329_v20  ;;  %v1330_v36 = vmax.f32 %v708_v23, 0.0  ;;  %v1316_v7 = vmax.f32 %v1041_v13, 0.0  ;;  %v710_v26 = vadd.f32 %v709_v24, %v6784_v60  ;;  %4138 = vmatpush1.bf16.msra.mxu0 %v6165_v3  ;;  %v7340_v24 = vld [vmem:[%s8937_s0 + $0x1a0] sm:$0xff]  }
 0x194   :  { %v1626_v37 = vadd.f32 %v1625_v12, %v1315_v38  ;;  %v1043_v51 = vadd.f32 %v1042_v39, %v6836_v35  ;;  %v711_v44 = vpop.f32.mrf.mxu0  ;;  %v1044_v45 = vpop.f32.mrf.mxu1 }
 0x195   :  { %v1593_v46 = vadd.f32 %v1592_v10, %v1330_v36  ;;  %v1663_v9 = vadd.f32 %v1662_v30, %v1316_v7  ;;  %v1333_v58 = vmax.f32 %v710_v26, 0.0  ;;  %v712_v48 = vadd.f32 %v711_v44, %v6792_v0 }
 0x196   :  { %v1319_v52 = vmax.f32 %v1043_v51, 0.0  ;;  %v1045_v57 = vadd.f32 %v1044_v45, %v6844_v41  ;;  %v715_v61 = vpop.f32.mrf.mxu0  ;;  %v1048_v63 = vpop.f32.mrf.mxu1  ;;  %5662 = vmatmul.mubr.msk.bf16.gmra.mxu0 %vm318_vm2, %v7309_v40  ;;  %5690 = vmatmul.mubr.msk.bf16.gmra.mxu1 %vm318_vm2, %v7209_v49  ;;  %v6170_v49 = vld [vmem:[%s8940_s3 + $0x4fc] ss:$12 sps:$4 sm:$0xff]  }
 0x197   :  { %v1557_v54 = vadd.f32 %v1556_v32, %v1333_v58  ;;  %v1334_v18 = vmax.f32 %v712_v48, 0.0  ;;  %v716_v4 = vadd.f32 %v715_v61, %v6784_v60  ;;  %v1049_v8 = vadd.f32 %v1048_v63, %v6836_v35  ;;  %2331 = vmatprep.mubr.bf16.mxu0 %v6502_v5  ;;  %2644 = vmatprep.mubr.bf16.mxu1 %v6502_v5 }
 0x198   :  { %v1627_v12 = vadd.f32 %v1626_v37, %v1319_v52  ;;  %v1320_v25 = vmax.f32 %v1045_v57, 0.0  ;;  %v717_v14 = vpop.f32.mrf.mxu0  ;;  %v1050_v15 = vpop.f32.mrf.mxu1  ;;  %4178 = vmatprep.subr.bf16.mxu1 %v6170_v49  ;;  %v7348_v48 = vadd.f32 %v6787_v62, %v6784_v60  ;;  %v7362_v49 = vadd.f32 %v6796_v2, %v6792_v0 }
 0x199   :  { %v1594_v33 = vadd.f32 %v1593_v46, %v1334_v18  ;;  %v1337_v19 = vmax.f32 %v716_v4, 0.0  ;;  %v1323_v10 = vmax.f32 %v1049_v8, 0.0  ;;  %v718_v20 = vadd.f32 %v717_v14, %v6792_v0  ;;  %4179 = vmatpush1.bf16.msra.mxu1 %v6168_v28 }
 0x19a   :  { %v1664_v23 = vadd.f32 %v1663_v9, %v1320_v25  ;;  %v1051_v13 = vadd.f32 %v1050_v15, %v6844_v41  ;;  %v719_v30 = vpop.f32.mrf.mxu0  ;;  %v1052_v38 = vpop.f32.mrf.mxu1  ;;  %v7374_v2 = vadd.f32 %v6799_v6, %v6784_v60 }
 0x19b   :  { %v1558_v39 = vadd.f32 %v1557_v54, %v1337_v19  ;;  %v1628_v32 = vadd.f32 %v1627_v12, %v1323_v10  ;;  %v1338_v36 = vmax.f32 %v718_v20, 0.0  ;;  %v720_v7 = vadd.f32 %v719_v30, %v6784_v60 }
 0x19c   :  { %v1324_v26 = vmax.f32 %v1051_v13, 0.0  ;;  %v1053_v37 = vadd.f32 %v1052_v38, %v6836_v35  ;;  %v721_v51 = vpop.f32.mrf.mxu0  ;;  %v1054_v44 = vpop.f32.mrf.mxu1 }
 0x19d   :  { %v1595_v45 = vadd.f32 %v1594_v33, %v1338_v36  ;;  %v1341_v46 = vmax.f32 %v720_v7, 0.0  ;;  %v722_v9 = vadd.f32 %v721_v51, %v6792_v0  ;;  %v1055_v58 = vadd.f32 %v1054_v44, %v6844_v41 }
 0x19e   :  { %v1665_v3 = vadd.f32 %v1664_v23, %v1324_v26  ;;  %v1327_v50 = vmax.f32 %v1053_v37, 0.0  ;;  %v725_v52 = vpop.f32.mrf.mxu0  ;;  %v1058_v57 = vpop.f32.mrf.mxu1  ;;  %5663 = vmatmul.mubr.msk.bf16.gmra.mxu0 %vm318_vm2, %v7340_v24  ;;  %5691 = vmatmul.mubr.msk.bf16.gmra.mxu1 %vm318_vm2, %v7240_v47  ;;  %v1377_v47 = vmax.f32 %v7348_v48, 0.0  ;;  %v7368_v23 = vld [vmem:[%s8937_s0 + $0x1a8] sm:$0xff]  }
 0x19f   :  { %v1559_v61 = vadd.f32 %v1558_v39, %v1341_v46  ;;  %v1342_v63 = vmax.f32 %v722_v9, 0.0  ;;  %v1328_v54 = vmax.f32 %v1055_v58, 0.0  ;;  %v726_v18 = vadd.f32 %v725_v52, %v6784_v60  ;;  %2341 = vmatprep.mubr.bf16.mxu0 %v6502_v5  ;;  %2654 = vmatprep.mubr.bf16.mxu1 %v6502_v5  ;;  %v6171_v52 = vld [vmem:[%s8940_s3 + $0x360] ss:$12 sps:$4 sm:$0xff]  }
 0x1a0   :  { %v1629_v62 = vadd.f32 %v1628_v32, %v1327_v50  ;;  %v1059_v4 = vadd.f32 %v1058_v57, %v6836_v35  ;;  %v727_v8 = vpop.f32.mrf.mxu0  ;;  %v1060_v12 = vpop.f32.mrf.mxu1  ;;  %v7378_v32 = vadd.f32 %v6807_v11, %v6792_v0  ;;  %v1378_v9 = vmax.f32 %v7362_v49, 0.0 }
 0x1a1   :  { %v1596_v25 = vadd.f32 %v1595_v45, %v1342_v63  ;;  %v1666_v14 = vadd.f32 %v1665_v3, %v1328_v54  ;;  %v1345_v15 = vmax.f32 %v726_v18, 0.0  ;;  %v728_v28 = vadd.f32 %v727_v8, %v6792_v0  ;;  %v6176_v18 = vld [vmem:[%s8940_s3 + $0x4e4] ss:$12 sps:$4 sm:$0xff]  }
 0x1a2   :  { %v1331_v33 = vmax.f32 %v1059_v4, 0.0  ;;  %v1061_v19 = vadd.f32 %v1060_v12, %v6844_v41  ;;  %v729_v10 = vpop.f32.mrf.mxu0  ;;  %v1062_v20 = vpop.f32.mrf.mxu1  ;;  %v7384_v58 = vadd.f32 %v6812_v16, %v6784_v60  ;;  %v6173_v16 = vld [vmem:[%s8940_s3 + $0x364] ss:$12 sps:$4 sm:$0xff]   ;;  %v7409_v4 = vadd.f32 %v6818_v21, %v6792_v0  ;;  %4180 = vmatprep.subr.bf16.mxu1 %v6176_v18 }
 0x1a3   :  { %v1560_v13 = vadd.f32 %v1559_v61, %v1345_v15  ;;  %v1346_v30 = vmax.f32 %v728_v28, 0.0  ;;  %v730_v38 = vadd.f32 %v729_v10, %v6784_v60  ;;  %v1063_v39 = vadd.f32 %v1062_v20, %v6836_v35  ;;  %4139 = vmatprep.subr.bf16.mxu0 %v6173_v16 }
 0x1a4   :  { %v1630_v36 = vadd.f32 %v1629_v62, %v1331_v33  ;;  %v1332_v7 = vmax.f32 %v1061_v19, 0.0  ;;  %v731_v26 = vpop.f32.mrf.mxu0  ;;  %v1064_v37 = vpop.f32.mrf.mxu1  ;;  %v1381_v62 = vmax.f32 %v7374_v2, 0.0  ;;  %4140 = vmatpush1.bf16.msra.mxu0 %v6171_v52  ;;  %v1382_v10 = vmax.f32 %v7378_v32, 0.0 }
 0x1a5   :  { %v1597_v51 = vadd.f32 %v1596_v25, %v1346_v30  ;;  %v1349_v44 = vmax.f32 %v730_v38, 0.0  ;;  %v1335_v45 = vmax.f32 %v1063_v39, 0.0  ;;  %v732_v46 = vadd.f32 %v731_v26, %v6792_v0  ;;  %v7419_v39 = vld [vmem:[%s8937_s0 + $0x1b0] sm:$0xff]  }
 0x1a6   :  { %v1667_v6 = vadd.f32 %v1666_v14, %v1332_v7  ;;  %v1065_v3 = vadd.f32 %v1064_v37, %v6844_v41  ;;  %v735_v11 = vpop.f32.mrf.mxu0  ;;  %v1068_v50 = vpop.f32.mrf.mxu1  ;;  %5664 = vmatmul.mubr.msk.bf16.gmra.mxu0 %vm318_vm2, %v7368_v23  ;;  %5692 = vmatmul.mubr.msk.bf16.gmra.mxu1 %vm318_vm2, %v7259_v43  ;;  %v6174_v43 = vld [vmem:[%s8940_s3 + $0x4e0] ss:$12 sps:$4 sm:$0xff]   ;;  %v1385_v20 = vmax.f32 %v7384_v58, 0.0 }
 0x1a7   :  { %v1561_v57 = vadd.f32 %v1560_v13, %v1349_v44  ;;  %v1631_v61 = vadd.f32 %v1630_v36, %v1335_v45  ;;  %v1350_v63 = vmax.f32 %v732_v46, 0.0  ;;  %v736_v54 = vadd.f32 %v735_v11, %v6784_v60  ;;  %2351 = vmatprep.mubr.bf16.mxu0 %v6502_v5  ;;  %2664 = vmatprep.mubr.bf16.mxu1 %v6502_v5 }
 0x1a8   :  { %v1336_v8 = vmax.f32 %v1065_v3, 0.0  ;;  %v1069_v12 = vadd.f32 %v1068_v50, %v6836_v35  ;;  %v737_v25 = vpop.f32.mrf.mxu0  ;;  %v1070_v14 = vpop.f32.mrf.mxu1  ;;  %4181 = vmatpush1.bf16.msra.mxu1 %v6174_v43  ;;  %v1424_v44 = vrot.slane %v7116_v17, 4 }
 0x1a9   :  { %v1598_v15 = vadd.f32 %v1597_v51, %v1350_v63  ;;  %v1353_v28 = vmax.f32 %v736_v54, 0.0  ;;  %v738_v33 = vadd.f32 %v737_v25, %v6792_v0  ;;  %v1071_v19 = vadd.f32 %v1070_v14, %v6844_v41 }
 0x1aa   :  { %v1668_v21 = vadd.f32 %v1667_v6, %v1336_v8  ;;  %v1339_v13 = vmax.f32 %v1069_v12, 0.0  ;;  %v739_v30 = vpop.f32.mrf.mxu0  ;;  %v1072_v38 = vpop.f32.mrf.mxu1  ;;  %v1386_v51 = vmax.f32 %v7409_v4, 0.0  ;;  %v1461_v63 = vrot.slane %v7122_v31, 4 }
 0x1ab   :  { %v1562_v36 = vadd.f32 %v1561_v57, %v1353_v28  ;;  %v1354_v7 = vmax.f32 %v738_v33, 0.0  ;;  %v1340_v26 = vmax.f32 %v1071_v19, 0.0  ;;  %v740_v37 = vadd.f32 %v739_v30, %v6784_v60 }
 0x1ac   :  { %v1632_v45 = vadd.f32 %v1631_v61, %v1339_v13  ;;  %v1073_v46 = vadd.f32 %v1072_v38, %v6836_v35  ;;  %v741_v6 = vpop.f32.mrf.mxu0  ;;  %v1074_v3 = vpop.f32.mrf.mxu1  ;;  %v7428_v57 = vadd.f32 %v6824_v27, %v6784_v60  ;;  %v7442_v14 = vadd.f32 %v6833_v34, %v6792_v0 }
 0x1ad   :  { %v1599_v11 = vadd.f32 %v1598_v15, %v1354_v7  ;;  %v1669_v50 = vadd.f32 %v1668_v21, %v1340_v26  ;;  %v1357_v52 = vmax.f32 %v740_v37, 0.0  ;;  %v742_v16 = vadd.f32 %v741_v6, %v6792_v0 }
 0x1ae   :  { %v1343_v54 = vmax.f32 %v1073_v46, 0.0  ;;  %v1075_v43 = vadd.f32 %v1074_v3, %v6844_v41  ;;  %v745_v18 = vpop.f32.mrf.mxu0  ;;  %v1078_v61 = vpop.f32.mrf.mxu1  ;;  %5665 = vmatmul.mubr.msk.bf16.gmra.mxu0 %vm318_vm2, %v7419_v39  ;;  %5693 = vmatmul.mubr.msk.bf16.gmra.mxu1 %vm318_vm2, %v7290_v42  ;;  %v1425_v15 = vadd.f32 %v1424_v44, %v7116_v17  ;;  %v1462_v7 = vadd.f32 %v1461_v63, %v7122_v31  ;;  %v7452_v17 = vld [vmem:[%s8937_s0 + $0x1b8] sm:$0xff]  }
 0x1af   :  { %v1563_v8 = vadd.f32 %v1562_v36, %v1357_v52  ;;  %v1358_v12 = vmax.f32 %v742_v16, 0.0  ;;  %v746_v25 = vadd.f32 %v745_v18, %v6784_v60  ;;  %v1079_v27 = vadd.f32 %v1078_v61, %v6836_v35  ;;  %2361 = vmatprep.mubr.bf16.mxu0 %v6502_v5  ;;  %2674 = vmatprep.mubr.bf16.mxu1 %v6502_v5 }
 0x1b0   :  { %v1633_v28 = vadd.f32 %v1632_v45, %v1343_v54  ;;  %v1344_v33 = vmax.f32 %v1075_v43, 0.0  ;;  %v747_v19 = vpop.f32.mrf.mxu0  ;;  %v1080_v42 = vpop.f32.mrf.mxu1  ;;  %v1389_v36 = vmax.f32 %v7428_v57, 0.0  ;;  %v1426_v52 = vrot.slane %v1425_v15, 2 }
 0x1b1   :  { %v1600_v21 = vadd.f32 %v1599_v11, %v1358_v12  ;;  %v1361_v13 = vmax.f32 %v746_v25, 0.0  ;;  %v1347_v30 = vmax.f32 %v1079_v27, 0.0  ;;  %v748_v38 = vadd.f32 %v747_v19, %v6792_v0  ;;  %v6177_v19 = vld [vmem:[%s8940_s3 + $0x348] ss:$12 sps:$4 sm:$0xff]  }
 0x1b2   :  { %v1670_v26 = vadd.f32 %v1669_v50, %v1344_v33  ;;  %v1081_v37 = vadd.f32 %v1080_v42, %v6844_v41  ;;  %v749_v34 = vpop.f32.mrf.mxu0  ;;  %v1082_v46 = vpop.f32.mrf.mxu1  ;;  %v1390_v11 = vmax.f32 %v7442_v14, 0.0  ;;  %v1463_v12 = vrot.slane %v1462_v7, 2  ;;  %v6179_v42 = vld [vmem:[%s8940_s3 + $0x34c] ss:$12 sps:$4 sm:$0xff]  }
 0x1b3   :  { %v1564_v44 = vadd.f32 %v1563_v8, %v1361_v13  ;;  %v1634_v45 = vadd.f32 %v1633_v28, %v1347_v30  ;;  %v1362_v6 = vmax.f32 %v748_v38, 0.0  ;;  %v750_v3 = vadd.f32 %v749_v34, %v6784_v60  ;;  %v7462_v8 = vld [vmem:[%s8939_s2 + $0x4] sm:$0xf]  ;;  %4141 = vmatprep.subr.bf16.mxu0 %v6179_v42 }
 0x1b4   :  { %v1348_v16 = vmax.f32 %v1081_v37, 0.0  ;;  %v1083_v31 = vadd.f32 %v1082_v46, %v6836_v35  ;;  %v751_v50 = vpop.f32.mrf.mxu0  ;;  %v1084_v63 = vpop.f32.mrf.mxu1  ;;  %4142 = vmatpush1.bf16.msra.mxu0 %v6177_v19 }
 0x1b5   :  { %v1601_v54 = vadd.f32 %v1600_v21, %v1362_v6  ;;  %v1365_v43 = vmax.f32 %v750_v3, 0.0  ;;  %v752_v18 = vadd.f32 %v751_v50, %v6792_v0  ;;  %v1085_v61 = vadd.f32 %v1084_v63, %v6844_v41  ;;  %v6182_v3 = vld [vmem:[%s8940_s3 + $0x4cc] ss:$12 sps:$4 sm:$0xff]  }
 0x1b6   :  { %v1671_v25 = vadd.f32 %v1670_v26, %v1348_v16  ;;  %v1351_v27 = vmax.f32 %v1083_v31, 0.0  ;;  %v755_v28 = vpop.f32.mrf.mxu0  ;;  %v1088_v33 = vpop.f32.mrf.mxu1  ;;  %5666 = vmatmul.mubr.msk.bf16.gmra.mxu0 %vm318_vm2, %v7452_v17  ;;  %5694 = vmatmul.mubr.msk.bf16.gmra.mxu1 %vm318_vm2, %v7309_v40  ;;  %v1427_v26 = vadd.f32 %v1426_v52, %v1425_v15  ;;  %v7480_v6 = vrot.slane %v7462_v8, %v6772_v56 }
 0x1b7   :  { %v1565_v21 = vadd.f32 %v1564_v44, %v1365_v43  ;;  %v1366_v13 = vmax.f32 %v752_v18, 0.0  ;;  %v1352_v30 = vmax.f32 %v1085_v61, 0.0  ;;  %v756_v38 = vadd.f32 %v755_v28, %v6784_v60  ;;  %2371 = vmatprep.mubr.bf16.mxu0 %v6502_v5  ;;  %2684 = vmatprep.mubr.bf16.mxu1 %v6502_v5  ;;  %v6180_v44 = vld [vmem:[%s8940_s3 + $0x4c8] ss:$12 sps:$4 sm:$0xff]   ;;  %v7493_v61 = vld [vmem:[%s8937_s0 + $0x1c0] sm:$0xff]  }
 0x1b8   :  { %v1635_v37 = vadd.f32 %v1634_v45, %v1351_v27  ;;  %v1089_v40 = vadd.f32 %v1088_v33, %v6836_v35  ;;  %v757_v34 = vpop.f32.mrf.mxu0  ;;  %v1090_v46 = vpop.f32.mrf.mxu1  ;;  %v1464_v31 = vadd.f32 %v1463_v12, %v1462_v7  ;;  %v7497_v27 = vrot.slane %v7462_v8, %v6781_v59  ;;  %4182 = vmatprep.subr.bf16.mxu1 %v6182_v3 }
 0x1b9   :  { %v1602_v16 = vadd.f32 %v1601_v54, %v1366_v13  ;;  %v1672_v15 = vadd.f32 %v1671_v25, %v1352_v30  ;;  %v1369_v45 = vmax.f32 %v756_v38, 0.0  ;;  %v758_v52 = vadd.f32 %v757_v34, %v6792_v0  ;;  %4183 = vmatpush1.bf16.msra.mxu1 %v6180_v44 }
 0x1ba   :  { %v1355_v50 = vmax.f32 %v1089_v40, 0.0  ;;  %v1091_v63 = vadd.f32 %v1090_v46, %v6844_v41  ;;  %v759_v43 = vpop.f32.mrf.mxu0  ;;  %v1092_v18 = vpop.f32.mrf.mxu1  ;;  %v1428_v12 = vrot.slane %v1427_v26, 1  ;;  %v1498_v33 = vrot.slane %v7161_v53, 4 }
 0x1bb   :  { %v1566_v54 = vadd.f32 %v1565_v21, %v1369_v45  ;;  %v1370_v25 = vmax.f32 %v758_v52, 0.0  ;;  %v760_v28 = vadd.f32 %v759_v43, %v6784_v60  ;;  %v1093_v7 = vadd.f32 %v1092_v18, %v6836_v35 }
 0x1bc   :  { %v1636_v19 = vadd.f32 %v1635_v37, %v1355_v50  ;;  %v1356_v42 = vmax.f32 %v1091_v63, 0.0  ;;  %v761_v13 = vpop.f32.mrf.mxu0  ;;  %v1094_v30 = vpop.f32.mrf.mxu1  ;;  %v1465_v3 = vrot.slane %v1464_v31, 1  ;;  %v1535_v21 = vrot.slane %v7164_v1, 4 }
 0x1bd   :  { %v1603_v38 = vadd.f32 %v1602_v16, %v1370_v25  ;;  %v1373_v40 = vmax.f32 %v760_v28, 0.0  ;;  %v1359_v34 = vmax.f32 %v1093_v7, 0.0  ;;  %v762_v46 = vadd.f32 %v761_v13, %v6792_v0  ;;  %v7528_v13 = vld [vmem:[%s8937_s0 + $0x1c8] sm:$0xff]  }
 0x1be   :  { %v1673_v45 = vadd.f32 %v1672_v15, %v1356_v42  ;;  %v1095_v60 = vadd.f32 %v1094_v30, %v6844_v41  ;;  %v1098_v52 = vpop.f32.mrf.mxu1  ;;  %v2133_v44 = vpop.f32.mrf.mxu0  ;;  %5667 = vmatmul.mubr.msk.bf16.gmra.mxu0 %vm318_vm2, %v7493_v61  ;;  %5695 = vmatmul.mubr.msk.bf16.gmra.mxu1 %vm318_vm2, %v7340_v24  ;;  %v7512_v0 = vadd.f32 %v1428_v12, %v1427_v26 }
 0x1bf   :  { %v1567_v37 = vadd.f32 %v1566_v54, %v1373_v40  ;;  %v1637_v16 = vadd.f32 %v1636_v19, %v1359_v34  ;;  %v1374_v50 = vmax.f32 %v762_v46, 0.0  ;;  %v1099_v63 = vadd.f32 %v1098_v52, %v6836_v35  ;;  %2381 = vmatprep.mubr.bf16.mxu0 %v6502_v5  ;;  %2694 = vmatprep.mubr.bf16.mxu1 %v6502_v5 }
 0x1c0   :  { %v7515_v15 = vadd.f32 %v1498_v33, %v7161_v53  ;;  %v1360_v43 = vmax.f32 %v1095_v60, 0.0  ;;  %v2134_v18 = vadd.f32 %v2133_v44, %v7480_v6  ;;  %v1100_v25 = vpop.f32.mrf.mxu1  ;;  %v2135_v28 = vpop.f32.mrf.mxu0  ;;  %v7522_v42 = vadd.f32 %v1535_v21, %v7164_v1 }
 0x1c1   :  { %v1568_v24 = vadd.f32 %v1567_v37, %v1377_v47  ;;  %v1604_v54 = vadd.f32 %v1603_v38, %v1374_v50  ;;  %v1363_v7 = vmax.f32 %v1099_v63, 0.0  ;;  %v1101_v19 = vadd.f32 %v1100_v25, %v6844_v41 }
 0x1c2   :  { %v1674_v26 = vadd.f32 %v1673_v45, %v1360_v43  ;;  %v2136_v12 = vadd.f32 %v2135_v28, %v7497_v27  ;;  %v1102_v53 = vpop.f32.mrf.mxu1  ;;  %v2137_v33 = vpop.f32.mrf.mxu0  ;;  %v7530_v30 = vadd.f32 %v1465_v3, %v1464_v31  ;;  %v1500_v40 = vrot.slane %v7515_v15, 2 }
 0x1c3   :  { %v1569_v48 = vadd.f32 %v1568_v24, %v1381_v62  ;;  %v1605_v47 = vadd.f32 %v1604_v54, %v1378_v9  ;;  %v1638_v1 = vadd.f32 %v1637_v16, %v1363_v7  ;;  %v1364_v38 = vmax.f32 %v1101_v19, 0.0 }
 0x1c4   :  { %v2805_v34 = vmax.f32 %v2134_v18, 0.0  ;;  %v1103_v46 = vadd.f32 %v1102_v53, %v6836_v35  ;;  %v2138_v21 = vadd.f32 %v2137_v33, %v7480_v6  ;;  %v1104_v45 = vpop.f32.mrf.mxu1  ;;  %v2139_v60 = vpop.f32.mrf.mxu0  ;;  %v2806_v9 = vmax.f32 %v2136_v12, 0.0  ;;  %v7564_v12 = vld [vmem:[%s8937_s0 + $0x1d0] sm:$0xff]  }
 0x1c5   :  { %v1570_v31 = vadd.f32 %v1569_v48, %v1385_v20  ;;  %v1606_v2 = vadd.f32 %v1605_v47, %v1382_v10  ;;  %v1675_v62 = vadd.f32 %v1674_v26, %v1364_v38  ;;  %v1105_v49 = vadd.f32 %v1104_v45, %v6844_v41  ;;  %v6183_v45 = vld [vmem:[%s8940_s3 + $0x330] ss:$12 sps:$4 sm:$0xff]  }
 0x1c6   :  { %v1367_v3 = vmax.f32 %v1103_v46, 0.0  ;;  %v2809_v52 = vmax.f32 %v2138_v21, 0.0  ;;  %v2140_v44 = vadd.f32 %v2139_v60, %v7497_v27  ;;  %v1108_v37 = vpop.f32.mrf.mxu1  ;;  %v2143_v16 = vpop.f32.mrf.mxu0  ;;  %5668 = vmatmul.mubr.msk.bf16.gmra.mxu0 %vm318_vm2, %v7528_v13  ;;  %5696 = vmatmul.mubr.msk.bf16.gmra.mxu1 %vm318_vm2, %v7368_v23  ;;  %v6188_v60 = vld [vmem:[%s8940_s3 + $0x4b4] ss:$12 sps:$4 sm:$0xff]  }
 0x1c7   :  { %v1571_v32 = vadd.f32 %v1570_v31, %v1389_v36  ;;  %v1607_v58 = vadd.f32 %v1606_v2, %v1386_v51  ;;  %v1368_v10 = vmax.f32 %v1105_v49, 0.0  ;;  %v1109_v20 = vadd.f32 %v1108_v37, %v6836_v35  ;;  %2391 = vmatprep.mubr.bf16.mxu0 %v6502_v5  ;;  %2704 = vmatprep.mubr.bf16.mxu1 %v6502_v5 }
 0x1c8   :  { %v1639_v50 = vadd.f32 %v1638_v1, %v1367_v3  ;;  %v3061_v63 = vadd.f32 %v2809_v52, %v2805_v34  ;;  %v2810_v43 = vmax.f32 %v2140_v44, 0.0  ;;  %v2144_v18 = vadd.f32 %v2143_v16, %v7480_v6  ;;  %v1110_v25 = vpop.f32.mrf.mxu1  ;;  %v2145_v23 = vpop.f32.mrf.mxu0  ;;  %4184 = vmatprep.subr.bf16.mxu1 %v6188_v60 }
 0x1c9   :  { %v1572_v28 = vrot.slane %v1571_v32, 4  ;;  %v1608_v57 = vadd.f32 %v1607_v58, %v1390_v11  ;;  %v1676_v4 = vadd.f32 %v1675_v62, %v1368_v10  ;;  %v1371_v51 = vmax.f32 %v1109_v20, 0.0  ;;  %v6185_v11 = vld [vmem:[%s8940_s3 + $0x334] ss:$12 sps:$4 sm:$0xff]  }
 0x1ca   :  { %v3098_v36 = vadd.f32 %v2810_v43, %v2806_v9  ;;  %v2813_v24 = vmax.f32 %v2144_v18, 0.0  ;;  %v1111_v54 = vadd.f32 %v1110_v25, %v6844_v41  ;;  %v2146_v7 = vadd.f32 %v2145_v23, %v7497_v27  ;;  %v1112_v19 = vpop.f32.mrf.mxu1  ;;  %v2147_v26 = vpop.f32.mrf.mxu0  ;;  %4143 = vmatprep.subr.bf16.mxu0 %v6185_v11  ;;  %v6186_v9 = vld [vmem:[%s8940_s3 + $0x4b0] ss:$12 sps:$4 sm:$0xff]  }
 0x1cb   :  { %v1573_v53 = vadd.f32 %v1572_v28, %v1571_v32  ;;  %v1609_v33 = vrot.slane %v1608_v57, 4  ;;  %v1640_v48 = vadd.f32 %v1639_v50, %v1371_v51  ;;  %v1113_v14 = vadd.f32 %v1112_v19, %v6836_v35  ;;  %4144 = vmatpush1.bf16.msra.mxu0 %v6183_v45  ;;  %4185 = vmatpush1.bf16.msra.mxu1 %v6186_v9 }
 0x1cc   :  { %v3062_v47 = vadd.f32 %v3061_v63, %v2813_v24  ;;  %v1372_v1 = vmax.f32 %v1111_v54, 0.0  ;;  %v2814_v38 = vmax.f32 %v2146_v7, 0.0  ;;  %v2148_v34 = vadd.f32 %v2147_v26, %v7480_v6  ;;  %v1114_v46 = vpop.f32.mrf.mxu1  ;;  %v2149_v21 = vpop.f32.mrf.mxu0  ;;  %v7595_v26 = vld [vmem:[%s8937_s0 + $0x1d8] sm:$0xff]  }
 0x1cd   :  { %v1574_v31 = vrot.slane %v1573_v53, 2  ;;  %v1375_v2 = vmax.f32 %v1113_v14, 0.0  ;;  %v1115_v62 = vadd.f32 %v1114_v46, %v6844_v41  ;;  %v2150_v49 = vadd.f32 %v2149_v21, %v7497_v27 }
 0x1ce   :  { %v1677_v3 = vadd.f32 %v1676_v4, %v1372_v1  ;;  %v3099_v52 = vadd.f32 %v3098_v36, %v2814_v38  ;;  %v2817_v44 = vmax.f32 %v2148_v34, 0.0  ;;  %v1118_v37 = vpop.f32.mrf.mxu1  ;;  %v2153_v16 = vpop.f32.mrf.mxu0  ;;  %5669 = vmatmul.mubr.msk.bf16.gmra.mxu0 %vm318_vm2, %v7564_v12  ;;  %5697 = vmatmul.mubr.msk.bf16.gmra.mxu1 %vm318_vm2, %v7419_v39  ;;  %v1610_v32 = vadd.f32 %v1609_v33, %v1608_v57 }
 0x1cf   :  { %v1575_v58 = vadd.f32 %v1574_v31, %v1573_v53  ;;  %v1641_v10 = vadd.f32 %v1640_v48, %v1375_v2  ;;  %v1376_v20 = vmax.f32 %v1115_v62, 0.0  ;;  %v2818_v50 = vmax.f32 %v2150_v49, 0.0  ;;  %2401 = vmatprep.mubr.bf16.mxu0 %v6502_v5  ;;  %2714 = vmatprep.mubr.bf16.mxu1 %v6502_v5 }
 0x1d0   :  { %v3063_v63 = vadd.f32 %v3062_v47, %v2817_v44  ;;  %v1119_v43 = vadd.f32 %v1118_v37, %v6836_v35  ;;  %v2154_v18 = vadd.f32 %v2153_v16, %v7480_v6  ;;  %v1120_v25 = vpop.f32.mrf.mxu1  ;;  %v2155_v23 = vpop.f32.mrf.mxu0  ;;  %v1611_v28 = vrot.slane %v1610_v32, 2  ;;  %v6189_v44 = vld [vmem:[%s8940_s3 + $0x318] ss:$12 sps:$4 sm:$0xff]   ;;  %v6191_v37 = vld [vmem:[%s8940_s3 + $0x31c] ss:$12 sps:$4 sm:$0xff]  }
 0x1d1   :  { %v1576_v39 = vrot.slane %v1575_v58, 1  ;;  %v1678_v57 = vadd.f32 %v1677_v3, %v1376_v20  ;;  %v3100_v4 = vadd.f32 %v3099_v52, %v2818_v50  ;;  %v1121_v51 = vadd.f32 %v1120_v25, %v6844_v41  ;;  %v6194_v50 = vld [vmem:[%s8940_s3 + $0x49c] ss:$12 sps:$4 sm:$0xff]   ;;  %4145 = vmatprep.subr.bf16.mxu0 %v6191_v37 }
 0x1d2   :  { %v1379_v36 = vmax.f32 %v1119_v43, 0.0  ;;  %v2821_v24 = vmax.f32 %v2154_v18, 0.0  ;;  %v2156_v54 = vadd.f32 %v2155_v23, %v7497_v27  ;;  %v1122_v7 = vpop.f32.mrf.mxu1  ;;  %v2157_v19 = vpop.f32.mrf.mxu0  ;;  %v1612_v53 = vadd.f32 %v1611_v28, %v1610_v32  ;;  %4146 = vmatpush1.bf16.msra.mxu0 %v6189_v44  ;;  %4186 = vmatprep.subr.bf16.mxu1 %v6194_v50  ;;  %v7669_v50 = vld [vmem:[%s8937_s0 + $0x1e8] sm:$0xff]  }
 0x1d3   :  { %v1380_v33 = vmax.f32 %v1121_v51, 0.0  ;;  %v1123_v48 = vadd.f32 %v1122_v7, %v6836_v35  ;;  %v2158_v14 = vadd.f32 %v2157_v19, %v7480_v6  ;;  %v1577_v11 = vadd.f32 %v1576_v39, %v1575_v58 }
 0x1d4   :  { %v1642_v47 = vadd.f32 %v1641_v10, %v1379_v36  ;;  %v3064_v1 = vadd.f32 %v3063_v63, %v2821_v24  ;;  %v2822_v38 = vmax.f32 %v2156_v54, 0.0  ;;  %v1124_v34 = vpop.f32.mrf.mxu1  ;;  %v2159_v46 = vpop.f32.mrf.mxu0  ;;  %v1613_v21 = vrot.slane %v1612_v53, 1 }
 0x1d5   :  { %v1679_v45 = vadd.f32 %v1678_v57, %v1380_v33  ;;  %v1383_v60 = vmax.f32 %v1123_v48, 0.0  ;;  %v2825_v31 = vmax.f32 %v2158_v14, 0.0  ;;  %v1125_v2 = vadd.f32 %v1124_v34, %v6844_v41 }
 0x1d6   :  { %v1537_v62 = vrot.slane %v7522_v42, 2  ;;  %v3101_v49 = vadd.f32 %v3100_v4, %v2822_v38  ;;  %v2160_v9 = vadd.f32 %v2159_v46, %v7497_v27  ;;  %v1128_v3 = vpop.f32.mrf.mxu1  ;;  %v2163_v52 = vpop.f32.mrf.mxu0  ;;  %5670 = vmatmul.mubr.msk.bf16.gmra.mxu0 %vm318_vm2, %v7595_v26  ;;  %5698 = vmatmul.mubr.msk.bf16.gmra.mxu1 %vm318_vm2, %v7452_v17  ;;  %v1614_v16 = vadd.f32 %v1613_v21, %v1612_v53  ;;  %v6192_v17 = vld [vmem:[%s8940_s3 + $0x498] ss:$12 sps:$4 sm:$0xff]  }
 0x1d7   :  { %v1643_v32 = vadd.f32 %v1642_v47, %v1383_v60  ;;  %v3065_v58 = vadd.f32 %v3064_v1, %v2825_v31  ;;  %v1384_v10 = vmax.f32 %v1125_v2, 0.0  ;;  %v1129_v20 = vadd.f32 %v1128_v3, %v6836_v35  ;;  %2411 = vmatprep.mubr.bf16.mxu0 %v6502_v5  ;;  %2724 = vmatprep.mubr.bf16.mxu1 %v6502_v5 }
 0x1d8   :  { %v2826_v63 = vmax.f32 %v2160_v9, 0.0  ;;  %v2164_v43 = vadd.f32 %v2163_v52, %v7480_v6  ;;  %v1130_v18 = vpop.f32.mrf.mxu1  ;;  %v2165_v25 = vpop.f32.mrf.mxu0  ;;  %v7624_v23 = vsel %vm1689_vm3, %v7530_v30, %v1614_v16  ;;  %v7628_v28 = vsel %vm1689_vm3, %v7512_v0, %v1577_v11  ;;  %v7638_v0 = vld [vmem:[%s8937_s0 + $0x1e0] sm:$0xff]   ;;  %4187 = vmatpush1.bf16.msra.mxu1 %v6192_v17 }
 0x1d9   :  { %8951 = vst [vmem:[#allocation8_spill] sm:$0xff] %v7624_v23  ;;  %8952 = vst [vmem:[#allocation9_spill] sm:$0xff] %v7628_v28  ;;  %v1680_v39 = vadd.f32 %v1679_v45, %v1384_v10  ;;  %v1387_v57 = vmax.f32 %v1129_v20, 0.0  ;;  %v1131_v4 = vadd.f32 %v1130_v18, %v6844_v41  ;;  %v2166_v51 = vadd.f32 %v2165_v25, %v7497_v27 }
 0x1da   :  { %v1501_v36 = vadd.f32 %v1500_v40, %v7515_v15  ;;  %v3102_v24 = vadd.f32 %v3101_v49, %v2826_v63  ;;  %v2829_v54 = vmax.f32 %v2164_v43, 0.0  ;;  %v1132_v30 = vpop.f32.mrf.mxu1  ;;  %v2167_v7 = vpop.f32.mrf.mxu0  ;;  %v1538_v14 = vadd.f32 %v1537_v62, %v7522_v42 }
 0x1db   :  { %v1644_v19 = vadd.f32 %v1643_v32, %v1387_v57  ;;  %v1388_v53 = vmax.f32 %v1131_v4, 0.0  ;;  %v2830_v33 = vmax.f32 %v2166_v51, 0.0  ;;  %v1133_v48 = vadd.f32 %v1132_v30, %v6836_v35 }
 0x1dc   :  { %v3066_v11 = vadd.f32 %v3065_v58, %v2829_v54  ;;  %v2168_v15 = vadd.f32 %v2167_v7, %v7480_v6  ;;  %v1134_v40 = vpop.f32.mrf.mxu1  ;;  %v2169_v47 = vpop.f32.mrf.mxu0  ;;  %v7645_v1 = vrot.slane %v7462_v8, %v6821_v22  ;;  %v1502_v45 = vrot.slane %v1501_v36, 1 }
 0x1dd   :  { %v1681_v38 = vadd.f32 %v1680_v39, %v1388_v53  ;;  %v3103_v34 = vadd.f32 %v3102_v24, %v2830_v33  ;;  %v1391_v46 = vmax.f32 %v1133_v48, 0.0  ;;  %v1135_v21 = vadd.f32 %v1134_v40, %v6844_v41 }
 0x1de   :  { %v2833_v60 = vmax.f32 %v2168_v15, 0.0  ;;  %v2170_v35 = vadd.f32 %v2169_v47, %v7497_v27  ;;  %v2173_v31 = vpop.f32.mrf.mxu0  ;;  %5671 = vmatmul.mubr.msk.bf16.gmra.mxu0 %vm318_vm2, %v7638_v0  ;;  %v2486_v42 = vpop.f32.mrf.mxu1  ;;  %5699 = vmatmul.mubr.msk.bf16.gmra.mxu1 %vm318_vm2, %v7493_v61  ;;  %v7656_v2 = vrot.slane %v7462_v8, %v116_v29  ;;  %v1539_v9 = vrot.slane %v1538_v14, 1 }
 0x1df   :  { %v1645_v62 = vadd.f32 %v1644_v19, %v1391_v46  ;;  %v1392_v49 = vmax.f32 %v1135_v21, 0.0  ;;  %v2174_v41 = vadd.f32 %v2173_v31, %v7480_v6  ;;  %2421 = vmatprep.mubr.bf16.mxu0 %v6502_v5  ;;  %2734 = vmatprep.mubr.bf16.mxu1 %v6502_v5  ;;  %v2487_v44 = vadd.f32 %v2486_v42, %v7645_v1 }
 0x1e0   :  { %v3067_v3 = vadd.f32 %v3066_v11, %v2833_v60  ;;  %v2834_v52 = vmax.f32 %v2170_v35, 0.0  ;;  %v2175_v37 = vpop.f32.mrf.mxu0  ;;  %v2488_v61 = vpop.f32.mrf.mxu1  ;;  %v7662_v29 = vadd.f32 %v1502_v45, %v1501_v36  ;;  %v7673_v24 = vadd.f32 %v1539_v9, %v1538_v14 }
 0x1e1   :  { %v1646_v16 = vrot.slane %v1645_v62, 4  ;;  %v1682_v55 = vadd.f32 %v1681_v38, %v1392_v49  ;;  %v2837_v32 = vmax.f32 %v2174_v41, 0.0  ;;  %v2176_v58 = vadd.f32 %v2175_v37, %v7497_v27 }
 0x1e2   :  { %v3104_v8 = vadd.f32 %v3103_v34, %v2834_v52  ;;  %v2489_v10 = vadd.f32 %v2488_v61, %v7656_v2  ;;  %v2177_v20 = vpop.f32.mrf.mxu0  ;;  %v2490_v17 = vpop.f32.mrf.mxu1  ;;  %v2807_v39 = vmax.f32 %v2487_v44, 0.0  ;;  %v7690_v61 = vld [vmem:[%s8937_s0 + $0x1f0] sm:$0xff]  }
 0x1e3   :  { %v1647_v63 = vadd.f32 %v1646_v16, %v1645_v62  ;;  %v1683_v43 = vrot.slane %v1682_v55, 4  ;;  %v3068_v18 = vadd.f32 %v3067_v3, %v2837_v32  ;;  %v2178_v25 = vadd.f32 %v2177_v20, %v7480_v6 }
 0x1e4   :  { %v2838_v57 = vmax.f32 %v2176_v58, 0.0  ;;  %v2491_v4 = vadd.f32 %v2490_v17, %v7645_v1  ;;  %v2179_v51 = vpop.f32.mrf.mxu0  ;;  %v2492_v36 = vpop.f32.mrf.mxu1  ;;  %v2808_v33 = vmax.f32 %v2489_v10, 0.0 }
 0x1e5   :  { %v1648_v54 = vrot.slane %v1647_v63, 2  ;;  %v1684_v30 = vadd.f32 %v1683_v43, %v1682_v55  ;;  %v2841_v7 = vmax.f32 %v2178_v25, 0.0  ;;  %v2180_v19 = vadd.f32 %v2179_v51, %v7497_v27  ;;  %v6197_v25 = vld [vmem:[%s8940_s3 + $0x304] ss:$12 sps:$4 sm:$0xff]  }
 0x1e6   :  { %v3105_v53 = vadd.f32 %v3104_v8, %v2838_v57  ;;  %v2811_v48 = vmax.f32 %v2491_v4, 0.0  ;;  %v2493_v11 = vadd.f32 %v2492_v36, %v7656_v2  ;;  %v2183_v15 = vpop.f32.mrf.mxu0  ;;  %5672 = vmatmul.mubr.msk.bf16.gmra.mxu0 %vm318_vm2, %v7669_v50  ;;  %v2496_v40 = vpop.f32.mrf.mxu1  ;;  %5700 = vmatmul.mubr.msk.bf16.gmra.mxu1 %vm318_vm2, %v7528_v13  ;;  %v6198_v36 = vld [vmem:[%s8940_s3 + $0x480] ss:$12 sps:$4 sm:$0xff]  }
 0x1e7   :  { %v1649_v14 = vadd.f32 %v1648_v54, %v1647_v63  ;;  %v1685_v47 = vrot.slane %v1684_v30, 2  ;;  %v3069_v38 = vadd.f32 %v3068_v18, %v2841_v7  ;;  %v2842_v34 = vmax.f32 %v2180_v19, 0.0  ;;  %2431 = vmatprep.mubr.bf16.mxu0 %v6502_v5  ;;  %2744 = vmatprep.mubr.bf16.mxu1 %v6502_v5  ;;  %v6195_v18 = vld [vmem:[%s8940_s3 + $0x300] ss:$12 sps:$4 sm:$0xff]   ;;  %v6200_v54 = vld [vmem:[%s8940_s3 + $0x484] ss:$12 sps:$4 sm:$0xff]  }
 0x1e8   :  { %v3135_v46 = vadd.f32 %v2811_v48, %v2807_v39  ;;  %v2812_v21 = vmax.f32 %v2493_v11, 0.0  ;;  %v2184_v45 = vadd.f32 %v2183_v15, %v7480_v6  ;;  %v2497_v60 = vadd.f32 %v2496_v40, %v7645_v1  ;;  %v2185_v35 = vpop.f32.mrf.mxu0  ;;  %v2498_v31 = vpop.f32.mrf.mxu1  ;;  %4147 = vmatprep.subr.bf16.mxu0 %v6197_v25  ;;  %4188 = vmatprep.subr.bf16.mxu1 %v6200_v54  ;;  %v6204_v54 = vld [vmem:[%s8940_s3 + $0x5e8] ss:$12 sps:$4 sm:$0xff]  }
 0x1e9   :  { %v1650_v42 = vrot.slane %v1649_v14, 1  ;;  %v1686_v62 = vadd.f32 %v1685_v47, %v1684_v30  ;;  %v3106_v49 = vadd.f32 %v3105_v53, %v2842_v34  ;;  %v2186_v13 = vadd.f32 %v2185_v35, %v7497_v27  ;;  %4148 = vmatpush1.bf16.msra.mxu0 %v6195_v18  ;;  %4189 = vmatpush1.bf16.msra.mxu1 %v6198_v36 }
 0x1ea   :  { %v3172_v41 = vadd.f32 %v2812_v21, %v2808_v33  ;;  %v2845_v9 = vmax.f32 %v2184_v45, 0.0  ;;  %v2815_v3 = vmax.f32 %v2497_v60, 0.0  ;;  %v2499_v52 = vadd.f32 %v2498_v31, %v7656_v2  ;;  %v2187_v44 = vpop.f32.mrf.mxu0  ;;  %v2500_v37 = vpop.f32.mrf.mxu1 }
 0x1eb   :  { %v1651_v16 = vadd.f32 %v1650_v42, %v1649_v14  ;;  %v1687_v55 = vrot.slane %v1686_v62, 1  ;;  %v2846_v32 = vmax.f32 %v2186_v13, 0.0  ;;  %v2188_v8 = vadd.f32 %v2187_v44, %v7480_v6 }
 0x1ec   :  { %v3070_v58 = vadd.f32 %v3069_v38, %v2845_v9  ;;  %v3136_v10 = vadd.f32 %v3135_v46, %v2815_v3  ;;  %v2816_v20 = vmax.f32 %v2499_v52, 0.0  ;;  %v2501_v17 = vadd.f32 %v2500_v37, %v7645_v1  ;;  %v2189_v63 = vpop.f32.mrf.mxu0  ;;  %v2502_v43 = vpop.f32.mrf.mxu1 }
 0x1ed   :  { %v3107_v39 = vadd.f32 %v3106_v49, %v2846_v32  ;;  %v2849_v57 = vmax.f32 %v2188_v8, 0.0  ;;  %v2190_v4 = vadd.f32 %v2189_v63, %v7497_v27  ;;  %v2503_v51 = vadd.f32 %v2502_v43, %v7656_v2  ;;  %v7729_v49 = vld [vmem:[%s8937_s0 + $0x1f8] sm:$0xff]   ;;  %v6201_v63 = vld [vmem:[%s8940_s3 + $0x468] ss:$12 sps:$4 sm:$0xff]  }
 0x1ee   :  { %v3173_v30 = vadd.f32 %v3172_v41, %v2816_v20  ;;  %v2819_v7 = vmax.f32 %v2501_v17, 0.0  ;;  %v2193_v19 = vpop.f32.mrf.mxu0  ;;  %5673 = vmatmul.mubr.msk.bf16.gmra.mxu0 %vm318_vm2, %v7690_v61  ;;  %v2506_v53 = vpop.f32.mrf.mxu1  ;;  %5701 = vmatmul.mubr.msk.bf16.gmra.mxu1 %vm318_vm2, %v7564_v12  ;;  %v1688_v33 = vadd.f32 %v1687_v55, %v1686_v62  ;;  %v7714_v48 = vsel %vm1689_vm3, %v7662_v29, %v1651_v16  ;;  %v6203_v43 = vld [vmem:[%s8940_s3 + $0x46c] ss:$12 sps:$4 sm:$0xff]  }
 0x1ef   :  { %8953 = vst [vmem:[#allocation10_spill] sm:$0xff] %v7714_v48  ;;  %v3071_v11 = vadd.f32 %v3070_v58, %v2849_v57  ;;  %v2850_v15 = vmax.f32 %v2190_v4, 0.0  ;;  %v2820_v40 = vmax.f32 %v2503_v51, 0.0  ;;  %v2194_v14 = vadd.f32 %v2193_v19, %v7480_v6  ;;  %2441 = vmatprep.mubr.bf16.mxu0 %v6502_v5  ;;  %2754 = vmatprep.mubr.bf16.mxu1 %v6502_v5 }
 0x1f0   :  { %v3137_v47 = vadd.f32 %v3136_v10, %v2819_v7  ;;  %v2507_v38 = vadd.f32 %v2506_v53, %v7645_v1  ;;  %v2195_v34 = vpop.f32.mrf.mxu0  ;;  %v2508_v46 = vpop.f32.mrf.mxu1  ;;  %v7722_v12 = vsel %vm1689_vm3, %v7673_v24, %v1688_v33  ;;  %4149 = vmatprep.subr.bf16.mxu0 %v6203_v43 }
 0x1f1   :  { %8954 = vst [vmem:[#allocation11_spill] sm:$0xff] %v7722_v12  ;;  %v3108_v29 = vadd.f32 %v3107_v39, %v2850_v15  ;;  %v3174_v21 = vadd.f32 %v3173_v30, %v2820_v40  ;;  %v2853_v45 = vmax.f32 %v2194_v14, 0.0  ;;  %v2196_v60 = vadd.f32 %v2195_v34, %v7497_v27  ;;  %v6206_v30 = vld [vmem:[%s8940_s3 + $0x5ec] ss:$12 sps:$4 sm:$0xff]   ;;  %4150 = vmatpush2.bf16.msra.mxu0 %v6201_v63 }
 0x1f2   :  { %v2823_v35 = vmax.f32 %v2507_v38, 0.0  ;;  %v2509_v31 = vadd.f32 %v2508_v46, %v7656_v2  ;;  %v2197_v42 = vpop.f32.mrf.mxu0  ;;  %v2510_v62 = vpop.f32.mrf.mxu1  ;;  %4190 = vmatprep.subr.bf16.mxu1 %v6206_v30 }
 0x1f3   :  { %v3072_v13 = vadd.f32 %v3071_v11, %v2853_v45  ;;  %v2854_v24 = vmax.f32 %v2196_v60, 0.0  ;;  %v2198_v41 = vadd.f32 %v2197_v42, %v7480_v6  ;;  %v2511_v9 = vadd.f32 %v2510_v62, %v7645_v1  ;;  %4191 = vmatpush2.bf16.msra.mxu1 %v6204_v54 }
 0x1f4   :  { %v3138_v3 = vadd.f32 %v3137_v47, %v2823_v35  ;;  %v2824_v52 = vmax.f32 %v2509_v31, 0.0  ;;  %v2199_v44 = vpop.f32.mrf.mxu0  ;;  %v2512_v37 = vpop.f32.mrf.mxu1 }
 0x1f5   :  { %v3109_v16 = vadd.f32 %v3108_v29, %v2854_v24  ;;  %v2857_v55 = vmax.f32 %v2198_v41, 0.0  ;;  %v2827_v32 = vmax.f32 %v2511_v9, 0.0  ;;  %v2200_v8 = vadd.f32 %v2199_v44, %v7497_v27 }
 0x1f6   :  { %v3175_v58 = vadd.f32 %v3174_v21, %v2824_v52  ;;  %v2513_v10 = vadd.f32 %v2512_v37, %v7656_v2  ;;  %v2203_v20 = vpop.f32.mrf.mxu0  ;;  %5674 = vmatmul.mubr.msk.bf16.gmra.mxu0 %vm318_vm2, %v7729_v49  ;;  %v2516_v17 = vpop.f32.mrf.mxu1  ;;  %5702 = vmatmul.mubr.msk.bf16.gmra.mxu1 %vm318_vm2, %v7595_v26 }
 0x1f7   :  { %v3073_v18 = vadd.f32 %v3072_v13, %v2857_v55  ;;  %v3139_v25 = vadd.f32 %v3138_v3, %v2827_v32  ;;  %v2858_v39 = vmax.f32 %v2200_v8, 0.0  ;;  %v2204_v57 = vadd.f32 %v2203_v20, %v7480_v6  ;;  %2764 = vmatprep.mubr.bf16.mxu1 %v6502_v5 }
 0x1f8   :  { %v2828_v4 = vmax.f32 %v2513_v10, 0.0  ;;  %v2517_v51 = vadd.f32 %v2516_v17, %v7645_v1  ;;  %v2205_v36 = vpop.f32.mrf.mxu0  ;;  %v2518_v26 = vpop.f32.mrf.mxu1 }
 0x1f9   :  { %v2861_v7 = vmax.f32 %v2204_v57, 0.0  ;;  %v2206_v19 = vadd.f32 %v2205_v36, %v7497_v27  ;;  %v2519_v53 = vadd.f32 %v2518_v26, %v7656_v2  ;;  %v3110_v33 = vadd.f32 %v3109_v16, %v2858_v39 }
 0x1fa   :  { %v3176_v11 = vadd.f32 %v3175_v58, %v2828_v4  ;;  %v2831_v15 = vmax.f32 %v2517_v51, 0.0  ;;  %v2207_v40 = vpop.f32.mrf.mxu0  ;;  %v2520_v14 = vpop.f32.mrf.mxu1 }
 0x1fb   :  { %v3074_v47 = vadd.f32 %v3073_v18, %v2861_v7  ;;  %v2862_v38 = vmax.f32 %v2206_v19, 0.0  ;;  %v2832_v34 = vmax.f32 %v2519_v53, 0.0  ;;  %v2208_v46 = vadd.f32 %v2207_v40, %v7480_v6 }
 0x1fc   :  { %v3140_v29 = vadd.f32 %v3139_v25, %v2831_v15  ;;  %v2521_v21 = vadd.f32 %v2520_v14, %v7645_v1  ;;  %v2209_v45 = vpop.f32.mrf.mxu0  ;;  %v2522_v60 = vpop.f32.mrf.mxu1 }
 0x1fd   :  { %v3111_v35 = vadd.f32 %v3110_v33, %v2862_v38  ;;  %v3177_v31 = vadd.f32 %v3176_v11, %v2832_v34  ;;  %v2865_v42 = vmax.f32 %v2208_v46, 0.0  ;;  %v2210_v62 = vadd.f32 %v2209_v45, %v7497_v27  ;;  %v6207_v33 = vld [vmem:[%s8940_s3 + $0x450] ss:$12 sps:$4 sm:$0xff]   ;;  %v6209_v11 = vld [vmem:[%s8940_s3 + $0x454] ss:$12 sps:$4 sm:$0xff]  }
 0x1fe   :  { %v2835_v13 = vmax.f32 %v2521_v21, 0.0  ;;  %v2523_v24 = vadd.f32 %v2522_v60, %v7656_v2  ;;  %v2213_v41 = vpop.f32.mrf.mxu0  ;;  %v2526_v9 = vpop.f32.mrf.mxu1  ;;  %5703 = vmatmul.mubr.msk.bf16.gmra.mxu1 %vm318_vm2, %v7638_v0  ;;  %4151 = vmatprep.subr.bf16.mxu0 %v6209_v11 }
 0x1ff   :  { %v3075_v3 = vadd.f32 %v3074_v47, %v2865_v42  ;;  %v2866_v52 = vmax.f32 %v2210_v62, 0.0  ;;  %v2214_v44 = vadd.f32 %v2213_v41, %v7480_v6  ;;  %v2527_v37 = vadd.f32 %v2526_v9, %v7645_v1  ;;  %2774 = vmatprep.mubr.bf16.mxu1 %v6502_v5  ;;  %4152 = vmatpush2.bf16.msra.mxu0 %v6207_v33 }
 0x200   :  { %v3141_v16 = vadd.f32 %v3140_v29, %v2835_v13  ;;  %v2836_v55 = vmax.f32 %v2523_v24, 0.0  ;;  %v2215_v32 = vpop.f32.mrf.mxu0  ;;  %v2528_v8 = vpop.f32.mrf.mxu1 }
 0x201   :  { %v2869_v58 = vmax.f32 %v2214_v44, 0.0  ;;  %v2839_v10 = vmax.f32 %v2527_v37, 0.0  ;;  %v2216_v20 = vadd.f32 %v2215_v32, %v7497_v27  ;;  %v3112_v17 = vadd.f32 %v3111_v35, %v2866_v52 }
 0x202   :  { %v3178_v63 = vadd.f32 %v3177_v31, %v2836_v55  ;;  %v2529_v0 = vadd.f32 %v2528_v8, %v7656_v2  ;;  %v2217_v43 = vpop.f32.mrf.mxu0  ;;  %v2530_v18 = vpop.f32.mrf.mxu1  ;;  %v6210_v31 = vld [vmem:[%s8940_s3 + $0x5d0] ss:$12 sps:$4 sm:$0xff]  }
 0x203   :  { %v3076_v25 = vadd.f32 %v3075_v3, %v2869_v58  ;;  %v3142_v39 = vadd.f32 %v3141_v16, %v2839_v10  ;;  %v2870_v57 = vmax.f32 %v2216_v20, 0.0  ;;  %v2218_v4 = vadd.f32 %v2217_v43, %v7480_v6 }
 0x204   :  { %v2840_v51 = vmax.f32 %v2529_v0, 0.0  ;;  %v2531_v36 = vadd.f32 %v2530_v18, %v7645_v1  ;;  %v2219_v26 = vpop.f32.mrf.mxu0  ;;  %v2532_v54 = vpop.f32.mrf.mxu1 }
 0x205   :  { %v3113_v30 = vadd.f32 %v3112_v17, %v2870_v57  ;;  %v2873_v7 = vmax.f32 %v2218_v4, 0.0  ;;  %v2220_v19 = vadd.f32 %v2219_v26, %v7497_v27  ;;  %v2533_v53 = vadd.f32 %v2532_v54, %v7656_v2 }
 0x206   :  { %v3179_v15 = vadd.f32 %v3178_v63, %v2840_v51  ;;  %v2843_v40 = vmax.f32 %v2531_v36, 0.0  ;;  %v2223_v14 = vpop.f32.mrf.mxu0  ;;  %v2536_v47 = vpop.f32.mrf.mxu1  ;;  %5704 = vmatmul.mubr.msk.bf16.gmra.mxu1 %vm318_vm2, %v7669_v50  ;;  %v6212_v50 = vld [vmem:[%s8940_s3 + $0x5d4] ss:$12 sps:$4 sm:$0xff]  }
 0x207   :  { %v3077_v38 = vadd.f32 %v3076_v25, %v2873_v7  ;;  %v2874_v34 = vmax.f32 %v2220_v19, 0.0  ;;  %v2224_v46 = vadd.f32 %v2223_v14, %v7480_v6  ;;  %2784 = vmatprep.mubr.bf16.mxu1 %v6502_v5  ;;  %v2844_v21 = vmax.f32 %v2533_v53, 0.0  ;;  %4192 = vmatprep.subr.bf16.mxu1 %v6212_v50 }
 0x208   :  { %v3143_v29 = vadd.f32 %v3142_v39, %v2843_v40  ;;  %v2537_v45 = vadd.f32 %v2536_v47, %v7645_v1  ;;  %v2225_v60 = vpop.f32.mrf.mxu0  ;;  %v2538_v35 = vpop.f32.mrf.mxu1  ;;  %4193 = vmatpush2.bf16.msra.mxu1 %v6210_v31 }
 0x209   :  { %v2877_v42 = vmax.f32 %v2224_v46, 0.0  ;;  %v2226_v62 = vadd.f32 %v2225_v60, %v7497_v27  ;;  %v3114_v13 = vadd.f32 %v3113_v30, %v2874_v34  ;;  %v2539_v41 = vadd.f32 %v2538_v35, %v7656_v2 }
 0x20a   :  { %v2847_v24 = vmax.f32 %v2537_v45, 0.0  ;;  %v2227_v9 = vpop.f32.mrf.mxu0  ;;  %v2540_v3 = vpop.f32.mrf.mxu1  ;;  %v3180_v55 = vadd.f32 %v3179_v15, %v2844_v21 }
 0x20b   :  { %v3078_v52 = vadd.f32 %v3077_v38, %v2877_v42  ;;  %v2878_v44 = vmax.f32 %v2226_v62, 0.0  ;;  %v2228_v37 = vadd.f32 %v2227_v9, %v7480_v6  ;;  %v2541_v16 = vadd.f32 %v2540_v3, %v7645_v1  ;;  %v6215_v9 = vld [vmem:[%s8940_s3 + $0x43c] ss:$12 sps:$4 sm:$0xff]  }
 0x20c   :  { %v3144_v32 = vadd.f32 %v3143_v29, %v2847_v24  ;;  %v2848_v8 = vmax.f32 %v2539_v41, 0.0  ;;  %v2229_v58 = vpop.f32.mrf.mxu0  ;;  %v2542_v10 = vpop.f32.mrf.mxu1  ;;  %v6213_v41 = vld [vmem:[%s8940_s3 + $0x438] ss:$12 sps:$4 sm:$0xff]   ;;  %4153 = vmatprep.subr.bf16.mxu0 %v6215_v9 }
 0x20d   :  { %v3115_v20 = vadd.f32 %v3114_v13, %v2878_v44  ;;  %v2881_v17 = vmax.f32 %v2228_v37, 0.0  ;;  %v2851_v63 = vmax.f32 %v2541_v16, 0.0  ;;  %v2230_v0 = vadd.f32 %v2229_v58, %v7497_v27  ;;  %v6216_v16 = vld [vmem:[%s8940_s3 + $0x5b8] ss:$12 sps:$4 sm:$0xff]   ;;  %4154 = vmatpush2.bf16.msra.mxu0 %v6213_v41 }
 0x20e   :  { %v3181_v43 = vadd.f32 %v3180_v55, %v2848_v8  ;;  %v2543_v18 = vadd.f32 %v2542_v10, %v7656_v2  ;;  %v2233_v25 = vpop.f32.mrf.mxu0  ;;  %v2546_v39 = vpop.f32.mrf.mxu1  ;;  %5705 = vmatmul.mubr.msk.bf16.gmra.mxu1 %vm318_vm2, %v7690_v61 }
 0x20f   :  { %v3079_v57 = vadd.f32 %v3078_v52, %v2881_v17  ;;  %v3145_v4 = vadd.f32 %v3144_v32, %v2851_v63  ;;  %v2882_v51 = vmax.f32 %v2230_v0, 0.0  ;;  %v2234_v36 = vadd.f32 %v2233_v25, %v7480_v6  ;;  %2794 = vmatprep.mubr.bf16.mxu1 %v6502_v5 }
 0x210   :  { %v2852_v26 = vmax.f32 %v2543_v18, 0.0  ;;  %v2547_v54 = vadd.f32 %v2546_v39, %v7645_v1  ;;  %v2235_v30 = vpop.f32.mrf.mxu0  ;;  %v2548_v7 = vpop.f32.mrf.mxu1 }
 0x211   :  { %v3116_v19 = vadd.f32 %v3115_v20, %v2882_v51  ;;  %v2885_v53 = vmax.f32 %v2234_v36, 0.0  ;;  %v2236_v33 = vadd.f32 %v2235_v30, %v7497_v27  ;;  %v2549_v11 = vadd.f32 %v2548_v7, %v7656_v2 }
 0x212   :  { %v3182_v15 = vadd.f32 %v3181_v43, %v2852_v26  ;;  %v2855_v61 = vmax.f32 %v2547_v54, 0.0  ;;  %v2237_v40 = vpop.f32.mrf.mxu0  ;;  %v2550_v14 = vpop.f32.mrf.mxu1 }
 0x213   :  { %v3080_v47 = vadd.f32 %v3079_v57, %v2885_v53  ;;  %v2886_v38 = vmax.f32 %v2236_v33, 0.0  ;;  %v2856_v34 = vmax.f32 %v2549_v11, 0.0  ;;  %v2238_v5 = vadd.f32 %v2237_v40, %v7480_v6 }
 0x214   :  { %v3146_v46 = vadd.f32 %v3145_v4, %v2855_v61  ;;  %v2551_v29 = vadd.f32 %v2550_v14, %v7645_v1  ;;  %v2239_v21 = vpop.f32.mrf.mxu0  ;;  %v2552_v45 = vpop.f32.mrf.mxu1 }
 0x215   :  { %v3117_v60 = vadd.f32 %v3116_v19, %v2886_v38  ;;  %v3183_v35 = vadd.f32 %v3182_v15, %v2856_v34  ;;  %v2889_v31 = vmax.f32 %v2238_v5, 0.0  ;;  %v2240_v50 = vadd.f32 %v2239_v21, %v7497_v27 }
 0x216   :  { %v2859_v42 = vmax.f32 %v2551_v29, 0.0  ;;  %v2553_v62 = vadd.f32 %v2552_v45, %v7656_v2  ;;  %v2243_v13 = vpop.f32.mrf.mxu0  ;;  %v2556_v24 = vpop.f32.mrf.mxu1  ;;  %5706 = vmatmul.mubr.msk.bf16.gmra.mxu1 %vm318_vm2, %v7729_v49  ;;  %v6218_v49 = vld [vmem:[%s8940_s3 + $0x5bc] ss:$12 sps:$4 sm:$0xff]  }
 0x217   :  { %v3081_v3 = vadd.f32 %v3080_v47, %v2889_v31  ;;  %v2890_v52 = vmax.f32 %v2240_v50, 0.0  ;;  %v2244_v44 = vadd.f32 %v2243_v13, %v7480_v6  ;;  %v2557_v37 = vadd.f32 %v2556_v24, %v7645_v1  ;;  %4194 = vmatprep.subr.bf16.mxu1 %v6218_v49 }
 0x218   :  { %v3147_v55 = vadd.f32 %v3146_v46, %v2859_v42  ;;  %v2860_v32 = vmax.f32 %v2553_v62, 0.0  ;;  %v2245_v8 = vpop.f32.mrf.mxu0  ;;  %v2558_v58 = vpop.f32.mrf.mxu1  ;;  %4195 = vmatpush2.bf16.msra.mxu1 %v6216_v16 }
 0x219   :  { %v3118_v10 = vadd.f32 %v3117_v60, %v2890_v52  ;;  %v2893_v20 = vmax.f32 %v2244_v44, 0.0  ;;  %v2863_v17 = vmax.f32 %v2557_v37, 0.0  ;;  %v2246_v63 = vadd.f32 %v2245_v8, %v7497_v27 }
 0x21a   :  { %v2559_v0 = vadd.f32 %v2558_v58, %v7656_v2  ;;  %v2247_v43 = vpop.f32.mrf.mxu0  ;;  %v2560_v18 = vpop.f32.mrf.mxu1  ;;  %v3184_v51 = vadd.f32 %v3183_v35, %v2860_v32 }
 0x21b   :  { %v3082_v25 = vadd.f32 %v3081_v3, %v2893_v20  ;;  %v3148_v39 = vadd.f32 %v3147_v55, %v2863_v17  ;;  %v2894_v57 = vmax.f32 %v2246_v63, 0.0  ;;  %v2248_v4 = vadd.f32 %v2247_v43, %v7480_v6  ;;  %v6219_v63 = vld [vmem:[%s8940_s3 + $0x420] ss:$12 sps:$4 sm:$0xff]  }
 0x21c   :  { %v2864_v36 = vmax.f32 %v2559_v0, 0.0  ;;  %v2561_v26 = vadd.f32 %v2560_v18, %v7645_v1  ;;  %v2249_v54 = vpop.f32.mrf.mxu0  ;;  %v2562_v30 = vpop.f32.mrf.mxu1  ;;  %v6221_v0 = vld [vmem:[%s8940_s3 + $0x424] ss:$12 sps:$4 sm:$0xff]  }
 0x21d   :  { %v3119_v7 = vadd.f32 %v3118_v10, %v2894_v57  ;;  %v2897_v19 = vmax.f32 %v2248_v4, 0.0  ;;  %v2250_v53 = vadd.f32 %v2249_v54, %v7497_v27  ;;  %v2563_v33 = vadd.f32 %v2562_v30, %v7656_v2  ;;  %4155 = vmatprep.subr.bf16.mxu0 %v6221_v0  ;;  %v6224_v54 = vld [vmem:[%s8940_s3 + $0x5a4] ss:$12 sps:$4 sm:$0xff]  }
 0x21e   :  { %v3185_v11 = vadd.f32 %v3184_v51, %v2864_v36  ;;  %v2867_v15 = vmax.f32 %v2561_v26, 0.0  ;;  %v2253_v61 = vpop.f32.mrf.mxu0  ;;  %v2566_v40 = vpop.f32.mrf.mxu1  ;;  %v6222_v26 = vld [vmem:[%s8940_s3 + $0x5a0] ss:$12 sps:$4 sm:$0xff]   ;;  %4156 = vmatpush2.bf16.msra.mxu0 %v6219_v63  ;;  %4196 = vmatprep.subr.bf16.mxu1 %v6224_v54  ;;  %v6225_v54 = vld [vmem:[%s8940_s3 + $0x408] ss:$12 sps:$4 sm:$0xff]  }
 0x21f   :  { %v3083_v14 = vadd.f32 %v3082_v25, %v2897_v19  ;;  %v2898_v47 = vmax.f32 %v2250_v53, 0.0  ;;  %v2254_v38 = vadd.f32 %v2253_v61, %v7480_v6  ;;  %v2868_v5 = vmax.f32 %v2563_v33, 0.0  ;;  %4197 = vmatpush2.bf16.msra.mxu1 %v6222_v26 }
 0x220   :  { %v3149_v34 = vadd.f32 %v3148_v39, %v2867_v15  ;;  %v2567_v46 = vadd.f32 %v2566_v40, %v7645_v1  ;;  %v2255_v29 = vpop.f32.mrf.mxu0  ;;  %v2568_v21 = vpop.f32.mrf.mxu1 }
 0x221   :  { %v3120_v45 = vadd.f32 %v3119_v7, %v2898_v47  ;;  %v2901_v60 = vmax.f32 %v2254_v38, 0.0  ;;  %v2256_v35 = vadd.f32 %v2255_v29, %v7497_v27  ;;  %v2569_v50 = vadd.f32 %v2568_v21, %v7656_v2 }
 0x222   :  { %v2871_v31 = vmax.f32 %v2567_v46, 0.0  ;;  %v2257_v42 = vpop.f32.mrf.mxu0  ;;  %v2570_v62 = vpop.f32.mrf.mxu1  ;;  %v3186_v3 = vadd.f32 %v3185_v11, %v2868_v5 }
 0x223   :  { %v3084_v13 = vadd.f32 %v3083_v14, %v2901_v60  ;;  %v2902_v24 = vmax.f32 %v2256_v35, 0.0  ;;  %v2258_v41 = vadd.f32 %v2257_v42, %v7480_v6  ;;  %v2571_v9 = vadd.f32 %v2570_v62, %v7645_v1 }
 0x224   :  { %v3150_v52 = vadd.f32 %v3149_v34, %v2871_v31  ;;  %v2872_v44 = vmax.f32 %v2569_v50, 0.0  ;;  %v2259_v37 = vpop.f32.mrf.mxu0  ;;  %v2572_v16 = vpop.f32.mrf.mxu1 }
 0x225   :  { %v3121_v49 = vadd.f32 %v3120_v45, %v2902_v24  ;;  %v2905_v55 = vmax.f32 %v2258_v41, 0.0  ;;  %v2875_v32 = vmax.f32 %v2571_v9, 0.0  ;;  %v2260_v8 = vadd.f32 %v2259_v37, %v7497_v27 }
 0x226   :  { %v3187_v58 = vadd.f32 %v3186_v3, %v2872_v44  ;;  %v2573_v10 = vadd.f32 %v2572_v16, %v7656_v2  ;;  %v2263_v20 = vpop.f32.mrf.mxu0  ;;  %v2576_v17 = vpop.f32.mrf.mxu1 }
 0x227   :  { %v3085_v43 = vadd.f32 %v3084_v13, %v2905_v55  ;;  %v3151_v18 = vadd.f32 %v3150_v52, %v2875_v32  ;;  %v2906_v25 = vmax.f32 %v2260_v8, 0.0  ;;  %v2264_v39 = vadd.f32 %v2263_v20, %v7480_v6 }
 0x228   :  { %v2876_v57 = vmax.f32 %v2573_v10, 0.0  ;;  %v2577_v4 = vadd.f32 %v2576_v17, %v7645_v1  ;;  %v2265_v51 = vpop.f32.mrf.mxu0  ;;  %v2578_v36 = vpop.f32.mrf.mxu1 }
 0x229   :  { %v3122_v30 = vadd.f32 %v3121_v49, %v2906_v25  ;;  %v2909_v7 = vmax.f32 %v2264_v39, 0.0  ;;  %v2266_v19 = vadd.f32 %v2265_v51, %v7497_v27  ;;  %v2579_v53 = vadd.f32 %v2578_v36, %v7656_v2 }
 0x22a   :  { %v3188_v33 = vadd.f32 %v3187_v58, %v2876_v57  ;;  %v2879_v11 = vmax.f32 %v2577_v4, 0.0  ;;  %v2267_v15 = vpop.f32.mrf.mxu0  ;;  %v2580_v61 = vpop.f32.mrf.mxu1 }
 0x22b   :  { %v3086_v40 = vadd.f32 %v3085_v43, %v2909_v7  ;;  %v2910_v14 = vmax.f32 %v2266_v19, 0.0  ;;  %v2880_v47 = vmax.f32 %v2579_v53, 0.0  ;;  %v2268_v38 = vadd.f32 %v2267_v15, %v7480_v6 }
 0x22c   :  { %v3152_v34 = vadd.f32 %v3151_v18, %v2879_v11  ;;  %v2581_v5 = vadd.f32 %v2580_v61, %v7645_v1  ;;  %v2269_v46 = vpop.f32.mrf.mxu0  ;;  %v2582_v29 = vpop.f32.mrf.mxu1 }
 0x22d   :  { %v3123_v21 = vadd.f32 %v3122_v30, %v2910_v14  ;;  %v3189_v45 = vadd.f32 %v3188_v33, %v2880_v47  ;;  %v2913_v60 = vmax.f32 %v2268_v38, 0.0  ;;  %v2270_v35 = vadd.f32 %v2269_v46, %v7497_v27  ;;  %v6227_v30 = vld [vmem:[%s8940_s3 + $0x40c] ss:$12 sps:$4 sm:$0xff]  }
 0x22e   :  { %v2883_v31 = vmax.f32 %v2581_v5, 0.0  ;;  %v2583_v50 = vadd.f32 %v2582_v29, %v7656_v2  ;;  %v2273_v42 = vpop.f32.mrf.mxu0  ;;  %v2586_v62 = vpop.f32.mrf.mxu1  ;;  %4157 = vmatprep.subr.bf16.mxu0 %v6227_v30  ;;  %v6228_v5 = vld [vmem:[%s8940_s3 + $0x588] ss:$12 sps:$4 sm:$0xff]   ;;  %v6230_v46 = vld [vmem:[%s8940_s3 + $0x58c] ss:$12 sps:$4 sm:$0xff]  }
 0x22f   :  { %v3087_v13 = vadd.f32 %v3086_v40, %v2913_v60  ;;  %v2914_v24 = vmax.f32 %v2270_v35, 0.0  ;;  %v2274_v41 = vadd.f32 %v2273_v42, %v7480_v6  ;;  %v2587_v9 = vadd.f32 %v2586_v62, %v7645_v1  ;;  %4158 = vmatpush2.bf16.msra.mxu0 %v6225_v54  ;;  %4198 = vmatprep.subr.bf16.mxu1 %v6230_v46 }
 0x230   :  { %v3153_v3 = vadd.f32 %v3152_v34, %v2883_v31  ;;  %v2884_v52 = vmax.f32 %v2583_v50, 0.0  ;;  %v2275_v44 = vpop.f32.mrf.mxu0  ;;  %v2588_v37 = vpop.f32.mrf.mxu1  ;;  %4199 = vmatpush2.bf16.msra.mxu1 %v6228_v5 }
 0x231   :  { %v3124_v16 = vadd.f32 %v3123_v21, %v2914_v24  ;;  %v2917_v49 = vmax.f32 %v2274_v41, 0.0  ;;  %v2887_v55 = vmax.f32 %v2587_v9, 0.0  ;;  %v2276_v32 = vadd.f32 %v2275_v44, %v7497_v27 }
 0x232   :  { %v3190_v8 = vadd.f32 %v3189_v45, %v2884_v52  ;;  %v2589_v58 = vadd.f32 %v2588_v37, %v7656_v2  ;;  %v2277_v10 = vpop.f32.mrf.mxu0  ;;  %v2590_v20 = vpop.f32.mrf.mxu1 }
 0x233   :  { %v3088_v17 = vadd.f32 %v3087_v13, %v2917_v49  ;;  %v3154_v63 = vadd.f32 %v3153_v3, %v2887_v55  ;;  %v2918_v0 = vmax.f32 %v2276_v32, 0.0  ;;  %v2278_v43 = vadd.f32 %v2277_v10, %v7480_v6 }
 0x234   :  { %v2888_v18 = vmax.f32 %v2589_v58, 0.0  ;;  %v2591_v25 = vadd.f32 %v2590_v20, %v7645_v1  ;;  %v2279_v39 = vpop.f32.mrf.mxu0  ;;  %v2592_v57 = vpop.f32.mrf.mxu1 }
 0x235   :  { %v3125_v4 = vadd.f32 %v3124_v16, %v2918_v0  ;;  %v2921_v51 = vmax.f32 %v2278_v43, 0.0  ;;  %v2280_v36 = vadd.f32 %v2279_v39, %v7497_v27  ;;  %v2593_v26 = vadd.f32 %v2592_v57, %v7656_v2 }
 0x236   :  { %v3191_v7 = vadd.f32 %v3190_v8, %v2888_v18  ;;  %v2891_v19 = vmax.f32 %v2591_v25, 0.0  ;;  %v2283_v53 = vpop.f32.mrf.mxu0  ;;  %v2596_v33 = vpop.f32.mrf.mxu1 }
 0x237   :  { %v3089_v11 = vadd.f32 %v3088_v17, %v2921_v51  ;;  %v2922_v15 = vmax.f32 %v2280_v36, 0.0  ;;  %v2892_v61 = vmax.f32 %v2593_v26, 0.0  ;;  %v2284_v40 = vadd.f32 %v2283_v53, %v7480_v6 }
 0x238   :  { %v3155_v14 = vadd.f32 %v3154_v63, %v2891_v19  ;;  %v2597_v47 = vadd.f32 %v2596_v33, %v7645_v1  ;;  %v2285_v38 = vpop.f32.mrf.mxu0  ;;  %v2598_v34 = vpop.f32.mrf.mxu1  ;;  %v6233_v33 = vld [vmem:[%s8940_s3 + $0x3f4] ss:$12 sps:$4 sm:$0xff]  }
 0x239   :  { %v3126_v29 = vadd.f32 %v3125_v4, %v2922_v15  ;;  %v3192_v21 = vadd.f32 %v3191_v7, %v2892_v61  ;;  %v2925_v45 = vmax.f32 %v2284_v40, 0.0  ;;  %v2286_v60 = vadd.f32 %v2285_v38, %v7497_v27  ;;  %4159 = vmatprep.subr.bf16.mxu0 %v6233_v33 }
 0x23a   :  { %v2895_v35 = vmax.f32 %v2597_v47, 0.0  ;;  %v2599_v31 = vadd.f32 %v2598_v34, %v7656_v2  ;;  %v2287_v50 = vpop.f32.mrf.mxu0  ;;  %v2600_v42 = vpop.f32.mrf.mxu1  ;;  %v6231_v47 = vld [vmem:[%s8940_s3 + $0x3f0] ss:$12 sps:$4 sm:$0xff]  }
 0x23b   :  { %v3090_v62 = vadd.f32 %v3089_v11, %v2925_v45  ;;  %v2926_v13 = vmax.f32 %v2286_v60, 0.0  ;;  %v2288_v24 = vadd.f32 %v2287_v50, %v7480_v6  ;;  %v2601_v41 = vadd.f32 %v2600_v42, %v7645_v1  ;;  %4160 = vmatpush2.bf16.msra.mxu0 %v6231_v47  ;;  %v6237_v42 = vld [vmem:[%s8940_s3 + $0x3d8] ss:$12 sps:$4 sm:$0xff]  }
 0x23c   :  { %v3156_v9 = vadd.f32 %v3155_v14, %v2895_v35  ;;  %v2896_v3 = vmax.f32 %v2599_v31, 0.0  ;;  %v2289_v52 = vpop.f32.mrf.mxu0  ;;  %v2602_v44 = vpop.f32.mrf.mxu1 }
 0x23d   :  { %v3127_v37 = vadd.f32 %v3126_v29, %v2926_v13  ;;  %v2929_v16 = vmax.f32 %v2288_v24, 0.0  ;;  %v2899_v49 = vmax.f32 %v2601_v41, 0.0  ;;  %v2290_v55 = vadd.f32 %v2289_v52, %v7497_v27  ;;  %v6242_v52 = vld [vmem:[%s8940_s3 + $0x3c4] ss:$12 sps:$4 sm:$0xff]  }
 0x23e   :  { %v3193_v32 = vadd.f32 %v3192_v21, %v2896_v3  ;;  %v2603_v8 = vadd.f32 %v2602_v44, %v7656_v2  ;;  %v7883_v58 = vpop.f32.mrf.mxu0  ;;  %v2606_v10 = vpop.f32.mrf.mxu1  ;;  %v6239_v21 = vld [vmem:[%s8940_s3 + $0x3dc] ss:$12 sps:$4 sm:$0xff]  }
 0x23f   :  { %v7885_v20 = vadd.f32 %v3090_v62, %v2929_v16  ;;  %v3157_v17 = vadd.f32 %v3156_v9, %v2899_v49  ;;  %v2930_v63 = vmax.f32 %v2290_v55, 0.0  ;;  %v2607_v43 = vadd.f32 %v2606_v10, %v7645_v1  ;;  %4161 = vmatprep.subr.bf16.mxu0 %v6239_v21  ;;  %v6234_v55 = vld [vmem:[%s8940_s3 + $0x570] ss:$12 sps:$4 sm:$0xff]   ;;  %v6240_v10 = vld [vmem:[%s8940_s3 + $0x3c0] ss:$12 sps:$4 sm:$0xff]  }
 0x240   :  { %v2900_v0 = vmax.f32 %v2603_v8, 0.0  ;;  %v7888_v18 = vpop.f32.mrf.mxu0  ;;  %v2608_v25 = vpop.f32.mrf.mxu1  ;;  %4162 = vmatpush2.bf16.msra.mxu0 %v6237_v42 }
 0x241   :  { %v7890_v39 = vadd.f32 %v3127_v37, %v2930_v63  ;;  %v2903_v4 = vmax.f32 %v2607_v43, 0.0  ;;  %v2609_v51 = vadd.f32 %v2608_v25, %v7656_v2  ;;  %4163 = vmatprep.subr.bf16.mxu0 %v6242_v52 }
 0x242   :  { %v3194_v57 = vadd.f32 %v3193_v32, %v2900_v0  ;;  %v7893_v36 = vpop.f32.mrf.mxu0  ;;  %v2610_v26 = vpop.f32.mrf.mxu1  ;;  %v6236_v32 = vld [vmem:[%s8940_s3 + $0x574] ss:$12 sps:$4 sm:$0xff]  }
 0x243   :  { %v3158_v54 = vadd.f32 %v3157_v17, %v2903_v4  ;;  %v2904_v30 = vmax.f32 %v2609_v51, 0.0  ;;  %v2611_v7 = vadd.f32 %v2610_v26, %v7645_v1  ;;  %4200 = vmatprep.subr.bf16.mxu1 %v6236_v32  ;;  %v2298_v52 = vadd.f32 %v7893_v36, %v7480_v6 }
 0x244   :  { %v7896_v19 = vpop.f32.mrf.mxu0  ;;  %v2612_v53 = vpop.f32.mrf.mxu1  ;;  %4201 = vmatpush2.bf16.msra.mxu1 %v6234_v55  ;;  %4164 = vmatpush2.bf16.msra.mxu0 %v6240_v10 }
 0x245   :  { %v3195_v11 = vadd.f32 %v3194_v57, %v2904_v30  ;;  %v2907_v15 = vmax.f32 %v2611_v7, 0.0  ;;  %v2613_v61 = vadd.f32 %v2612_v53, %v7656_v2  ;;  %v6243_v57 = vld [vmem:[%s8940_s3 + $0x470] ss:$12 sps:$4 sm:$0xff]   ;;  %v2300_v10 = vadd.f32 %v7896_v19, %v7497_v27 }
 0x246   :  { %v7902_v40 = vpop.f32.mrf.mxu0  ;;  %v2616_v14 = vpop.f32.mrf.mxu1  ;;  %5947 = vmatprep.subr.bf16.mxu0 %v6243_v57 }
 0x247   :  { %v3159_v38 = vadd.f32 %v3158_v54, %v2907_v15  ;;  %v2908_v34 = vmax.f32 %v2613_v61, 0.0  ;;  %v2617_v5 = vadd.f32 %v2616_v14, %v7645_v1  ;;  %v2304_v57 = vadd.f32 %v7902_v40, %v7480_v6 }
 0x248   :  { %v7908_v46 = vpop.f32.mrf.mxu0  ;;  %v2618_v29 = vpop.f32.mrf.mxu1 }
 0x249   :  { %v3196_v45 = vadd.f32 %v3195_v11, %v2908_v34  ;;  %v2911_v60 = vmax.f32 %v2617_v5, 0.0  ;;  %v2619_v35 = vadd.f32 %v2618_v29, %v7656_v2  ;;  %v6244_v5 = vld [vmem:[%s8940_s3 + $0x558] ss:$12 sps:$4 sm:$0xff]   ;;  %v6246_v29 = vld [vmem:[%s8940_s3 + $0x55c] ss:$12 sps:$4 sm:$0xff]   ;;  %v2941_v40 = vmax.f32 %v2304_v57, 0.0 }
 0x24a   :  { %v7914_v31 = vpop.f32.mrf.mxu0  ;;  %v2620_v50 = vpop.f32.mrf.mxu1  ;;  %4202 = vmatprep.subr.bf16.mxu1 %v6246_v29 }
 0x24b   :  { %v3160_v62 = vadd.f32 %v3159_v38, %v2911_v60  ;;  %v2912_v13 = vmax.f32 %v2619_v35, 0.0  ;;  %v2621_v24 = vadd.f32 %v2620_v50, %v7645_v1  ;;  %4203 = vmatpush2.bf16.msra.mxu1 %v6244_v5 }
 0x24c   :  { %v7920_v41 = vpop.f32.mrf.mxu0  ;;  %v2622_v9 = vpop.f32.mrf.mxu1 }
 0x24d   :  { %v2623_v3 = vadd.f32 %v2622_v9, %v7656_v2  ;;  %v3197_v44 = vadd.f32 %v3196_v45, %v2912_v13  ;;  %v2915_v37 = vmax.f32 %v2621_v24, 0.0  ;;  %v2294_v9 = vadd.f32 %v7883_v58, %v7480_v6 }
 0x24e   :  { %v7926_v16 = vpop.f32.mrf.mxu0  ;;  %v2626_v49 = vpop.f32.mrf.mxu1 }
 0x24f   :  { %v2916_v8 = vmax.f32 %v2623_v3, 0.0  ;;  %v3161_v17 = vadd.f32 %v3160_v62, %v2915_v37  ;;  %v2627_v63 = vadd.f32 %v2626_v49, %v7645_v1  ;;  %v2933_v36 = vmax.f32 %v2294_v9, 0.0 }
 0x250   :  { %v7938_v0 = vpop.f32.mrf.mxu0  ;;  %v2628_v43 = vpop.f32.mrf.mxu1 }
 0x251   :  { %v3198_v25 = vadd.f32 %v3197_v44, %v2916_v8  ;;  %v2919_v4 = vmax.f32 %v2627_v63, 0.0  ;;  %v2629_v51 = vadd.f32 %v2628_v43, %v7656_v2  ;;  %v2296_v8 = vadd.f32 %v7888_v18, %v7497_v27 }
 0x252   :  { %v7944_v26 = vpop.f32.mrf.mxu0  ;;  %v2630_v54 = vpop.f32.mrf.mxu1 }
 0x253   :  { %v2631_v30 = vadd.f32 %v2630_v54, %v7645_v1  ;;  %v3162_v7 = vadd.f32 %v3161_v17, %v2919_v4  ;;  %v2920_v53 = vmax.f32 %v2629_v51, 0.0  ;;  %v2934_v19 = vmax.f32 %v2296_v8, 0.0 }
 0x254   :  { %v7947_v33 = vpop.f32.mrf.mxu0  ;;  %v2632_v11 = vpop.f32.mrf.mxu1 }
 0x255   :  { %v2923_v15 = vmax.f32 %v2631_v30, 0.0  ;;  %v3199_v61 = vadd.f32 %v3198_v25, %v2920_v53  ;;  %v2633_v14 = vadd.f32 %v2632_v11, %v7656_v2  ;;  %v2937_v25 = vmax.f32 %v2298_v52, 0.0 }
 0x256   :  { %v7950_v47 = vpop.f32.mrf.mxu0  ;;  %v2636_v38 = vpop.f32.mrf.mxu1  ;;  %v2938_v30 = vmax.f32 %v2300_v10, 0.0 }
 0x257   :  { %v3163_v34 = vadd.f32 %v3162_v7, %v2923_v15  ;;  %v2924_v21 = vmax.f32 %v2633_v14, 0.0  ;;  %v2637_v45 = vadd.f32 %v2636_v38, %v7645_v1  ;;  %v2306_v7 = vadd.f32 %v7908_v46, %v7497_v27 }
 0x258   :  { %v7959_v60 = vpop.f32.mrf.mxu0  ;;  %v2638_v35 = vpop.f32.mrf.mxu1  ;;  %v2308_v14 = vadd.f32 %v7914_v31, %v7480_v6  ;;  %v3246_v5 = vadd.f32 %v2938_v30, %v2934_v19  ;;  %v2310_v46 = vadd.f32 %v7920_v41, %v7497_v27 }
 0x259   :  { %v2639_v50 = vadd.f32 %v2638_v35, %v7656_v2  ;;  %v3200_v42 = vadd.f32 %v3199_v61, %v2924_v21  ;;  %v2927_v62 = vmax.f32 %v2637_v45, 0.0  ;;  %v3209_v61 = vadd.f32 %v2937_v25, %v2933_v36  ;;  %v6255_v36 = vld [vmem:[%s8940_s3 + $0x540] ss:$12 sps:$4 sm:$0xff]  }
 0x25a   :  { %v7962_v13 = vpop.f32.mrf.mxu0  ;;  %v2640_v24 = vpop.f32.mrf.mxu1  ;;  %v2942_v29 = vmax.f32 %v2306_v7, 0.0  ;;  %v2946_v9 = vmax.f32 %v2310_v46, 0.0 }
 0x25b   :  { %v2928_v3 = vmax.f32 %v2639_v50, 0.0  ;;  %v3164_v44 = vadd.f32 %v3163_v34, %v2927_v62  ;;  %v2641_v37 = vadd.f32 %v2640_v24, %v7645_v1  ;;  %v3210_v35 = vadd.f32 %v3209_v61, %v2941_v40 }
 0x25c   :  { %v7969_v49 = vpop.f32.mrf.mxu0  ;;  %v2642_v55 = vpop.f32.mrf.mxu1  ;;  %v2945_v50 = vmax.f32 %v2308_v14, 0.0  ;;  %v3247_v24 = vadd.f32 %v3246_v5, %v2942_v29  ;;  %v2326_v61 = vadd.f32 %v7959_v60, %v7497_v27  ;;  %v6265_v5 = vld [vmem:[%s8940_s3 + $0x5f0] ss:$12 sps:$4 sm:$0xff]   ;;  %v2328_v46 = vadd.f32 %v7962_v13, %v7480_v6 }
 0x25d   :  { %v3201_v32 = vadd.f32 %v3200_v42, %v2928_v3  ;;  %v2931_v17 = vmax.f32 %v2641_v37, 0.0  ;;  %v2643_v58 = vadd.f32 %v2642_v55, %v7656_v2  ;;  %v2314_v42 = vadd.f32 %v7926_v16, %v7480_v6 }
 0x25e   :  { %v7976_v63 = vpop.f32.mrf.mxu0  ;;  %v7978_v43 = vpop.f32.mrf.mxu1  ;;  %v2316_v3 = vadd.f32 %v7938_v0, %v7497_v27  ;;  %v2318_v55 = vadd.f32 %v7944_v26, %v7480_v6  ;;  %v3248_v8 = vadd.f32 %v3247_v24, %v2946_v9  ;;  %v6257_v26 = vld [vmem:[%s8940_s3 + $0x544] ss:$12 sps:$4 sm:$0xff]   ;;  %v2958_v60 = vmax.f32 %v2326_v61, 0.0 }
 0x25f   :  { %v7982_v4 = vadd.f32 %v3164_v44, %v2931_v17  ;;  %v2932_v51 = vmax.f32 %v2643_v58, 0.0  ;;  %v3211_v44 = vadd.f32 %v3210_v35, %v2945_v50  ;;  %v2949_v37 = vmax.f32 %v2314_v42, 0.0  ;;  %4204 = vmatprep.subr.bf16.mxu1 %v6257_v26 }
 0x260   :  { %v7984_v54 = vpop.f32.mrf.mxu0  ;;  %v7986_v18 = vpop.f32.mrf.mxu1  ;;  %v2950_v10 = vmax.f32 %v2316_v3, 0.0  ;;  %v2320_v17 = vadd.f32 %v7947_v33, %v7497_v27  ;;  %v2953_v57 = vmax.f32 %v2318_v55, 0.0  ;;  %4205 = vmatpush2.bf16.msra.mxu1 %v6255_v36  ;;  %v2330_v24 = vadd.f32 %v7969_v49, %v7497_v27 }
 0x261   :  { %v7990_v53 = vadd.f32 %v3201_v32, %v2932_v51  ;;  %v3212_v25 = vadd.f32 %v3211_v44, %v2949_v37  ;;  %v2324_v51 = vadd.f32 %v7950_v47, %v7480_v6  ;;  %5969 = vmatprep.subr.bf16.mxu1 %v6265_v5  ;;  %v3092_v44 = vrot.slane %v7885_v20, 4 }
 0x262   :  { %v7992_v11 = vpop.f32.mrf.mxu0  ;;  %v7994_v15 = vpop.f32.mrf.mxu1  ;;  %v3249_v30 = vadd.f32 %v3248_v8, %v2950_v10  ;;  %v2954_v7 = vmax.f32 %v2320_v17, 0.0  ;;  %v2961_v55 = vmax.f32 %v2328_v46, 0.0  ;;  %v2334_v13 = vadd.f32 %v7976_v63, %v7480_v6 }
 0x263   :  { %v3213_v47 = vadd.f32 %v3212_v25, %v2953_v57  ;;  %v2957_v29 = vmax.f32 %v2324_v51, 0.0  ;;  %v2962_v36 = vmax.f32 %v2330_v24, 0.0  ;;  %v2336_v49 = vadd.f32 %v7984_v54, %v7497_v27 }
 0x264   :  { %v7998_v38 = vpop.f32.mrf.mxu0  ;;  %v8000_v34 = vpop.f32.mrf.mxu1  ;;  %v3250_v42 = vadd.f32 %v3249_v30, %v2954_v7  ;;  %v3093_v57 = vadd.f32 %v3092_v44, %v7885_v20  ;;  %v3129_v51 = vrot.slane %v7890_v39, 4  ;;  %v2965_v7 = vmax.f32 %v2334_v13, 0.0 }
 0x265   :  { %v3214_v37 = vadd.f32 %v3213_v47, %v2957_v29  ;;  %v2338_v63 = vadd.f32 %v7992_v11, %v7480_v6  ;;  %v2966_v29 = vmax.f32 %v2336_v49, 0.0  ;;  %v2340_v54 = vadd.f32 %v7998_v38, %v7497_v27 }
 0x266   :  { %v8004_v21 = vpop.f32.mrf.mxu0  ;;  %v8006_v45 = vpop.f32.mrf.mxu1  ;;  %v3251_v17 = vadd.f32 %v3250_v42, %v2958_v60  ;;  %v3094_v20 = vrot.slane %v3093_v57, 2  ;;  %v3130_v60 = vadd.f32 %v3129_v51, %v7890_v39 }
 0x267   :  { %v3215_v30 = vadd.f32 %v3214_v37, %v2961_v55  ;;  %v2969_v44 = vmax.f32 %v2338_v63, 0.0  ;;  %v2344_v11 = vadd.f32 %v8004_v21, %v7480_v6  ;;  %v2651_v21 = vadd.f32 %v7994_v15, %v7645_v1 }
 0x268   :  { %v8010_v62 = vpop.f32.mrf.mxu0  ;;  %v8012_v31 = vpop.f32.mrf.mxu1  ;;  %v3252_v47 = vadd.f32 %v3251_v17, %v2962_v36  ;;  %v2970_v17 = vmax.f32 %v2340_v54, 0.0  ;;  %v8105_v22 = vadd.f32 %v3094_v20, %v3093_v57  ;;  %v3131_v39 = vrot.slane %v3130_v60, 2 }
 0x269   :  { %v3216_v24 = vadd.f32 %v3215_v30, %v2965_v7  ;;  %v2346_v38 = vadd.f32 %v8010_v62, %v7497_v27  ;;  %v2973_v30 = vmax.f32 %v2344_v11, 0.0  ;;  %v2647_v62 = vadd.f32 %v7978_v43, %v7645_v1 }
 0x26a   :  { %v8016_v52 = vpop.f32.mrf.mxu0  ;;  %v8018_v41 = vpop.f32.mrf.mxu1  ;;  %v3253_v13 = vadd.f32 %v3252_v47, %v2966_v29  ;;  %v2653_v57 = vadd.f32 %v8000_v34, %v7656_v2  ;;  %v2657_v54 = vadd.f32 %v8006_v45, %v7645_v1  ;;  %v8128_v11 = vadd.f32 %v3131_v39, %v3130_v60 }
 0x26b   :  { %v3217_v51 = vadd.f32 %v3216_v24, %v2969_v44  ;;  %v2348_v7 = vadd.f32 %v8016_v52, %v7480_v6  ;;  %v2974_v20 = vmax.f32 %v2346_v38, 0.0  ;;  %v2649_v43 = vadd.f32 %v7986_v18, %v7656_v2 }
 0x26c   :  { %v8022_v32 = vpop.f32.mrf.mxu0  ;;  %v8024_v16 = vpop.f32.mrf.mxu1  ;;  %v3254_v29 = vadd.f32 %v3253_v13, %v2970_v17  ;;  %v2659_v34 = vadd.f32 %v8012_v31, %v7656_v2  ;;  %v2939_v13 = vmax.f32 %v2651_v21, 0.0  ;;  %v2935_v56 = vmax.f32 %v2647_v62, 0.0 }
 0x26d   :  { %v2350_v15 = vadd.f32 %v8022_v32, %v7497_v27  ;;  %v3218_v45 = vadd.f32 %v3217_v51, %v2973_v30  ;;  %v2977_v17 = vmax.f32 %v2348_v7, 0.0  ;;  %v2940_v44 = vmax.f32 %v2653_v57, 0.0 }
 0x26e   :  { %v8028_v58 = vpop.f32.mrf.mxu0  ;;  %v8030_v0 = vpop.f32.mrf.mxu1  ;;  %v2661_v60 = vadd.f32 %v8018_v41, %v7645_v1  ;;  %v2663_v18 = vadd.f32 %v8024_v16, %v7656_v2  ;;  %v2943_v39 = vmax.f32 %v2657_v54, 0.0  ;;  %v3255_v31 = vadd.f32 %v3254_v29, %v2974_v20 }
 0x26f   :  { %v2354_v32 = vadd.f32 %v8028_v58, %v7480_v6  ;;  %v2978_v21 = vmax.f32 %v2350_v15, 0.0  ;;  %v2936_v7 = vmax.f32 %v2649_v43, 0.0  ;;  %v2944_v48 = vmax.f32 %v2659_v34, 0.0 }
 0x270   :  { %v8040_v19 = vpop.f32.mrf.mxu0  ;;  %v8042_v33 = vpop.f32.mrf.mxu1  ;;  %v2667_v62 = vadd.f32 %v8030_v0, %v7645_v1  ;;  %v3283_v57 = vadd.f32 %v2939_v13, %v2935_v56  ;;  %v3219_v16 = vadd.f32 %v3218_v45, %v2977_v17  ;;  %v2947_v28 = vmax.f32 %v2661_v60, 0.0 }
 0x271   :  { %v2356_v51 = vadd.f32 %v8040_v19, %v7497_v27  ;;  %v2669_v41 = vadd.f32 %v8042_v33, %v7656_v2  ;;  %v2981_v54 = vmax.f32 %v2354_v32, 0.0  ;;  %v3320_v15 = vadd.f32 %v2940_v44, %v2936_v7 }
 0x272   :  { %v8046_v40 = vpop.f32.mrf.mxu0  ;;  %v8048_v14 = vpop.f32.mrf.mxu1  ;;  %v2948_v43 = vmax.f32 %v2663_v18, 0.0  ;;  %v3284_v0 = vadd.f32 %v3283_v57, %v2943_v39  ;;  %v3256_v12 = vadd.f32 %v3255_v31, %v2978_v21  ;;  %v2951_v45 = vmax.f32 %v2667_v62, 0.0 }
 0x273   :  { %v2358_v29 = vadd.f32 %v8046_v40, %v7480_v6  ;;  %v2671_v34 = vadd.f32 %v8048_v14, %v7645_v1  ;;  %v2982_v23 = vmax.f32 %v2356_v51, 0.0  ;;  %v3321_v40 = vadd.f32 %v3320_v15, %v2944_v48 }
 0x274   :  { %v8055_v35 = vpop.f32.mrf.mxu0  ;;  %v8057_v50 = vpop.f32.mrf.mxu1  ;;  %v2952_v17 = vmax.f32 %v2669_v41, 0.0  ;;  %v3220_v32 = vadd.f32 %v3219_v16, %v2981_v54  ;;  %v3285_v31 = vadd.f32 %v3284_v0, %v2947_v28 }
 0x275   :  { %v2360_v56 = vadd.f32 %v8055_v35, %v7497_v27  ;;  %v2673_v44 = vadd.f32 %v8057_v50, %v7656_v2  ;;  %v2985_v60 = vmax.f32 %v2358_v29, 0.0  ;;  %v3322_v21 = vadd.f32 %v3321_v40, %v2948_v43 }
 0x276   :  { %v8061_v9 = vpop.f32.mrf.mxu0  ;;  %v8063_v3 = vpop.f32.mrf.mxu1  ;;  %v2955_v48 = vmax.f32 %v2671_v34, 0.0  ;;  %v3257_v7 = vadd.f32 %v3256_v12, %v2982_v23  ;;  %v3286_v57 = vadd.f32 %v3285_v31, %v2951_v45 }
 0x277   :  { %v2364_v14 = vadd.f32 %v8061_v9, %v7480_v6  ;;  %v2677_v18 = vadd.f32 %v8063_v3, %v7645_v1  ;;  %v2986_v50 = vmax.f32 %v2360_v56, 0.0  ;;  %v3323_v16 = vadd.f32 %v3322_v21, %v2952_v17 }
 0x278   :  { %v8068_v8 = vpop.f32.mrf.mxu0  ;;  %v8070_v10 = vpop.f32.mrf.mxu1  ;;  %v2956_v28 = vmax.f32 %v2673_v44, 0.0  ;;  %v3221_v29 = vadd.f32 %v3220_v32, %v2985_v60 }
 0x279   :  { %v2366_v51 = vadd.f32 %v8068_v8, %v7497_v27  ;;  %v2679_v62 = vadd.f32 %v8070_v10, %v7656_v2  ;;  %v2989_v8 = vmax.f32 %v2364_v14, 0.0  ;;  %v2959_v23 = vmax.f32 %v2677_v18, 0.0 }
 0x27a   :  { %v8074_v26 = vpop.f32.mrf.mxu0  ;;  %v8076_v25 = vpop.f32.mrf.mxu1  ;;  %v3258_v56 = vadd.f32 %v3257_v7, %v2986_v50  ;;  %v3324_v44 = vadd.f32 %v3323_v16, %v2956_v28 }
 0x27b   :  { %v2368_v9 = vadd.f32 %v8074_v26, %v7480_v6  ;;  %v2681_v54 = vadd.f32 %v8076_v25, %v7645_v1  ;;  %v3287_v26 = vadd.f32 %v3286_v57, %v2955_v48  ;;  %v2990_v43 = vmax.f32 %v2366_v51, 0.0 }
 0x27c   :  { %v8082_v61 = vpop.f32.mrf.mxu0  ;;  %v8084_v5 = vpop.f32.mrf.mxu1  ;;  %v2960_v25 = vmax.f32 %v2679_v62, 0.0  ;;  %v3222_v14 = vadd.f32 %v3221_v29, %v2989_v8 }
 0x27d   :  { %v2370_v12 = vadd.f32 %v8082_v61, %v7497_v27  ;;  %v2683_v34 = vadd.f32 %v8084_v5, %v7656_v2  ;;  %v2993_v40 = vmax.f32 %v2368_v9, 0.0  ;;  %v2963_v32 = vmax.f32 %v2681_v54, 0.0 }
 0x27e   :  { %v8088_v46 = vpop.f32.mrf.mxu0  ;;  %v8090_v42 = vpop.f32.mrf.mxu1  ;;  %v3259_v48 = vadd.f32 %v3258_v56, %v2990_v43 }
 0x27f   :  { %v2374_v0 = vadd.f32 %v8088_v46, %v7480_v6  ;;  %v2687_v45 = vadd.f32 %v8090_v42, %v7645_v1  ;;  %v3288_v46 = vadd.f32 %v3287_v26, %v2959_v23  ;;  %v2994_v18 = vmax.f32 %v2370_v12, 0.0 }
 0x280   :  { %v8095_v37 = vpop.f32.mrf.mxu0  ;;  %v8097_v55 = vpop.f32.mrf.mxu1  ;;  %v2964_v51 = vmax.f32 %v2683_v34, 0.0  ;;  %v3223_v62 = vadd.f32 %v3222_v14, %v2993_v40 }
 0x281   :  { %v2376_v60 = vadd.f32 %v8095_v37, %v7497_v27  ;;  %v2689_v5 = vadd.f32 %v8097_v55, %v7656_v2  ;;  %v2997_v7 = vmax.f32 %v2374_v0, 0.0  ;;  %v3325_v37 = vadd.f32 %v3324_v44, %v2960_v25 }
 0x282   :  { %v8101_v36 = vpop.f32.mrf.mxu0  ;;  %v8103_v49 = vpop.f32.mrf.mxu1  ;;  %v2967_v9 = vmax.f32 %v2687_v45, 0.0  ;;  %v3260_v8 = vadd.f32 %v3259_v48, %v2994_v18 }
 0x283   :  { %v2378_v31 = vadd.f32 %v8101_v36, %v7480_v6  ;;  %v2691_v50 = vadd.f32 %v8103_v49, %v7645_v1  ;;  %v3289_v36 = vadd.f32 %v3288_v46, %v2963_v32  ;;  %v2998_v28 = vmax.f32 %v2376_v60, 0.0 }
 0x284   :  { %v8111_v63 = vpop.f32.mrf.mxu0  ;;  %v8113_v47 = vpop.f32.mrf.mxu1  ;;  %v2968_v54 = vmax.f32 %v2689_v5, 0.0  ;;  %v3326_v43 = vadd.f32 %v3325_v37, %v2964_v51  ;;  %v3224_v34 = vadd.f32 %v3223_v62, %v2997_v7 }
 0x285   :  { %v2380_v55 = vadd.f32 %v8111_v63, %v7497_v27  ;;  %v2693_v29 = vadd.f32 %v8113_v47, %v7656_v2  ;;  %v3001_v23 = vmax.f32 %v2378_v31, 0.0  ;;  %v2971_v0 = vmax.f32 %v2691_v50, 0.0 }
 0x286   :  { %v8123_v24 = vpop.f32.mrf.mxu0  ;;  %v8125_v52 = vpop.f32.mrf.mxu1  ;;  %v3290_v25 = vadd.f32 %v3289_v36, %v2967_v9  ;;  %v3327_v32 = vadd.f32 %v3326_v43, %v2968_v54 }
 0x287   :  { %v2384_v49 = vadd.f32 %v8123_v24, %v7480_v6  ;;  %v2697_v12 = vadd.f32 %v8125_v52, %v7645_v1  ;;  %v3002_v40 = vmax.f32 %v2380_v55, 0.0  ;;  %v3261_v52 = vadd.f32 %v3260_v8, %v2998_v28 }
 0x288   :  { %v8136_v38 = vpop.f32.mrf.mxu0  ;;  %v8138_v59 = vpop.f32.mrf.mxu1  ;;  %v2972_v60 = vmax.f32 %v2693_v29, 0.0  ;;  %v3225_v14 = vadd.f32 %v3224_v34, %v3001_v23  ;;  %v3291_v48 = vadd.f32 %v3290_v25, %v2971_v0 }
 0x289   :  { %v2386_v56 = vadd.f32 %v8136_v38, %v7497_v27  ;;  %v2699_v47 = vadd.f32 %v8138_v59, %v7656_v2  ;;  %v3005_v46 = vmax.f32 %v2384_v49, 0.0  ;;  %v2975_v38 = vmax.f32 %v2697_v12, 0.0 }
 0x28a   :  { %v8146_v30 = vpop.f32.mrf.mxu0  ;;  %v8148_v58 = vpop.f32.mrf.mxu1  ;;  %v3262_v50 = vadd.f32 %v3261_v52, %v3002_v40 }
 0x28b   :  { %v2388_v24 = vadd.f32 %v8146_v30, %v7480_v6  ;;  %v2701_v5 = vadd.f32 %v8148_v58, %v7645_v1  ;;  %v3006_v30 = vmax.f32 %v2386_v56, 0.0  ;;  %v2976_v37 = vmax.f32 %v2699_v47, 0.0 }
 0x28c   :  { %v8156_v20 = vpop.f32.mrf.mxu0  ;;  %v8158_v19 = vpop.f32.mrf.mxu1  ;;  %v3226_v54 = vadd.f32 %v3225_v14, %v3005_v46  ;;  %v3292_v29 = vadd.f32 %v3291_v48, %v2975_v38 }
 0x28d   :  { %v2390_v18 = vadd.f32 %v8156_v20, %v7497_v27  ;;  %v2703_v51 = vadd.f32 %v8158_v19, %v7656_v2  ;;  %v3009_v58 = vmax.f32 %v2388_v24, 0.0  ;;  %v3328_v20 = vadd.f32 %v3327_v32, %v2972_v60 }
 0x28e   :  { %v8164_v33 = vpop.f32.mrf.mxu0  ;;  %v8166_v13 = vpop.f32.mrf.mxu1  ;;  %v2979_v36 = vmax.f32 %v2701_v5, 0.0 }
 0x28f   :  { %v2394_v7 = vadd.f32 %v8164_v33, %v7480_v6  ;;  %v2707_v28 = vadd.f32 %v8166_v13, %v7645_v1  ;;  %v3010_v33 = vmax.f32 %v2390_v18, 0.0  ;;  %v2980_v12 = vmax.f32 %v2703_v51, 0.0 }
 0x290   :  { %v8174_v39 = vpop.f32.mrf.mxu0  ;;  %v8176_v35 = vpop.f32.mrf.mxu1  ;;  %v3329_v0 = vadd.f32 %v3328_v20, %v2976_v37  ;;  %v3227_v13 = vadd.f32 %v3226_v54, %v3009_v58  ;;  %v3293_v47 = vadd.f32 %v3292_v29, %v2979_v36 }
 0x291   :  { %v2396_v62 = vadd.f32 %v8174_v39, %v7497_v27  ;;  %v3263_v39 = vadd.f32 %v3262_v50, %v3006_v30  ;;  %v3013_v43 = vmax.f32 %v2394_v7, 0.0  ;;  %v2709_v60 = vadd.f32 %v8176_v35, %v7656_v2 }
 0x292   :  { %v8184_v41 = vpop.f32.mrf.mxu0  ;;  %v8186_v3 = vpop.f32.mrf.mxu1 }
 0x293   :  { %v2398_v19 = vadd.f32 %v8184_v41, %v7480_v6  ;;  %v3014_v56 = vmax.f32 %v2396_v62, 0.0  ;;  %v3264_v32 = vadd.f32 %v3263_v39, %v3010_v33  ;;  %v3228_v38 = vadd.f32 %v3227_v13, %v3013_v43 }
 0x294   :  { %v8192_v10 = vpop.f32.mrf.mxu0  ;;  %v8194_v15 = vpop.f32.mrf.mxu1  ;;  %v2711_v51 = vadd.f32 %v8186_v3, %v7645_v1  ;;  %v2984_v20 = vmax.f32 %v2709_v60, 0.0 }
 0x295   :  { %v2400_v8 = vadd.f32 %v8192_v10, %v7497_v27  ;;  %v2983_v10 = vmax.f32 %v2707_v28, 0.0  ;;  %v3017_v24 = vmax.f32 %v2398_v19, 0.0  ;;  %v3265_v30 = vadd.f32 %v3264_v32, %v3014_v56 }
 0x296   :  { %v8202_v17 = vpop.f32.mrf.mxu0  ;;  %v8204_v61 = vpop.f32.mrf.mxu1  ;;  %v2713_v3 = vadd.f32 %v8194_v15, %v7656_v2 }
 0x297   :  { %v2404_v34 = vadd.f32 %v8202_v17, %v7480_v6  ;;  %v3018_v17 = vmax.f32 %v2400_v8, 0.0  ;;  %v3294_v37 = vadd.f32 %v3293_v47, %v2983_v10  ;;  %v2717_v8 = vadd.f32 %v8204_v61, %v7645_v1 }
 0x298   :  { %v8212_v21 = vpop.f32.mrf.mxu0  ;;  %v8214_v42 = vpop.f32.mrf.mxu1 }
 0x299   :  { %v2406_v41 = vadd.f32 %v8212_v21, %v7497_v27  ;;  %v3330_v21 = vadd.f32 %v3329_v0, %v2980_v12  ;;  %v3021_v18 = vmax.f32 %v2404_v34, 0.0  ;;  %v3266_v36 = vadd.f32 %v3265_v30, %v3018_v17 }
 0x29a   :  { %v8220_v57 = vpop.f32.mrf.mxu0  ;;  %v8222_v16 = vpop.f32.mrf.mxu1  ;;  %v2719_v15 = vadd.f32 %v8214_v42, %v7656_v2 }
 0x29b   :  { %v2408_v52 = vadd.f32 %v8220_v57, %v7480_v6  ;;  %v3022_v57 = vmax.f32 %v2406_v41, 0.0  ;;  %v3331_v17 = vadd.f32 %v3330_v21, %v2984_v20 }
 0x29c   :  { %v2409_v26 = vpop.f32.mrf.mxu0  ;;  %v8230_v63 = vpop.f32.mrf.mxu1 }
 0x29d   :  { %v2410_v5 = vadd.f32 %v2409_v26, %v7497_v27  ;;  %v3229_v26 = vadd.f32 %v3228_v38, %v3017_v24  ;;  %v3025_v58 = vmax.f32 %v2408_v52, 0.0  ;;  %v3267_v39 = vadd.f32 %v3266_v36, %v3022_v57 }
 0x29e   :  { %v2413_v45 = vpop.f32.mrf.mxu0  ;;  %v8238_v44 = vpop.f32.mrf.mxu1  ;;  %v2988_v24 = vmax.f32 %v2713_v3, 0.0  ;;  %v2721_v3 = vadd.f32 %v8222_v16, %v7645_v1 }
 0x29f   :  { %v2414_v48 = vadd.f32 %v2413_v45, %v7480_v6  ;;  %v3026_v28 = vmax.f32 %v2410_v5, 0.0  ;;  %v2991_v5 = vmax.f32 %v2717_v8, 0.0 }
 0x2a0   :  { %v2415_v31 = vpop.f32.mrf.mxu0  ;;  %v8244_v59 = vpop.f32.mrf.mxu1  ;;  %v3332_v21 = vadd.f32 %v3331_v17, %v2988_v24 }
 0x2a1   :  { %v2416_v7 = vadd.f32 %v2415_v31, %v7497_v27  ;;  %v3230_v31 = vadd.f32 %v3229_v26, %v3021_v18  ;;  %v3029_v29 = vmax.f32 %v2414_v48, 0.0  ;;  %v3268_v41 = vadd.f32 %v3267_v39, %v3026_v28 }
 0x2a2   :  { %v2417_v9 = vpop.f32.mrf.mxu0  ;;  %v8252_v55 = vpop.f32.mrf.mxu1 }
 0x2a3   :  { %v2418_v62 = vadd.f32 %v2417_v9, %v7480_v6  ;;  %v3030_v9 = vmax.f32 %v2416_v7, 0.0  ;;  %v3231_v0 = vadd.f32 %v3230_v31, %v3025_v58  ;;  %v2723_v31 = vadd.f32 %v8230_v63, %v7656_v2 }
 0x2a4   :  { %v2419_v23 = vpop.f32.mrf.mxu0  ;;  %v8260_v49 = vpop.f32.mrf.mxu1  ;;  %v2731_v24 = vadd.f32 %v8252_v55, %v7645_v1 }
 0x2a5   :  { %v2420_v45 = vadd.f32 %v2419_v23, %v7497_v27  ;;  %v2987_v23 = vmax.f32 %v2711_v51, 0.0  ;;  %v3033_v13 = vmax.f32 %v2418_v62, 0.0  ;;  %v3232_v52 = vadd.f32 %v3231_v0, %v3029_v29 }
 0x2a6   :  { %v2423_v25 = vpop.f32.mrf.mxu0  ;;  %v8266_v40 = vpop.f32.mrf.mxu1  ;;  %v2729_v0 = vadd.f32 %v8244_v59, %v7656_v2 }
 0x2a7   :  { %v2424_v33 = vadd.f32 %v2423_v25, %v7480_v6  ;;  %v3034_v25 = vmax.f32 %v2420_v45, 0.0  ;;  %v3233_v42 = vadd.f32 %v3232_v52, %v3033_v13  ;;  %v3295_v7 = vadd.f32 %v3294_v37, %v2987_v23 }
 0x2a8   :  { %v2425_v14 = vpop.f32.mrf.mxu0  ;;  %v8273_v46 = vpop.f32.mrf.mxu1  ;;  %v2727_v23 = vadd.f32 %v8238_v44, %v7645_v1  ;;  %v2733_v44 = vadd.f32 %v8260_v49, %v7656_v2 }
 0x2a9   :  { %v2426_v12 = vadd.f32 %v2425_v14, %v7497_v27  ;;  %v3037_v32 = vmax.f32 %v2424_v33, 0.0  ;;  %v3269_v14 = vadd.f32 %v3268_v41, %v3030_v9 }
 0x2aa   :  { %v2427_v50 = vpop.f32.mrf.mxu0  ;;  %v8279_v35 = vpop.f32.mrf.mxu1 }
 0x2ab   :  { %v2428_v56 = vadd.f32 %v2427_v50, %v7480_v6  ;;  %v3038_v38 = vmax.f32 %v2426_v12, 0.0  ;;  %v2992_v50 = vmax.f32 %v2719_v15, 0.0  ;;  %v3270_v26 = vadd.f32 %v3269_v14, %v3034_v25 }
 0x2ac   :  { %v2429_v19 = vpop.f32.mrf.mxu0  ;;  %v8283_v54 = vpop.f32.mrf.mxu1  ;;  %v3234_v20 = vadd.f32 %v3233_v42, %v3037_v32  ;;  %v2999_v14 = vmax.f32 %v2727_v23, 0.0  ;;  %v2739_v42 = vadd.f32 %v8273_v46, %v7656_v2 }
 0x2ad   :  { %v2430_v47 = vadd.f32 %v2429_v19, %v7497_v27  ;;  %v3041_v30 = vmax.f32 %v2428_v56, 0.0  ;;  %v3296_v19 = vadd.f32 %v3295_v7, %v2991_v5  ;;  %v3271_v29 = vadd.f32 %v3270_v26, %v3038_v38 }
 0x2ae   :  { %v2433_v43 = vpop.f32.mrf.mxu0  ;;  %v8291_v34 = vpop.f32.mrf.mxu1  ;;  %v3000_v38 = vmax.f32 %v2729_v0, 0.0 }
 0x2af   :  { %v2434_v60 = vadd.f32 %v2433_v43, %v7480_v6  ;;  %v3042_v58 = vmax.f32 %v2430_v47, 0.0  ;;  %v3235_v8 = vadd.f32 %v3234_v20, %v3041_v30  ;;  %v3333_v43 = vadd.f32 %v3332_v21, %v2992_v50 }
 0x2b0   :  { %v2435_v61 = vpop.f32.mrf.mxu0  ;;  %v8297_v10 = vpop.f32.mrf.mxu1  ;;  %v2995_v47 = vmax.f32 %v2721_v3, 0.0  ;;  %v3004_v21 = vmax.f32 %v2733_v44, 0.0  ;;  %v2743_v3 = vadd.f32 %v8283_v54, %v7656_v2  ;;  %v8955_v54 = vrot.slane %v8105_v22, 1 }
 0x2b1   :  { %v2436_v51 = vadd.f32 %v2435_v61, %v7497_v27  ;;  %v3045_v28 = vmax.f32 %v2434_v60, 0.0  ;;  %v3272_v16 = vadd.f32 %v3271_v29, %v3042_v58  ;;  %v2996_v61 = vmax.f32 %v2723_v31, 0.0 }
 0x2b2   :  { %v2437_v18 = vpop.f32.mrf.mxu0  ;;  %v8300_v48 = vpop.f32.mrf.mxu1  ;;  %v3297_v50 = vadd.f32 %v3296_v19, %v2995_v47  ;;  %v3003_v58 = vmax.f32 %v2731_v24, 0.0  ;;  %v2747_v31 = vadd.f32 %v8291_v34, %v7645_v1  ;;  %v3008_v29 = vmax.f32 %v2739_v42, 0.0 }
 0x2b3   :  { %v2438_v57 = vadd.f32 %v2437_v18, %v7480_v6  ;;  %v3046_v39 = vmax.f32 %v2436_v51, 0.0  ;;  %v3236_v63 = vadd.f32 %v3235_v8, %v3045_v28  ;;  %v2737_v18 = vadd.f32 %v8266_v40, %v7645_v1 }
 0x2b4   :  { %v2439_v62 = vpop.f32.mrf.mxu0  ;;  %v8304_v36 = vpop.f32.mrf.mxu1  ;;  %v3334_v26 = vadd.f32 %v3333_v43, %v2996_v61  ;;  %v3097_v23 = vadd.f32 %v8955_v54, %v8105_v22 }
 0x2b5   :  { %v2440_v45 = vadd.f32 %v2439_v62, %v7497_v27  ;;  %v3049_v9 = vmax.f32 %v2438_v57, 0.0  ;;  %v3273_v59 = vadd.f32 %v3272_v16, %v3046_v39  ;;  %v3007_v46 = vmax.f32 %v2737_v18, 0.0 }
 0x2b6   :  { %v2443_v37 = vpop.f32.mrf.mxu0  ;;  %v8311_v33 = vpop.f32.mrf.mxu1  ;;  %v3335_v19 = vadd.f32 %v3334_v26, %v3000_v38 }
 0x2b7   :  { %v2444_v12 = vadd.f32 %v2443_v37, %v7480_v6  ;;  %v3050_v15 = vmax.f32 %v2440_v45, 0.0  ;;  %v3237_v60 = vadd.f32 %v3236_v63, %v3049_v9  ;;  %v3298_v45 = vadd.f32 %v3297_v50, %v2999_v14 }
 0x2b8   :  { %v2445_v13 = vpop.f32.mrf.mxu0  ;;  %v8318_v56 = vpop.f32.mrf.mxu1  ;;  %v2749_v9 = vadd.f32 %v8297_v10, %v7656_v2  ;;  %v3336_v0 = vadd.f32 %v3335_v19, %v3004_v21  ;;  %v3012_v63 = vmax.f32 %v2743_v3, 0.0  ;;  %v2757_v10 = vadd.f32 %v8311_v33, %v7645_v1 }
 0x2b9   :  { %v3053_v41 = vmax.f32 %v2444_v12, 0.0  ;;  %v2446_v25 = vadd.f32 %v2445_v13, %v7497_v27  ;;  %v3274_v51 = vadd.f32 %v3273_v59, %v3050_v15  ;;  %v3299_v39 = vadd.f32 %v3298_v45, %v3003_v58 }
 0x2ba   :  { %v2447_v52 = vpop.f32.mrf.mxu0  ;;  %v2760_v32 = vpop.f32.mrf.mxu1  ;;  %v2751_v12 = vadd.f32 %v8300_v48, %v7645_v1  ;;  %v3015_v15 = vmax.f32 %v2747_v31, 0.0  ;;  %v3337_v47 = vadd.f32 %v3336_v0, %v3008_v29  ;;  %v3016_v44 = vmax.f32 %v2749_v9, 0.0 }
 0x2bb   :  { %v3054_v17 = vmax.f32 %v2446_v25, 0.0  ;;  %v2448_v5 = vadd.f32 %v2447_v52, %v7480_v6  ;;  %v3238_v57 = vadd.f32 %v3237_v60, %v3053_v41  ;;  %v2741_v6 = vadd.f32 %v8279_v35, %v7645_v1 }
 0x2bc   :  { %v2449_v30 = vpop.f32.mrf.mxu0  ;;  %v2762_v55 = vpop.f32.mrf.mxu1  ;;  %v3300_v13 = vadd.f32 %v3299_v39, %v3007_v46  ;;  %v2753_v41 = vadd.f32 %v8304_v36, %v7656_v2  ;;  %v3019_v52 = vmax.f32 %v2751_v12, 0.0  ;;  %v2759_v22 = vadd.f32 %v8318_v56, %v7656_v2 }
 0x2bd   :  { %v3057_v49 = vmax.f32 %v2448_v5, 0.0  ;;  %v2450_v7 = vadd.f32 %v2449_v30, %v7497_v27  ;;  %v3275_v20 = vadd.f32 %v3274_v51, %v3054_v17  ;;  %v3011_v35 = vmax.f32 %v2741_v6, 0.0 }
 0x2be   :  { %v2766_v62 = vpop.f32.mrf.mxu1  ;;  %v3133_v60 = vrot.slane %v8128_v11, 1  ;;  %v2761_v5 = vadd.f32 %v2760_v32, %v7645_v1  ;;  %v3338_v14 = vadd.f32 %v3337_v47, %v3012_v63  ;;  %v3020_v18 = vmax.f32 %v2753_v41, 0.0 }
 0x2bf   :  { %v3239_v40 = vadd.f32 %v3238_v57, %v3057_v49  ;;  %v3058_v28 = vmax.f32 %v2450_v7, 0.0  ;;  %v3301_v24 = vadd.f32 %v3300_v13, %v3011_v35  ;;  %v2763_v33 = vadd.f32 %v2762_v55, %v7656_v2 }
 0x2c0   :  { %v2768_v27 = vpop.f32.mrf.mxu1  ;;  %v3023_v30 = vmax.f32 %v2757_v10, 0.0  ;;  %v2767_v49 = vadd.f32 %v2766_v62, %v7645_v1  ;;  %v3339_v7 = vadd.f32 %v3338_v14, %v3016_v44  ;;  %v3024_v50 = vmax.f32 %v2759_v22, 0.0  ;;  %v6249_v14 = vld [vmem:[%s8940_s3 + $0x398] ss:$12 sps:$4 sm:$0xff]  }
 0x2c1   :  { %v3240_v37 = vrot.slane %v3239_v40, 4  ;;  %v3276_v8 = vadd.f32 %v3275_v20, %v3058_v28  ;;  %v3302_v38 = vadd.f32 %v3301_v24, %v3015_v15  ;;  %v2769_v26 = vadd.f32 %v2768_v27, %v7656_v2  ;;  %v6247_v15 = vld [vmem:[%s8940_s3 + $0x3b0] ss:$12 sps:$4 sm:$0xff]  }
 0x2c2   :  { %v2770_v43 = vpop.f32.mrf.mxu1  ;;  %v3027_v32 = vmax.f32 %v2761_v5, 0.0  ;;  %v3028_v28 = vmax.f32 %v2763_v33, 0.0  ;;  %v3134_v46 = vadd.f32 %v3133_v60, %v8128_v11  ;;  %v3031_v31 = vmax.f32 %v2767_v49, 0.0 }
 0x2c3   :  { %v3241_v34 = vadd.f32 %v3240_v37, %v3239_v40  ;;  %v3277_v16 = vrot.slane %v3276_v8, 4  ;;  %v3303_v56 = vadd.f32 %v3302_v38, %v3019_v52  ;;  %v2771_v20 = vadd.f32 %v2770_v43, %v7645_v1 }
 0x2c4   :  { %v2772_v25 = vpop.f32.mrf.mxu1  ;;  %v3340_v40 = vadd.f32 %v3339_v7, %v3020_v18  ;;  %v3032_v29 = vmax.f32 %v2769_v26, 0.0  ;;  %v3166_v38 = vrot.slane %v7982_v4, 4  ;;  %v3203_v7 = vrot.slane %v7990_v53, 4 }
 0x2c5   :  { %v3242_v48 = vrot.slane %v3241_v34, 2  ;;  %v3278_v61 = vadd.f32 %v3277_v16, %v3276_v8  ;;  %v2773_v55 = vadd.f32 %v2772_v25, %v7656_v2  ;;  %v3304_v3 = vadd.f32 %v3303_v56, %v3023_v30 }
 0x2c6   :  { %v2776_v59 = vpop.f32.mrf.mxu1  ;;  %v3341_v27 = vadd.f32 %v3340_v40, %v3024_v50  ;;  %v3035_v9 = vmax.f32 %v2771_v20, 0.0  ;;  %v3167_v20 = vadd.f32 %v3166_v38, %v7982_v4  ;;  %v6268_v38 = vld [vmem:[%s8940_s3 + $0xac] ss:$12 sps:$4 sm:$0xff]  }
 0x2c7   :  { %v3243_v17 = vadd.f32 %v3242_v48, %v3241_v34  ;;  %v3279_v36 = vrot.slane %v3278_v61, 2  ;;  %v2777_v19 = vadd.f32 %v2776_v59, %v7645_v1  ;;  %v3305_v35 = vadd.f32 %v3304_v3, %v3027_v32  ;;  %v6248_v48 = vld [vmem:[%s8940_s3 + $0x458] ss:$12 sps:$4 sm:$0xff]  }
 0x2c8   :  { %v2778_v42 = vpop.f32.mrf.mxu1  ;;  %v3342_v43 = vadd.f32 %v3341_v27, %v3028_v28  ;;  %v3036_v54 = vmax.f32 %v2773_v55, 0.0  ;;  %v6252_v28 = vld [vmem:[%s8940_s3 + $0x428] ss:$12 sps:$4 sm:$0xff]  }
 0x2c9   :  { %v3244_v51 = vrot.slane %v3243_v17, 1  ;;  %v3280_v57 = vadd.f32 %v3279_v36, %v3278_v61  ;;  %v2779_v37 = vadd.f32 %v2778_v42, %v7656_v2  ;;  %v3306_v34 = vadd.f32 %v3305_v35, %v3031_v31  ;;  %v6250_v42 = vld [vmem:[%s8940_s3 + $0x440] ss:$12 sps:$4 sm:$0xff]  }
 0x2ca   :  { %v2780_v58 = vpop.f32.mrf.mxu1  ;;  %v3039_v16 = vmax.f32 %v2777_v19, 0.0  ;;  %v3343_v25 = vadd.f32 %v3342_v43, %v3032_v29 }
 0x2cb   :  { %v3245_v6 = vadd.f32 %v3244_v51, %v3243_v17  ;;  %v3281_v21 = vrot.slane %v3280_v57, 1  ;;  %v2781_v12 = vadd.f32 %v2780_v58, %v7645_v1  ;;  %v3040_v47 = vmax.f32 %v2779_v37, 0.0  ;;  %v6253_v37 = vld [vmem:[%s8940_s3 + $0x368] ss:$12 sps:$4 sm:$0xff]  }
 0x2cc   :  { %v2782_v45 = vpop.f32.mrf.mxu1  ;;  %v3307_v61 = vadd.f32 %v3306_v34, %v3035_v9  ;;  %v3344_v22 = vadd.f32 %v3343_v25, %v3036_v54  ;;  %v6259_v54 = vld [vmem:[%s8940_s3 + $0x3f8] ss:$12 sps:$4 sm:$0xff]  }
 0x2cd   :  { %v3357_v62 = vsel %vm1689_vm3, %v3097_v23, %v3245_v6  ;;  %v3282_v39 = vadd.f32 %v3281_v21, %v3280_v57  ;;  %v2783_v11 = vadd.f32 %v2782_v45, %v7656_v2  ;;  %v3043_v24 = vmax.f32 %v2781_v12, 0.0  ;;  %v6251_v21 = vld [vmem:[%s8940_s3 + $0x380] ss:$12 sps:$4 sm:$0xff]  }
 0x2ce   :  { %v2786_v8 = vpop.f32.mrf.mxu1  ;;  %v8368_v41 = vpack.c.bf16 %v3357_v62, %v3357_v62  ;;  %v3308_v17 = vadd.f32 %v3307_v61, %v3039_v16  ;;  %v3345_v18 = vadd.f32 %v3344_v22, %v3040_v47  ;;  %v3204_v62 = vadd.f32 %v3203_v7, %v7990_v53 }
 0x2cf   :  { %v3358_v23 = vsel %vm1689_vm3, %v3134_v46, %v3282_v39  ;;  %v2787_v13 = vadd.f32 %v2786_v8, %v7645_v1  ;;  %v3044_v59 = vmax.f32 %v2783_v11, 0.0  ;;  %v6254_v8 = vld [vmem:[%s8940_s3 + $0x410] ss:$12 sps:$4 sm:$0xff]   ;;  %v3168_v39 = vrot.slane %v3167_v20, 2 }
 0x2d0   :  { %v2788_v0 = vpop.f32.mrf.mxu1  ;;  %v3362_v63 = vpack.c.bf16 %v3358_v23, %v3358_v23  ;;  %v3309_v30 = vadd.f32 %v3308_v17, %v3043_v24  ;;  %v3205_v9 = vrot.slane %v3204_v62, 2 }
 0x2d1   :  { %v2789_v44 = vadd.f32 %v2788_v0, %v7656_v2  ;;  %v3047_v5 = vmax.f32 %v2787_v13, 0.0  ;;  %v3346_v56 = vadd.f32 %v3345_v18, %v3044_v59  ;;  %v3169_v11 = vadd.f32 %v3168_v39, %v3167_v20  ;;  %v6283_v20 = vld [vmem:[%s8940_s3 + $0x64] ss:$12 sps:$4 sm:$0xff]   ;;  %v6300_v39 = vld [vmem:[%s8940_s3 + $0x548] ss:$12 sps:$4 sm:$0xff]  }
 0x2d2   :  { %v2790_v10 = vpop.f32.mrf.mxu1  ;;  %4165 = vmatprep.mubr.bf16.mxu0 %v3362_v63  ;;  %v3206_v34 = vadd.f32 %v3205_v9, %v3204_v62  ;;  %v6290_v62 = vld [vmem:[%s8940_s3 + $0x578] ss:$12 sps:$4 sm:$0xff]  }
 0x2d3   :  { %v2791_v52 = vadd.f32 %v2790_v10, %v7645_v1  ;;  %4166 = vmatmul.mubr.bf16.vlgmr.msra.gmra.mxu0 %v8368_v41  ;;  %v3048_v51 = vmax.f32 %v2789_v44, 0.0  ;;  %v3310_v26 = vadd.f32 %v3309_v30, %v3047_v5  ;;  %v3170_v25 = vrot.slane %v3169_v11, 1  ;;  %v6262_v44 = vld [vmem:[%s8940_s3 + $0x320] ss:$12 sps:$4 sm:$0xff]   ;;  %v6264_v5 = vld [vmem:[%s8940_s3 + $0x308] ss:$12 sps:$4 sm:$0xff]  }
 0x2d4   :  { %v2792_v60 = vpop.f32.mrf.mxu1  ;;  %5948 = vmatpush3.bf16.msra.mxu0 %v6247_v15  ;;  %4247 = vmatprep.mubr.bf16.mxu0 %v3362_v63  ;;  %v6260_v63 = vld [vmem:[%s8940_s3 + $0x338] ss:$12 sps:$4 sm:$0xff]   ;;  %v6261_v15 = vld [vmem:[%s8940_s3 + $0x3e0] ss:$12 sps:$4 sm:$0xff]  }
 0x2d5   :  { %v2793_v36 = vadd.f32 %v2792_v60, %v7656_v2  ;;  %5949 = vmatprep.subr.bf16.mxu0 %v6248_v48  ;;  %v3051_v57 = vmax.f32 %v2791_v52, 0.0  ;;  %v3347_v55 = vadd.f32 %v3346_v56, %v3048_v51  ;;  %v3207_v48 = vrot.slane %v3206_v34, 1  ;;  %v6263_v52 = vld [vmem:[%s8940_s3 + $0x3c8] ss:$12 sps:$4 sm:$0xff]   ;;  %v6310_v9 = vld [vmem:[%s8940_s3 + $0x22c] ss:$12 sps:$4 sm:$0xff]  }
 0x2d6   :  { %v2796_v33 = vpop.f32.mrf.mxu1  ;;  %v3171_v22 = vadd.f32 %v3170_v25, %v3169_v11  ;;  %v6266_v51 = vld [vmem:[%s8940_s3 + $0xa8] ss:$12 sps:$4 sm:$0xff]   ;;  %v6317_v25 = vld [vmem:[%s8940_s3 + $0x138] ss:$12 sps:$4 sm:$0xff]  }
 0x2d7   :  { %v2797_v49 = vadd.f32 %v2796_v33, %v7645_v1  ;;  %v3052_v58 = vmax.f32 %v2793_v36, 0.0  ;;  %v3311_v45 = vadd.f32 %v3310_v26, %v3051_v57  ;;  %v3208_v36 = vadd.f32 %v3207_v48, %v3206_v34  ;;  %v6270_v57 = vld [vmem:[%s8940_s3 + $0x5d8] ss:$12 sps:$4 sm:$0xff]   ;;  %v6273_v56 = vld [vmem:[%s8940_s3 + $0x94] ss:$12 sps:$4 sm:$0xff]  }
 0x2d8   :  { %v2798_v50 = vpop.f32.mrf.mxu1  ;;  %5950 = vmatpush3.bf16.msra.mxu0 %v6249_v14  ;;  %v6271_v26 = vld [vmem:[%s8940_s3 + $0x90] ss:$12 sps:$4 sm:$0xff]   ;;  %v6326_v48 = vld [vmem:[%s8940_s3 + $0x1e0] ss:$12 sps:$4 sm:$0xff]  }
 0x2d9   :  { %v3055_v6 = vmax.f32 %v2797_v49, 0.0  ;;  %v2799_v32 = vadd.f32 %v2798_v50, %v7656_v2  ;;  %5951 = vmatprep.subr.bf16.mxu0 %v6250_v42  ;;  %v3348_v19 = vadd.f32 %v3347_v55, %v3052_v58  ;;  %v6269_v42 = vld [vmem:[%s8940_s3 + $0x530] ss:$12 sps:$4 sm:$0xff]   ;;  %v6274_v50 = vld [vmem:[%s8940_s3 + $0x518] ss:$12 sps:$4 sm:$0xff]  }
 0x2da   :  { %v2800_v40 = vpop.f32.mrf.mxu1  ;;  %v8956_v49 = vld [vmem:[#allocation8_spill] sm:$0xff]  ;;  %v8957_v11 = vld [vmem:[#allocation11_spill] sm:$0xff] }
 0x2db   :  { %v3056_v46 = vmax.f32 %v2799_v32, 0.0  ;;  %v2801_v3 = vadd.f32 %v2800_v40, %v7645_v1  ;;  %v3312_v27 = vadd.f32 %v3311_v45, %v3055_v6  ;;  %v8443_v7 = vpack.c.bf16 %v8956_v49, %v8956_v49  ;;  %v6275_v58 = vld [vmem:[%s8940_s3 + $0x5c0] ss:$12 sps:$4 sm:$0xff]   ;;  %v6276_v32 = vld [vmem:[%s8940_s3 + $0x78] ss:$12 sps:$4 sm:$0xff]  }
 0x2dc   :  { %v2802_v31 = vpop.f32.mrf.mxu1  ;;  %5952 = vmatpush3.bf16.msra.mxu0 %v6251_v21  ;;  %v6279_v6 = vld [vmem:[%s8940_s3 + $0x500] ss:$12 sps:$4 sm:$0xff]   ;;  %v6280_v21 = vld [vmem:[%s8940_s3 + $0x5a8] ss:$12 sps:$4 sm:$0xff]   ;;  %v6285_v55 = vld [vmem:[%s8940_s3 + $0x590] ss:$12 sps:$4 sm:$0xff]  }
 0x2dd   :  { %v3059_v29 = vmax.f32 %v2801_v3, 0.0  ;;  %v2803_v4 = vadd.f32 %v2802_v31, %v7656_v2  ;;  %5953 = vmatprep.subr.bf16.mxu0 %v6252_v28  ;;  %v3349_v1 = vadd.f32 %v3348_v19, %v3056_v46  ;;  %v6258_v2 = vld [vmem:[%s8940_s3 + $0x350] ss:$12 sps:$4 sm:$0xff]   ;;  %v6284_v40 = vld [vmem:[%s8940_s3 + $0x4e8] ss:$12 sps:$4 sm:$0xff]  }
 0x2de   :  { %v6281_v28 = vld [vmem:[%s8940_s3 + $0x60] ss:$12 sps:$4 sm:$0xff]   ;;  %v6289_v46 = vld [vmem:[%s8940_s3 + $0x4d0] ss:$12 sps:$4 sm:$0xff]   ;;  %v6286_v3 = vld [vmem:[%s8940_s3 + $0x48] ss:$12 sps:$4 sm:$0xff]  }
 0x2df   :  { %v3313_v35 = vadd.f32 %v3312_v27, %v3059_v29  ;;  %v3060_v53 = vmax.f32 %v2803_v4, 0.0  ;;  %v6288_v45 = vld [vmem:[%s8940_s3 + $0x4c] ss:$12 sps:$4 sm:$0xff]   ;;  %v6293_v31 = vld [vmem:[%s8940_s3 + $0x34] ss:$12 sps:$4 sm:$0xff]  }
 0x2e0   :  { %5954 = vmatpush3.bf16.msra.mxu0 %v6253_v37  ;;  %v6294_v19 = vld [vmem:[%s8940_s3 + $0x4b8] ss:$12 sps:$4 sm:$0xff]   ;;  %v6291_v27 = vld [vmem:[%s8940_s3 + $0x30] ss:$12 sps:$4 sm:$0xff]   ;;  %v6295_v29 = vld [vmem:[%s8940_s3 + $0x560] ss:$12 sps:$4 sm:$0xff]  }
 0x2e1   :  { %v3314_v12 = vrot.slane %v3313_v35, 4  ;;  %v3350_v43 = vadd.f32 %v3349_v1, %v3060_v53  ;;  %5955 = vmatprep.subr.bf16.mxu0 %v6254_v8  ;;  %v6298_v4 = vld [vmem:[%s8940_s3 + $0x1c] ss:$12 sps:$4 sm:$0xff]   ;;  %v6299_v37 = vld [vmem:[%s8940_s3 + $0x4a0] ss:$12 sps:$4 sm:$0xff]  }
 0x2e2   :  { %v6296_v8 = vld [vmem:[%s8940_s3 + $0x18] ss:$12 sps:$4 sm:$0xff]   ;;  %v6301_v53 = vld [vmem:[%s8940_s3] ss:$12 sps:$4 sm:$0xff]   ;;  %v6314_v34 = vld [vmem:[%s8940_s3 + $0x210] ss:$12 sps:$4 sm:$0xff]  }
 0x2e3   :  { %v3315_v0 = vadd.f32 %v3314_v12, %v3313_v35  ;;  %v3351_v23 = vrot.slane %v3350_v43, 4  ;;  %v6303_v1 = vld [vmem:[%s8940_s3 + $0x4] ss:$12 sps:$4 sm:$0xff]   ;;  %v6304_v35 = vld [vmem:[%s8940_s3 + $0x488] ss:$12 sps:$4 sm:$0xff]  }
 0x2e4   :  { %5956 = vmatpush3.bf16.msra.mxu0 %v6258_v2  ;;  %v6307_v12 = vld [vmem:[%s8940_s3 + $0x16c] ss:$12 sps:$4 sm:$0xff]   ;;  %v6305_v2 = vld [vmem:[%s8940_s3 + $0x168] ss:$12 sps:$4 sm:$0xff]   ;;  %v6356_v49 = vld [vmem:[%s8940_s3 + $0x170] ss:$12 sps:$4 sm:$0xff]  }
 0x2e5   :  { %v3316_v16 = vrot.slane %v3315_v0, 2  ;;  %v3352_v13 = vadd.f32 %v3351_v23, %v3350_v43  ;;  %5957 = vmatprep.subr.bf16.mxu0 %v6259_v54  ;;  %v6308_v43 = vld [vmem:[%s8940_s3 + $0x228] ss:$12 sps:$4 sm:$0xff]  }
 0x2e6   :  { %v6316_v54 = vld [vmem:[%s8940_s3 + $0x214] ss:$12 sps:$4 sm:$0xff]  }
 0x2e7   :  { %v3317_v47 = vadd.f32 %v3316_v16, %v3315_v0  ;;  %v3353_v10 = vrot.slane %v3352_v13, 2  ;;  %v8545_v0 = vpack.c.bf16 %v8957_v11, %v8957_v11  ;;  %v6313_v23 = vld [vmem:[%s8940_s3 + $0x154] ss:$12 sps:$4 sm:$0xff]   ;;  %v6311_v16 = vld [vmem:[%s8940_s3 + $0x150] ss:$12 sps:$4 sm:$0xff]  }
 0x2e8   :  { %5958 = vmatpush3.bf16.msra.mxu0 %v6260_v63  ;;  %v6319_v63 = vld [vmem:[%s8940_s3 + $0x13c] ss:$12 sps:$4 sm:$0xff]  }
 0x2e9   :  { %v3318_v61 = vrot.slane %v3317_v47, 1  ;;  %v3354_v24 = vadd.f32 %v3353_v10, %v3352_v13  ;;  %5959 = vmatprep.subr.bf16.mxu0 %v6261_v15  ;;  %v6322_v13 = vld [vmem:[%s8940_s3 + $0x1fc] ss:$12 sps:$4 sm:$0xff]   ;;  %v6320_v15 = vld [vmem:[%s8940_s3 + $0x1f8] ss:$12 sps:$4 sm:$0xff]  }
 0x2ea   :  { %v6325_v10 = vld [vmem:[%s8940_s3 + $0x124] ss:$12 sps:$4 sm:$0xff]  }
 0x2eb   :  { %v3319_v59 = vadd.f32 %v3318_v61, %v3317_v47  ;;  %v3355_v60 = vrot.slane %v3354_v24, 1  ;;  %v6328_v47 = vld [vmem:[%s8940_s3 + $0x1e4] ss:$12 sps:$4 sm:$0xff]   ;;  %v6323_v61 = vld [vmem:[%s8940_s3 + $0x120] ss:$12 sps:$4 sm:$0xff]  }
 0x2ec   :  { %5960 = vmatpush3.bf16.msra.mxu0 %v6262_v44  ;;  %v6331_v44 = vld [vmem:[%s8940_s3 + $0x10c] ss:$12 sps:$4 sm:$0xff]   ;;  %v6394_v11 = vld [vmem:[%s8940_s3 + $0x230] ss:$12 sps:$4 sm:$0xff]  }
 0x2ed   :  { %v3359_v17 = vsel %vm1689_vm3, %v3171_v22, %v3319_v59  ;;  %v3356_v14 = vadd.f32 %v3355_v60, %v3354_v24  ;;  %5961 = vmatprep.subr.bf16.mxu0 %v6263_v52  ;;  %v6334_v24 = vld [vmem:[%s8940_s3 + $0x1cc] ss:$12 sps:$4 sm:$0xff]   ;;  %v6332_v52 = vld [vmem:[%s8940_s3 + $0x1c8] ss:$12 sps:$4 sm:$0xff]  }
 0x2ee   :  { %v8432_v30 = vpack.c.bf16 %v3359_v17, %v3359_v17  ;;  %v6329_v22 = vld [vmem:[%s8940_s3 + $0x108] ss:$12 sps:$4 sm:$0xff]   ;;  %v6338_v17 = vld [vmem:[%s8940_s3 + $0x1b0] ss:$12 sps:$4 sm:$0xff]  }
 0x2ef   :  { %v3360_v18 = vsel %vm1689_vm3, %v3208_v36, %v3356_v14  ;;  %v6340_v59 = vld [vmem:[%s8940_s3 + $0x1b4] ss:$12 sps:$4 sm:$0xff]   ;;  %v6346_v36 = vld [vmem:[%s8940_s3 + $0x19c] ss:$12 sps:$4 sm:$0xff]  }
 0x2f0   :  { %v3364_v33 = vpack.c.bf16 %v3360_v18, %v3360_v18  ;;  %5962 = vmatpush3.bf16.msra.mxu0 %v6264_v5  ;;  %v6337_v60 = vld [vmem:[%s8940_s3 + $0xf4] ss:$12 sps:$4 sm:$0xff]   ;;  %v6335_v5 = vld [vmem:[%s8940_s3 + $0xf0] ss:$12 sps:$4 sm:$0xff]   ;;  %v6341_v18 = vld [vmem:[%s8940_s3 + $0xd8] ss:$12 sps:$4 sm:$0xff]  }
 0x2f1   :  { %4807 = vmatprep.subr.bf16.mxu0 %v6268_v38  ;;  %v6343_v14 = vld [vmem:[%s8940_s3 + $0xdc] ss:$12 sps:$4 sm:$0xff]   ;;  %v6344_v38 = vld [vmem:[%s8940_s3 + $0x198] ss:$12 sps:$4 sm:$0xff]  }
 0x2f2   :  { %4206 = vmatprep.mubr.bf16.mxu1 %v3364_v33 }
 0x2f3   :  { %4207 = vmatmul.mubr.bf16.vlgmr.msra.gmra.mxu1 %v8432_v30  ;;  %4248 = vmatmul.mubr.bf16.vlgmr.msra.gmra.mxu0 %v8368_v41  ;;  %v6278_v41 = vld [vmem:[%s8940_s3 + $0x7c] ss:$12 sps:$4 sm:$0xff]  }
 0x2f4   :  { %5970 = vmatpush3.bf16.msra.mxu1 %v6269_v42  ;;  %4808 = vmatpush1.bf16.msra.mxu0 %v6266_v51  ;;  %v6349_v42 = vld [vmem:[%s8940_s3 + $0xc4] ss:$12 sps:$4 sm:$0xff]   ;;  %v6347_v51 = vld [vmem:[%s8940_s3 + $0xc0] ss:$12 sps:$4 sm:$0xff]  }
 0x2f5   :  { %4839 = vmatprep.mubr.bf16.mxu0 %v8443_v7  ;;  %4287 = vmatprep.mubr.bf16.mxu1 %v3364_v33  ;;  %v6352_v33 = vld [vmem:[%s8940_s3 + $0x184] ss:$12 sps:$4 sm:$0xff]  }
 0x2f6   :  { %5971 = vmatprep.subr.bf16.mxu1 %v6270_v57  ;;  %4809 = vmatprep.subr.bf16.mxu0 %v6273_v56  ;;  %v6355_v57 = vld [vmem:[%s8940_s3 + $0x2ec] ss:$12 sps:$4 sm:$0xff]   ;;  %v6353_v56 = vld [vmem:[%s8940_s3 + $0x2e8] ss:$12 sps:$4 sm:$0xff]  }
 0x2f8   :  { %5972 = vmatpush3.bf16.msra.mxu1 %v6274_v50  ;;  %4810 = vmatpush1.bf16.msra.mxu0 %v6271_v26  ;;  %v6357_v50 = vld [vmem:[%s8940_s3 + $0xb0] ss:$12 sps:$4 sm:$0xff]   ;;  %v8958_v26 = vld [vmem:[#allocation9_spill] sm:$0xff] }
 0x2f9   :  { %5973 = vmatprep.subr.bf16.mxu1 %v6275_v58  ;;  %4811 = vmatprep.subr.bf16.mxu0 %v6278_v41  ;;  %v8644_v58 = vpack.c.bf16 %v8958_v26, %v8958_v26  ;;  %v6360_v41 = vld [vmem:[%s8940_s3 + $0x2d4] ss:$12 sps:$4 sm:$0xff]  }
 0x2fa   :  { %v6435_v26 = vld [vmem:[%s8942_s5 + $0xf4] ss:$8 sps:$4 sm:$0xff]  }
 0x2fc   :  { %5974 = vmatpush3.bf16.msra.mxu1 %v6279_v6  ;;  %4812 = vmatpush1.bf16.msra.mxu0 %v6276_v32  ;;  %v6361_v6 = vld [vmem:[%s8940_s3 + $0x158] ss:$12 sps:$4 sm:$0xff]   ;;  %v6358_v32 = vld [vmem:[%s8940_s3 + $0x2d0] ss:$12 sps:$4 sm:$0xff]  }
 0x2fd   :  { %5975 = vmatprep.subr.bf16.mxu1 %v6280_v21  ;;  %4813 = vmatprep.subr.bf16.mxu0 %v6283_v20  ;;  %v6362_v21 = vld [vmem:[%s8940_s3 + $0x98] ss:$12 sps:$4 sm:$0xff]   ;;  %v6365_v20 = vld [vmem:[%s8940_s3 + $0x2bc] ss:$12 sps:$4 sm:$0xff]  }
 0x300   :  { %5976 = vmatpush3.bf16.msra.mxu1 %v6284_v40  ;;  %4814 = vmatpush1.bf16.msra.mxu0 %v6281_v28  ;;  %v6366_v40 = vld [vmem:[%s8940_s3 + $0x140] ss:$12 sps:$4 sm:$0xff]   ;;  %v6363_v28 = vld [vmem:[%s8940_s3 + $0x2b8] ss:$12 sps:$4 sm:$0xff]  }
 0x301   :  { %5977 = vmatprep.subr.bf16.mxu1 %v6285_v55  ;;  %4815 = vmatprep.subr.bf16.mxu0 %v6288_v45  ;;  %v6370_v55 = vld [vmem:[%s8940_s3 + $0x2a4] ss:$12 sps:$4 sm:$0xff]   ;;  %v6371_v45 = vld [vmem:[%s8940_s3 + $0x128] ss:$12 sps:$4 sm:$0xff]  }
 0x304   :  { %5978 = vmatpush3.bf16.msra.mxu1 %v6289_v46  ;;  %4816 = vmatpush1.bf16.msra.mxu0 %v6286_v3  ;;  %v6368_v46 = vld [vmem:[%s8940_s3 + $0x2a0] ss:$12 sps:$4 sm:$0xff]   ;;  %v6372_v3 = vld [vmem:[%s8940_s3 + $0x68] ss:$12 sps:$4 sm:$0xff]  }
 0x305   :  { %5979 = vmatprep.subr.bf16.mxu1 %v6290_v62  ;;  %4817 = vmatprep.subr.bf16.mxu0 %v6293_v31  ;;  %v6375_v62 = vld [vmem:[%s8940_s3 + $0x28c] ss:$12 sps:$4 sm:$0xff]   ;;  %v6376_v31 = vld [vmem:[%s8940_s3 + $0x110] ss:$12 sps:$4 sm:$0xff]  }
 0x308   :  { %5980 = vmatpush3.bf16.msra.mxu1 %v6294_v19  ;;  %4818 = vmatpush1.bf16.msra.mxu0 %v6291_v27  ;;  %v6373_v19 = vld [vmem:[%s8940_s3 + $0x288] ss:$12 sps:$4 sm:$0xff]   ;;  %v6377_v27 = vld [vmem:[%s8940_s3 + $0x50] ss:$12 sps:$4 sm:$0xff]  }
 0x309   :  { %5981 = vmatprep.subr.bf16.mxu1 %v6295_v29  ;;  %4819 = vmatprep.subr.bf16.mxu0 %v6298_v4  ;;  %v6380_v29 = vld [vmem:[%s8940_s3 + $0x274] ss:$12 sps:$4 sm:$0xff]   ;;  %v6381_v4 = vld [vmem:[%s8940_s3 + $0xf8] ss:$12 sps:$4 sm:$0xff]  }
 0x30c   :  { %5982 = vmatpush3.bf16.msra.mxu1 %v6299_v37  ;;  %4820 = vmatpush1.bf16.msra.mxu0 %v6296_v8  ;;  %v6378_v37 = vld [vmem:[%s8940_s3 + $0x270] ss:$12 sps:$4 sm:$0xff]   ;;  %v6382_v8 = vld [vmem:[%s8940_s3 + $0x38] ss:$12 sps:$4 sm:$0xff]  }
 0x30d   :  { %5983 = vmatprep.subr.bf16.mxu1 %v6300_v39  ;;  %4821 = vmatprep.subr.bf16.mxu0 %v6303_v1  ;;  %v6385_v39 = vld [vmem:[%s8940_s3 + $0x25c] ss:$12 sps:$4 sm:$0xff]   ;;  %v6386_v1 = vld [vmem:[%s8940_s3 + $0xe0] ss:$12 sps:$4 sm:$0xff]  }
 0x310   :  { %5984 = vmatpush3.bf16.msra.mxu1 %v6304_v35  ;;  %4822 = vmatpush1.bf16.msra.mxu0 %v6301_v53  ;;  %v6383_v35 = vld [vmem:[%s8940_s3 + $0x258] ss:$12 sps:$4 sm:$0xff]   ;;  %v6387_v53 = vld [vmem:[%s8940_s3 + $0x20] ss:$12 sps:$4 sm:$0xff]  }
 0x311   :  { %4848 = vmatprep.subr.bf16.mxu1 %v6310_v9  ;;  %4823 = vmatprep.subr.bf16.mxu0 %v6307_v12  ;;  %v6390_v9 = vld [vmem:[%s8940_s3 + $0x244] ss:$12 sps:$4 sm:$0xff]   ;;  %v6391_v12 = vld [vmem:[%s8940_s3 + $0xc8] ss:$12 sps:$4 sm:$0xff]  }
 0x313   :  { %4288 = vmatmul.mubr.bf16.vlgmr.msra.gmra.mxu1 %v8432_v30  ;;  %v6350_v30 = vld [vmem:[%s8940_s3 + $0x180] ss:$12 sps:$4 sm:$0xff]  }
 0x314   :  { %4849 = vmatpush1.bf16.msra.mxu1 %v6308_v43  ;;  %4880 = vmatprep.mubr.bf16.mxu1 %v8545_v0  ;;  %v6388_v43 = vld [vmem:[%s8940_s3 + $0x240] ss:$12 sps:$4 sm:$0xff]  }
 0x315   :  { %4824 = vmatpush2.bf16.msra.mxu0 %v6305_v2  ;;  %4850 = vmatprep.subr.bf16.mxu1 %v6316_v54  ;;  %v6392_v2 = vld [vmem:[%s8940_s3 + $0x8] ss:$12 sps:$4 sm:$0xff]   ;;  %v6393_v54 = vld [vmem:[%s8940_s3 + $0x2f0] ss:$12 sps:$4 sm:$0xff]  }
 0x316   :  { %4825 = vmatprep.subr.bf16.mxu0 %v6313_v23  ;;  %v8959_v23 = vld [vmem:[#allocation10_spill] sm:$0xff] }
 0x318   :  { %4851 = vmatpush1.bf16.msra.mxu1 %v6314_v34  ;;  %v1696_v34 = vpack.c.bf16 %v8959_v23, %v8959_v23  ;;  %v6459_v23 = vld [vmem:[%s8943_s6 + $0x70] sm:$0xff]  }
 0x319   :  { %4826 = vmatpush2.bf16.msra.mxu0 %v6311_v16  ;;  %4852 = vmatprep.subr.bf16.mxu1 %v6322_v13  ;;  %v6395_v16 = vld [vmem:[%s8940_s3 + $0x2d8] ss:$12 sps:$4 sm:$0xff]  }
 0x31a   :  { %4827 = vmatprep.subr.bf16.mxu0 %v6319_v63  ;;  %v6396_v13 = vld [vmem:[%s8940_s3 + $0x218] ss:$12 sps:$4 sm:$0xff]   ;;  %v6397_v63 = vld [vmem:[%s8940_s3 + $0x2c0] ss:$12 sps:$4 sm:$0xff]  }
 0x31c   :  { %4853 = vmatpush1.bf16.msra.mxu1 %v6320_v15  ;;  %v6398_v15 = vld [vmem:[%s8940_s3 + $0x200] ss:$12 sps:$4 sm:$0xff]  }
 0x31d   :  { %4828 = vmatpush2.bf16.msra.mxu0 %v6317_v25  ;;  %4854 = vmatprep.subr.bf16.mxu1 %v6328_v47  ;;  %v6399_v25 = vld [vmem:[%s8940_s3 + $0x2a8] ss:$12 sps:$4 sm:$0xff]   ;;  %v6409_v47 = vld [vmem:[%s8942_s5 + $0x70] ss:$8 sps:$4 sm:$0xff]  }
 0x31e   :  { %4829 = vmatprep.subr.bf16.mxu0 %v6325_v10  ;;  %v6414_v10 = vld [vmem:[%s8942_s5 + $0x64] ss:$8 sps:$4 sm:$0xff]  }
 0x320   :  { %4855 = vmatpush1.bf16.msra.mxu1 %v6326_v48  ;;  %v6400_v48 = vld [vmem:[%s8940_s3 + $0x1e8] ss:$12 sps:$4 sm:$0xff]  }
 0x321   :  { %4830 = vmatpush2.bf16.msra.mxu0 %v6323_v61  ;;  %4856 = vmatprep.subr.bf16.mxu1 %v6334_v24  ;;  %v6412_v61 = vld [vmem:[%s8942_s5 + $0x60] ss:$8 sps:$4 sm:$0xff]   ;;  %v6401_v24 = vld [vmem:[%s8940_s3 + $0x290] ss:$12 sps:$4 sm:$0xff]  }
 0x322   :  { %4831 = vmatprep.subr.bf16.mxu0 %v6331_v44  ;;  %v6417_v44 = vld [vmem:[%s8942_s5 + $0x54] ss:$8 sps:$4 sm:$0xff]  }
 0x324   :  { %4857 = vmatpush1.bf16.msra.mxu1 %v6332_v52  ;;  %v6402_v52 = vld [vmem:[%s8940_s3 + $0x1d0] ss:$12 sps:$4 sm:$0xff]  }
 0x325   :  { %4832 = vmatpush2.bf16.msra.mxu0 %v6329_v22  ;;  %4858 = vmatprep.subr.bf16.mxu1 %v6340_v59  ;;  %v6415_v22 = vld [vmem:[%s8942_s5 + $0x50] ss:$8 sps:$4 sm:$0xff]  }
 0x326   :  { %4833 = vmatprep.subr.bf16.mxu0 %v6337_v60  ;;  %v6403_v59 = vld [vmem:[%s8940_s3 + $0x278] ss:$12 sps:$4 sm:$0xff]  }
 0x327   :  { %v6420_v60 = vld [vmem:[%s8942_s5 + $0x44] ss:$8 sps:$4 sm:$0xff]  }
 0x328   :  { %4859 = vmatpush1.bf16.msra.mxu1 %v6338_v17  ;;  %v6404_v17 = vld [vmem:[%s8940_s3 + $0x1b8] ss:$12 sps:$4 sm:$0xff]  }
 0x329   :  { %4834 = vmatpush2.bf16.msra.mxu0 %v6335_v5  ;;  %4860 = vmatprep.subr.bf16.mxu1 %v6346_v36  ;;  %v6418_v5 = vld [vmem:[%s8942_s5 + $0x40] ss:$8 sps:$4 sm:$0xff]  }
 0x32a   :  { %4835 = vmatprep.subr.bf16.mxu0 %v6343_v14  ;;  %v6405_v36 = vld [vmem:[%s8940_s3 + $0x260] ss:$12 sps:$4 sm:$0xff]   ;;  %v6423_v14 = vld [vmem:[%s8942_s5 + $0x34] ss:$8 sps:$4 sm:$0xff]  }
 0x32c   :  { %4861 = vmatpush1.bf16.msra.mxu1 %v6344_v38  ;;  %v6406_v38 = vld [vmem:[%s8940_s3 + $0x1a0] ss:$12 sps:$4 sm:$0xff]  }
 0x32d   :  { %4836 = vmatpush2.bf16.msra.mxu0 %v6341_v18  ;;  %4862 = vmatprep.subr.bf16.mxu1 %v6352_v33  ;;  %v6421_v18 = vld [vmem:[%s8942_s5 + $0x30] ss:$8 sps:$4 sm:$0xff]   ;;  %v6407_v33 = vld [vmem:[%s8940_s3 + $0x248] ss:$12 sps:$4 sm:$0xff]  }
 0x32e   :  { %4837 = vmatprep.subr.bf16.mxu0 %v6349_v42  ;;  %v6408_v42 = vld [vmem:[%s8940_s3 + $0x188] ss:$12 sps:$4 sm:$0xff]  }
 0x330   :  { %4863 = vmatpush1.bf16.msra.mxu1 %v6350_v30  ;;  %v6426_v30 = vld [vmem:[%s8942_s5 + $0x24] ss:$8 sps:$4 sm:$0xff]  }
 0x331   :  { %4838 = vmatpush2.bf16.msra.mxu0 %v6347_v51  ;;  %4864 = vmatprep.subr.bf16.mxu1 %v6355_v57  ;;  %v6424_v51 = vld [vmem:[%s8942_s5 + $0x20] ss:$8 sps:$4 sm:$0xff]   ;;  %v6427_v57 = vld [vmem:[%s8942_s5 + $0x10] ss:$8 sps:$4 sm:$0xff]  }
 0x332   :  { %5991 = vmatprep.subr.bf16.mxu0 %v6356_v49  ;;  %v6429_v49 = vld [vmem:[%s8942_s5 + $0x14] ss:$8 sps:$4 sm:$0xff]  }
 0x334   :  { %4840 = vmatmul.mubr.bf16.vlgmr.msra.gmra.mxu0 %v8644_v58  ;;  %4865 = vmatpush2.bf16.msra.mxu1 %v6353_v56  ;;  %v6432_v56 = vld [vmem:[%s8942_s5 + $0x4] ss:$8 sps:$4 sm:$0xff]  }
 0x335   :  { %5992 = vmatpush3.bf16.msra.mxu0 %v6357_v50  ;;  %4921 = vmatprep.mubr.bf16.mxu0 %v8443_v7  ;;  %v6367_v7 = vld [vmem:[%s8940_s3 + $0x80] ss:$12 sps:$4 sm:$0xff]  }
 0x336   :  { %4866 = vmatprep.subr.bf16.mxu1 %v6360_v41  ;;  %5993 = vmatprep.subr.bf16.mxu0 %v6361_v6  ;;  %v6430_v50 = vld [vmem:[%s8942_s5] ss:$8 sps:$4 sm:$0xff]   ;;  %v6438_v41 = vld [vmem:[%s8942_s5 + $0xe4] ss:$8 sps:$4 sm:$0xff]  }
 0x337   :  { %v6436_v6 = vld [vmem:[%s8942_s5 + $0xe0] ss:$8 sps:$4 sm:$0xff]  }
 0x338   :  { %4867 = vmatpush2.bf16.msra.mxu1 %v6358_v32  ;;  %v6441_v32 = vld [vmem:[%s8942_s5 + $0xd4] ss:$8 sps:$4 sm:$0xff]  }
 0x339   :  { %5994 = vmatpush3.bf16.msra.mxu0 %v6362_v21  ;;  %4868 = vmatprep.subr.bf16.mxu1 %v6365_v20  ;;  %v6439_v21 = vld [vmem:[%s8942_s5 + $0xd0] ss:$8 sps:$4 sm:$0xff]   ;;  %v6444_v20 = vld [vmem:[%s8942_s5 + $0xc4] ss:$8 sps:$4 sm:$0xff]  }
 0x33a   :  { %5995 = vmatprep.subr.bf16.mxu0 %v6366_v40  ;;  %v6442_v40 = vld [vmem:[%s8942_s5 + $0xc0] ss:$8 sps:$4 sm:$0xff]  }
 0x33c   :  { %4869 = vmatpush2.bf16.msra.mxu1 %v6363_v28  ;;  %v6447_v28 = vld [vmem:[%s8942_s5 + $0xb4] ss:$8 sps:$4 sm:$0xff]  }
 0x33d   :  { %5996 = vmatpush3.bf16.msra.mxu0 %v6367_v7  ;;  %4870 = vmatprep.subr.bf16.mxu1 %v6370_v55  ;;  %v6445_v7 = vld [vmem:[%s8942_s5 + $0xb0] ss:$8 sps:$4 sm:$0xff]  }
 0x33e   :  { %5997 = vmatprep.subr.bf16.mxu0 %v6371_v45  ;;  %v6450_v45 = vld [vmem:[%s8942_s5 + $0xa4] ss:$8 sps:$4 sm:$0xff]  }
 0x340   :  { %4871 = vmatpush2.bf16.msra.mxu1 %v6368_v46  ;;  %v6448_v46 = vld [vmem:[%s8942_s5 + $0xa0] ss:$8 sps:$4 sm:$0xff]  }
 0x341   :  { %5998 = vmatpush3.bf16.msra.mxu0 %v6372_v3  ;;  %4872 = vmatprep.subr.bf16.mxu1 %v6375_v62 }
 0x342   :  { %5999 = vmatprep.subr.bf16.mxu0 %v6376_v31  ;;  %v6453_v31 = vld [vmem:[%s8942_s5 + $0x94] ss:$8 sps:$4 sm:$0xff]  }
 0x344   :  { %4873 = vmatpush2.bf16.msra.mxu1 %v6373_v19  ;;  %v6451_v19 = vld [vmem:[%s8942_s5 + $0x90] ss:$8 sps:$4 sm:$0xff]  }
 0x345   :  { %6000 = vmatpush3.bf16.msra.mxu0 %v6377_v27  ;;  %4874 = vmatprep.subr.bf16.mxu1 %v6380_v29  ;;  %v6454_v29 = vld [vmem:[%s8942_s5 + $0x80] ss:$8 sps:$4 sm:$0xff]  }
 0x346   :  { %6001 = vmatprep.subr.bf16.mxu0 %v6381_v4  ;;  %v6456_v4 = vld [vmem:[%s8942_s5 + $0x84] ss:$8 sps:$4 sm:$0xff]  }
 0x348   :  { %4875 = vmatpush2.bf16.msra.mxu1 %v6378_v37 }
 0x349   :  { %6002 = vmatpush3.bf16.msra.mxu0 %v6382_v8  ;;  %4876 = vmatprep.subr.bf16.mxu1 %v6385_v39 }
 0x34a   :  { %6003 = vmatprep.subr.bf16.mxu0 %v6386_v1 }
 0x34c   :  { %4877 = vmatpush2.bf16.msra.mxu1 %v6383_v35 }
 0x34d   :  { %6004 = vmatpush3.bf16.msra.mxu0 %v6387_v53  ;;  %4878 = vmatprep.subr.bf16.mxu1 %v6390_v9 }
 0x34e   :  { %6005 = vmatprep.subr.bf16.mxu0 %v6391_v12 }
 0x350   :  { %4879 = vmatpush2.bf16.msra.mxu1 %v6388_v43 }
 0x351   :  { %6006 = vmatpush3.bf16.msra.mxu0 %v6392_v2  ;;  %6013 = vmatprep.subr.bf16.mxu1 %v6393_v54  ;;  %v6457_v54 = vld [vmem:[%s8943_s6 + $0x78] sm:$0xff]  }
 0x353   :  { %4881 = vmatmul.mubr.bf16.vlgmr.msra.gmra.mxu1 %v1696_v34 }
 0x354   :  { %4922 = vmatmul.mubr.bf16.vlgmr.msra.gmra.mxu0 %v8644_v58  ;;  %6014 = vmatpush3.bf16.msra.mxu1 %v6394_v11  ;;  %v6433_v58 = vld [vmem:[%s8942_s5 + $0xf0] ss:$8 sps:$4 sm:$0xff]  }
 0x355   :  { %4961 = vmatprep.mubr.bf16.mxu1 %v8545_v0  ;;  %6015 = vmatprep.subr.bf16.mxu1 %v6395_v16  ;;  %v6411_v0 = vld [vmem:[%s8942_s5 + $0x74] ss:$8 sps:$4 sm:$0xff]  }
 0x356   :  { %5185 = vmatprep.subr.bf16.mxu0 %v6411_v0  ;;  %v6458_v11 = vld [vmem:[%s8943_s6 + $0x38] sm:$0xff]   ;;  %v6460_v16 = vld [vmem:[%s8943_s6 + $0x30] sm:$0xff]  }
 0x357   :  { %5186 = vmatpush1.bf16.msra.mxu0 %v6409_v47  ;;  %v6465_v47 = vld [vmem:[%s8943_s6 + $0x58] sm:$0xff]  }
 0x358   :  { %6016 = vmatpush3.bf16.msra.mxu1 %v6396_v13  ;;  %5187 = vmatprep.subr.bf16.mxu0 %v6414_v10  ;;  %v6461_v13 = vld [vmem:[%s8943_s6 + $0x68] sm:$0xff]   ;;  %v6466_v0 = vld [vmem:[%s8943_s6 + $0x18] sm:$0xff]   ;;  %v6467_v10 = vld [vmem:[%s8943_s6 + $0x50] sm:$0xff]  }
 0x359   :  { %6017 = vmatprep.subr.bf16.mxu1 %v6397_v63  ;;  %v6462_v63 = vld [vmem:[%s8943_s6 + $0x28] sm:$0xff]  }
 0x35b   :  { %5188 = vmatpush1.bf16.msra.mxu0 %v6412_v61 }
 0x35c   :  { %6018 = vmatpush3.bf16.msra.mxu1 %v6398_v15  ;;  %5189 = vmatprep.subr.bf16.mxu0 %v6417_v44  ;;  %v6463_v15 = vld [vmem:[%s8943_s6 + $0x60] sm:$0xff]  }
 0x35d   :  { %6019 = vmatprep.subr.bf16.mxu1 %v6399_v25  ;;  %v6464_v25 = vld [vmem:[%s8943_s6 + $0x20] sm:$0xff]  }
 0x35f   :  { %5190 = vmatpush1.bf16.msra.mxu0 %v6415_v22 }
 0x360   :  { %6020 = vmatpush3.bf16.msra.mxu1 %v6400_v48  ;;  %5191 = vmatprep.subr.bf16.mxu0 %v6420_v60  ;;  %v6468_v48 = vld [vmem:[%s8943_s6 + $0x10] sm:$0xff]  }
 0x361   :  { %6021 = vmatprep.subr.bf16.mxu1 %v6401_v24 }
 0x363   :  { %5192 = vmatpush1.bf16.msra.mxu0 %v6418_v5 }
 0x364   :  { %6022 = vmatpush3.bf16.msra.mxu1 %v6402_v52  ;;  %5193 = vmatprep.subr.bf16.mxu0 %v6423_v14  ;;  %v4969_v14 = vld [vmem:[%s8941_s4] sm:$0x7] }
 0x365   :  { %6023 = vmatprep.subr.bf16.mxu1 %v6403_v59 }
 0x367   :  { %5194 = vmatpush1.bf16.msra.mxu0 %v6421_v18  ;;  %v8960_v18 = vld [vmem:[#allocation5_spill] sm:$0xff] }
 0x368   :  { %6024 = vmatpush3.bf16.msra.mxu1 %v6404_v17  ;;  %5195 = vmatprep.subr.bf16.mxu0 %v6426_v30 }
 0x369   :  { %6025 = vmatprep.subr.bf16.mxu1 %v6405_v36 }
 0x36b   :  { %5196 = vmatpush1.bf16.msra.mxu0 %v6424_v51 }
 0x36c   :  { %6026 = vmatpush3.bf16.msra.mxu1 %v6406_v38  ;;  %5197 = vmatprep.subr.bf16.mxu0 %v6429_v49  ;;  %v8961_v49 = vld [vmem:[#allocation6_spill] sm:$0xff] }
 0x36d   :  { %6027 = vmatprep.subr.bf16.mxu1 %v6407_v33  ;;  %v4974_v33 = vrot.slane %v4969_v14, %v8960_v18 }
 0x36f   :  { %5198 = vmatpush1.bf16.msra.mxu0 %v6427_v57 }
 0x370   :  { %6028 = vmatpush3.bf16.msra.mxu1 %v6408_v42  ;;  %5199 = vmatprep.subr.bf16.mxu0 %v6432_v56  ;;  %v4978_v56 = vrot.slane %v4969_v14, %v8961_v49 }
 0x371   :  { %6035 = vmatprep.subr.bf16.mxu1 %v6457_v54 }
 0x373   :  { %4962 = vmatmul.mubr.bf16.vlgmr.msra.gmra.mxu1 %v1696_v34  ;;  %5200 = vmatpush1.bf16.msra.mxu0 %v6430_v50 }
 0x374   :  { %5201 = vmatprep.subr.bf16.mxu0 %v6435_v26  ;;  %6036 = vmatpush3.bf16.msra.mxu1 %v6458_v11 }
 0x375   :  { %6037 = vmatprep.subr.bf16.mxu1 %v6459_v23 }
 0x377   :  { %5202 = vmatpush2.bf16.msra.mxu0 %v6433_v58 }
 0x378   :  { %5203 = vmatprep.subr.bf16.mxu0 %v6438_v41  ;;  %6038 = vmatpush3.bf16.msra.mxu1 %v6460_v16 }
 0x379   :  { %6039 = vmatprep.subr.bf16.mxu1 %v6461_v13 }
 0x37b   :  { %5204 = vmatpush2.bf16.msra.mxu0 %v6436_v6 }
 0x37c   :  { %5205 = vmatprep.subr.bf16.mxu0 %v6441_v32  ;;  %6040 = vmatpush3.bf16.msra.mxu1 %v6462_v63 }
 0x37d   :  { %6041 = vmatprep.subr.bf16.mxu1 %v6463_v15 }
 0x37f   :  { %5206 = vmatpush2.bf16.msra.mxu0 %v6439_v21 }
 0x380   :  { %5207 = vmatprep.subr.bf16.mxu0 %v6444_v20  ;;  %6042 = vmatpush3.bf16.msra.mxu1 %v6464_v25 }
 0x381   :  { %6043 = vmatprep.subr.bf16.mxu1 %v6465_v47 }
 0x383   :  { %5208 = vmatpush2.bf16.msra.mxu0 %v6442_v40 }
 0x384   :  { %5209 = vmatprep.subr.bf16.mxu0 %v6447_v28  ;;  %6044 = vmatpush3.bf16.msra.mxu1 %v6466_v0 }
 0x385   :  { %6045 = vmatprep.subr.bf16.mxu1 %v6467_v10 }
 0x387   :  { %5210 = vmatpush2.bf16.msra.mxu0 %v6445_v7 }
 0x388   :  { %5211 = vmatprep.subr.bf16.mxu0 %v6450_v45  ;;  %6046 = vmatpush3.bf16.msra.mxu1 %v6468_v48 }
 0x38b   :  { %5212 = vmatpush2.bf16.msra.mxu0 %v6448_v46 }
 0x38c   :  { %5213 = vmatprep.subr.bf16.mxu0 %v6453_v31 }
 0x38f   :  { %5214 = vmatpush2.bf16.msra.mxu0 %v6451_v19 }
 0x390   :  { %5215 = vmatprep.subr.bf16.mxu0 %v6456_v4 }
 0x393   :  { %v4167_v55 = vpop.f32.mrf.mxu0  ;;  %5216 = vmatpush2.bf16.msra.mxu0 %v6454_v29 }
 0x395   :  { %v4169_v3 = vpop.f32.mrf.mxu0 }
 0x397   :  { %v4171_v62 = vpop.f32.mrf.mxu0 }
 0x399   :  { %v4172_v27 = vpop.f32.mrf.mxu0 }
 0x39a   :  { %v8962_v27 = vld [vmem:[#allocation7_spill] sm:$0xff] }
 0x39b   :  { %v4982_v29 = vrot.slane %v4969_v14, %v8962_v27 }
 0x3b3   :  { %v4208_v37 = vpop.f32.mrf.mxu1  ;;  %v5963_v8 = vpop.f32.mrf.mxu0 }
 0x3b4   :  { %v4209_v39 = vadd.f32 %v4208_v37, %v4167_v55 }
 0x3b5   :  { %v4210_v1 = vpop.f32.mrf.mxu1  ;;  %v5964_v35 = vpop.f32.mrf.mxu0 }
 0x3b6   :  { %v4211_v53 = vadd.f32 %v4210_v1, %v4169_v3  ;;  %v5965_v9 = vadd.f32 %v5964_v35, %v5963_v8  ;;  %v6469_v1 = vld [vmem:[%s8943_s6 + $0x48] sm:$0xff]  }
 0x3b7   :  { %v4212_v12 = vpop.f32.mrf.mxu1  ;;  %v5966_v43 = vpop.f32.mrf.mxu0  ;;  %v6470_v35 = vld [vmem:[%s8943_s6 + $0x8] sm:$0xff]   ;;  %6047 = vmatprep.subr.bf16.mxu1 %v6469_v1 }
 0x3b8   :  { %6048 = vmatpush3.bf16.msra.mxu1 %v6470_v35 }
 0x3b9   :  { %v4213_v2 = vpop.f32.mrf.mxu1  ;;  %v5967_v34 = vpop.f32.mrf.mxu0 }
 0x3d3   :  { %v5985_v61 = vpop.f32.mrf.mxu1 }
 0x3d5   :  { %v5986_v24 = vpop.f32.mrf.mxu1 }
 0x3d6   :  { %v5987_v44 = vadd.f32 %v5986_v24, %v5985_v61 }
 0x3d7   :  { %v5988_v52 = vpop.f32.mrf.mxu1 }
 0x3d8   :  { %v4290_v22 = vadd.f32 %v5987_v44, %v5965_v9  ;;  %v6472_v9 = vld [vmem:[%s8943_s6] sm:$0xff]  }
 0x3d9   :  { %v5989_v59 = vpop.f32.mrf.mxu1 }
 0x3f4   :  { %v4841_v60 = vpop.f32.mrf.mxu0 }
 0x3f5   :  { %v4842_v38 = vadd.f32 %v4841_v60, %v4209_v39 }
 0x3f6   :  { %v4843_v17 = vpop.f32.mrf.mxu0 }
 0x3f7   :  { %v4844_v30 = vadd.f32 %v4843_v17, %v4211_v53  ;;  %v6471_v53 = vld [vmem:[%s8943_s6 + $0x40] sm:$0xff]   ;;  %s6503_s6 = smov 117  }
 0x3f8   :  { %v4845_v5 = vpop.f32.mrf.mxu0  ;;  %6049 = vmatprep.subr.bf16.mxu1 %v6471_v53 }
 0x3f9   :  { %6050 = vmatpush3.bf16.msra.mxu1 %v6472_v9 }
 0x3fa   :  { %v4846_v36 = vpop.f32.mrf.mxu0 }
 0x413   :  { %v4882_v42 = vpop.f32.mrf.mxu1 }
 0x414   :  { %v4883_v51 = vadd.f32 %v4882_v42, %v4842_v38  ;;  %v6007_v57 = vpop.f32.mrf.mxu0 }
 0x415   :  { %v4884_v50 = vpop.f32.mrf.mxu1 }
 0x416   :  { %v4986_v26 = vadd.f32 %v4974_v33, %v4883_v51  ;;  %v4885_v58 = vadd.f32 %v4884_v50, %v4844_v30  ;;  %v6008_v41 = vpop.f32.mrf.mxu0 }
 0x417   :  { %v6009_v6 = vadd.f32 %v6008_v41, %v6007_v57  ;;  %v4886_v32 = vpop.f32.mrf.mxu1 }
 0x418   :  { %v4987_v21 = vadd.f32 %v4978_v56, %v4885_v58  ;;  %v6010_v20 = vpop.f32.mrf.mxu0  ;;  %v4989_v40 = vmax.f32 %v4986_v26, 0.0 }
 0x419   :  { %v4924_v28 = vadd.f32 %v6009_v6, %v4290_v22  ;;  %v4887_v7 = vpop.f32.mrf.mxu1 }
 0x41a   :  { %v4990_v55 = vmax.f32 %v4987_v21, 0.0  ;;  %v6011_v45 = vpop.f32.mrf.mxu0  ;;  %v4991_v3 = vpack.c.bf16 %v4989_v40, %v4989_v40 }
 0x41c   :  { %v4992_v46 = vpack.c.bf16 %v4990_v55, %v4990_v55 }
 0x41e   :  { %5217 = vmatprep.mubr.bf16.mxu0 %v4992_v46 }
 0x41f   :  { %5218 = vmatmul.mubr.bf16.vlgmr.msra.gmra.mxu0 %v4991_v3 }
 0x433   :  { %v6029_v62 = vpop.f32.mrf.mxu1 }
 0x435   :  { %v6030_v31 = vpop.f32.mrf.mxu1 }
 0x436   :  { %v6031_v19 = vadd.f32 %v6030_v31, %v6029_v62 }
 0x437   :  { %v6032_v4 = vpop.f32.mrf.mxu1 }
 0x438   :  { %v4964_v37 = vadd.f32 %v6031_v19, %v4924_v28 }
 0x439   :  { %v6033_v8 = vpop.f32.mrf.mxu1 }
 0x43a   :  { %v4988_v39 = vadd.f32 %v4982_v29, %v4964_v37 }
 0x4df   :  { %v5219_v12 = vpop.f32.mrf.mxu0 }
 0x4e0   :  { %v5226_v43 = vmax.f32 %v5219_v12, 0.0 }
 0x4e1   :  { %v5221_v2 = vpop.f32.mrf.mxu0 }
 0x4e2   :  { %v5227_v54 = vmax.f32 %v5221_v2, 0.0  ;;  %v5228_v34 = vpack.c.bf16 %v5226_v43, %v5226_v43 }
 0x4e3   :  { %v5223_v11 = vpop.f32.mrf.mxu0 }
 0x4e4   :  { %v5229_v23 = vpack.c.bf16 %v5227_v54, %v5227_v54 }
 0x4e5   :  { %v5224_v16 = vpop.f32.mrf.mxu0 }
 0x4e6   :  { %5390 = vmatprep.mubr.bf16.mxu1 %v5229_v23 }
 0x4e7   :  { %5391 = vmatmul.mubr.bf16.vlgmr.msra.gmra.mxu1 %v5228_v34 }
 0x5a7   :  { %v6051_v13 = vpop.f32.mrf.mxu1 }
 0x5a9   :  { %v6052_v63 = vpop.f32.mrf.mxu1 }
 0x5aa   :  { %v6053_v15 = vadd.f32 %v6052_v63, %v6051_v13 }
 0x5ab   :  { %v6054_v25 = vpop.f32.mrf.mxu1 }
 0x5ac   :  { %v5398_v47 = vsub.f32 0.0, %v6053_v15 }
 0x5ad   :  { %v6055_v0 = vpop.f32.mrf.mxu1 }
 0x5ae   :  { %v5399_v10 = vmul.f32 1.442695, %v5398_v47 }
 0x5b0   :  { %6473 = vpow2.f32 %v5399_v10 }
 0x5bd   :  { %v6474_v48 = vpop.eup %6473 }
 0x5be   :  { %v5401_v61 = vadd.f32 1.0, %v6474_v48 }
 0x5c0   :  { %6475 = vrcp.f32 %v5401_v61 }
 0x5cd   :  { %v6476_v24 = vpop.eup %6475 }
 0x5ce   :  { %v5404_v44 = vmul.f32 %v6476_v24, %v4988_v39 }
 0x5d0   :  { %5406 = vrot.lane.b32.xlu0 %v5404_v44, %s6503_s6 }
 0x642   :  { %v5407_v52 = vpop.permute.xlu0 %5406 }
 0x643   :  { %v5409_v22 = vadd.f32 %v5407_v52, %v5404_v44 }
 0x645   :  { %5411 = vst.msk [vmem:[#allocation2] sm:$0x3] %vm5410_vm4, %v5409_v22 }
 0x646   :  { %6490 = shalt.err (!%p6487_p4)
}
 0x647   :  { %5421 = dma.vmem_to_hbm [thread:$0]  %s5419_s13, 32, %s8944_s7, [#allocation3]  }
 0x648   :  { %6499 = dma.done.wait [#allocation3], 32  }
 0x649   :  { %6500 = vsyncadd [#allocation3], 4294967264 }
 0x64a   :  { %5425 = vsyncpa [#allocation3], 1 }

</bundles_post_ra>
